<compile_context>
chip_gen: v7x
topology: tpu7x:2x2x1
jax: 0.10.0
libtpu: 0.0.40
codegen_flags: <defaults>
</compile_context>

<pallas_src>
import jax
import jax.numpy as jnp
from jax.experimental import pallas as pl
from jax.experimental.pallas import tpu as pltpu

IN_DIM = 28 * 28                       # 784
LAYER_DIMS = [IN_DIM, 128, 64, 36, 18, 9, 18, 36, 64, 128, IN_DIM]
NUM_LAYERS = len(LAYER_DIMS) - 1       # 10
# PyTorch Sequential: encoder = 4x(Linear,ReLU) + Linear(18,9) [no activation];
# decoder = 4x(Linear,ReLU) + Linear(128,784) + Sigmoid.
ACTIVATIONS = ["relu", "relu", "relu", "relu", None,
               "relu", "relu", "relu", "relu", "sigmoid"]

# Layers 5 (18->9, no activation) and 6 (9->18) folded into one 18->18 linear.
FUSED_DIMS = [IN_DIM, 128, 64, 36, 18, 18, 36, 64, 128, IN_DIM]
NUM_FUSED = len(FUSED_DIMS) - 1        # 9
FUSED_ACTS = ["relu"] * 8 + ["sigmoid"]

LANE = 128


def _round_up(x, m):
    return ((x + m - 1) // m) * m


# All widths padded to lane-dense multiples of 128 (784 -> 896).
PAD_DIMS = [_round_up(d, LANE) for d in FUSED_DIMS]
PAD_IN = PAD_DIMS[0]     # 896
PAD_OUT = PAD_DIMS[-1]   # 896


def _device_kind():
    try:
        return jax.devices()[0].device_kind.lower()
    except Exception:
        return ""


def _use_bf16_epilogue():
    # bf16 VPU path exists on v6e / v7x; keep elementwise f32 on older chips.
    kind = _device_kind()
    return ("v6" in kind) or ("7" in kind)


def _default_min_steps():
    # v7x has 2 TensorCores per chip: give each core its own grid step.
    kind = _device_kind()
    return 2 if "7" in kind else 1


def dense_ae_kernel(x_ref, *refs):
    """refs = (w1..w9 [bf16, padded], b1..b9 [padded], out_ref)."""
    w_refs = refs[:NUM_FUSED]
    b_refs = refs[NUM_FUSED:2 * NUM_FUSED]
    out_ref = refs[2 * NUM_FUSED]

    h = x_ref[...]                                     # (TILE_B, 896) bf16
    for li in range(NUM_FUSED):
        acc = jnp.dot(h, w_refs[li][...],              # bf16 x bf16 -> f32 acc
                      preferred_element_type=jnp.float32)
        b = b_refs[li][...]
        if li == NUM_FUSED - 1:
            # Final layer: f32 bias-add + sigmoid via a single EUP tanh.
            z = acc + b
            out_ref[...] = (0.5 * jnp.tanh(0.5 * z) + 0.5).astype(out_ref.dtype)
        elif b.dtype == jnp.bfloat16:
            # bf16 epilogue (v6e / v7x): one cast, bf16 bias-add + ReLU.
            h = jnp.maximum(acc.astype(jnp.bfloat16) + b, 0.0)
        else:
            # f32 epilogue (v5e): f32 bias-add + ReLU, then cast for next MXU pass.
            h = jnp.maximum(acc + b, 0.0).astype(jnp.bfloat16)


def dense_ae_forward(x, weights_p, biases_p, *, max_tile_b=1024, min_steps=None):
    """x: (B, 784) f32. weights_p[i]: padded (in_p, out_p) bf16.
    biases_p[i]: padded (1, out_p), f32 (last layer / v5e) or bf16 (v6e/v7x)."""
    B, D = x.shape
    assert D == IN_DIM, x.shape
    if min_steps is None:
        min_steps = _default_min_steps()

    # As few, as large, grid steps as the VMEM budget allows; tile_b derived from
    # the step count so the last tile is never near-empty.
    n_steps = max(min_steps, -(-B // max_tile_b))
    tile_b = _round_up(-(-B // n_steps), 8)
    b_pad = n_steps * tile_b

    # bf16 activation input, zero-padded to lane-dense (b_pad, 896).
    x_p = jnp.pad(x.astype(jnp.bfloat16),
                  ((0, b_pad - B), (0, PAD_IN - IN_DIM)))

    def resident(shape):
        # Same block index every grid step -> stays VMEM-resident, no re-DMA.
        return pl.BlockSpec(shape, lambda i: (0, 0))

    in_specs = [pl.BlockSpec((tile_b, PAD_IN), lambda i: (i, 0))]
    in_specs += [resident(w.shape) for w in weights_p]
    in_specs += [resident(b.shape) for b in biases_p]

    out = pl.pallas_call(
        dense_ae_kernel,
        out_shape=jax.ShapeDtypeStruct((b_pad, PAD_OUT), jnp.float32),
        grid_spec=pl.GridSpec(
            grid=(n_steps,),
            in_specs=in_specs,
            out_specs=pl.BlockSpec((tile_b, PAD_OUT), lambda i: (i, 0)),
        ),
        compiler_params=pltpu.CompilerParams(
            dimension_semantics=("parallel",),
            vmem_limit_bytes=48 * 1024 * 1024,
        ),
    )(x_p, *weights_p, *biases_p)

    return out[:B, :IN_DIM]


def init_params(key):
    """Deterministic init mimicking nn.Linear default (uniform +-1/sqrt(fan_in)).

    Weights are stored pre-transposed as (in, out) so each layer is y = x @ W + b.
    """
    weights, biases = [], []
    for li in range(NUM_LAYERS):
        fan_in, fan_out = LAYER_DIMS[li], LAYER_DIMS[li + 1]
        key, kw, kb = jax.random.split(key, 3)
        bound = 1.0 / (fan_in ** 0.5)
        w = jax.random.uniform(kw, (fan_in, fan_out), jnp.float32, -bound, bound)
        b = jax.random.uniform(kb, (1, fan_out), jnp.float32, -bound, bound)
        weights.append(w)
        biases.append(b)
    return weights, biases


def fold_bottleneck(weights, biases):
    """Fold Linear(18,9) and Linear(9,18) (no activation between) into one 18->18
    layer, in full f32 precision (before any bf16 cast)."""
    w5, b5 = weights[4], biases[4]
    w6, b6 = weights[5], biases[5]
    w56 = w5 @ w6                  # (18, 18)
    b56 = b5 @ w6 + b6             # (1, 18)
    weights_f = weights[:4] + [w56] + weights[6:]
    biases_f = biases[:4] + [b56] + biases[6:]
    return weights_f, biases_f


def pad_params(weights_f, biases_f, bf16_epilogue):
    """Zero-pad all widths to multiples of 128 lanes; weights -> bf16.
    Non-final biases are pre-cast to bf16 when the bf16 epilogue is used."""
    weights_p, biases_p = [], []
    for li in range(NUM_FUSED):
        din, dout = FUSED_DIMS[li], FUSED_DIMS[li + 1]
        pin, pout = PAD_DIMS[li], PAD_DIMS[li + 1]
        w = jnp.zeros((pin, pout), jnp.float32).at[:din, :dout].set(weights_f[li])
        b = jnp.zeros((1, pout), jnp.float32).at[:, :dout].set(biases_f[li])
        weights_p.append(w.astype(jnp.bfloat16))
        if bf16_epilogue and li != NUM_FUSED - 1:
            b = b.astype(jnp.bfloat16)
        biases_p.append(b)
    return weights_p, biases_p


def reference_forward_fused(x, weights_f, biases_f, bf16_epilogue):
    """Pure-JAX reference mirroring the kernel's exact precision path."""
    h = x.astype(jnp.bfloat16)
    for li in range(NUM_FUSED):
        w = weights_f[li].astype(jnp.bfloat16)
        acc = jnp.dot(h, w, preferred_element_type=jnp.float32)
        b = biases_f[li]
        if li == NUM_FUSED - 1:
            h = 0.5 * jnp.tanh(0.5 * (acc + b)) + 0.5
        elif bf16_epilogue:
            h = jnp.maximum(acc.astype(jnp.bfloat16) + b.astype(jnp.bfloat16), 0.0)
        else:
            h = jnp.maximum(acc + b, 0.0).astype(jnp.bfloat16)
    return h


def reference_forward_f32(x, weights, biases):
    """Exact f32, unfolded 10-layer reference of the PyTorch module."""
    h = x
    for li in range(NUM_LAYERS):
        h = h @ weights[li] + biases[li]
        if ACTIVATIONS[li] == "relu":
            h = jnp.maximum(h, 0.0)
        elif ACTIVATIONS[li] == "sigmoid":
            h = jax.nn.sigmoid(h)
    return h


if __name__ == "__main__":
    key = jax.random.PRNGKey(0)
    key, kx = jax.random.split(key)

    B = 256  # small MNIST-like batch; max_tile_b=128 -> grid of >=2 exercises tiling
    x = jax.random.uniform(kx, (B, IN_DIM), jnp.float32)

    weights, biases = init_params(key)
    weights_f, biases_f = fold_bottleneck(weights, biases)
    bf16_ep = _use_bf16_epilogue()
    weights_p, biases_p = pad_params(weights_f, biases_f, bf16_ep)

    out = dense_ae_forward(x, weights_p, biases_p, max_tile_b=128)
    out = jax.block_until_ready(out)
    assert out.shape == (B, IN_DIM), out.shape

    # Tight check against a reference that uses the same precision path.
    ref = reference_forward_fused(x, weights_f, biases_f, bf16_ep)
    max_err = float(jnp.max(jnp.abs(out - ref)))
    assert max_err < 2e-3, f"matched-precision max err {max_err}"

    # Loose sanity check against the exact f32 unfolded module.
    ref_f32 = reference_forward_f32(x, weights, biases)
    max_err_f32 = float(jnp.max(jnp.abs(out - ref_f32)))
    assert max_err_f32 < 5e-2, f"f32-reference max err {max_err_f32}"

    print("KERNEL_OK")
</pallas_src>

<mosaic_0001>
module attributes {stable_mosaic.version = 11 : i64} {
  func.func @dense_ae_kernel(%arg0: i32, %arg1: memref<128x896xbf16, #tpu.memory_space<vmem>>, %arg2: memref<896x128xbf16, #tpu.memory_space<vmem>>, %arg3: memref<128x128xbf16, #tpu.memory_space<vmem>>, %arg4: memref<128x128xbf16, #tpu.memory_space<vmem>>, %arg5: memref<128x128xbf16, #tpu.memory_space<vmem>>, %arg6: memref<128x128xbf16, #tpu.memory_space<vmem>>, %arg7: memref<128x128xbf16, #tpu.memory_space<vmem>>, %arg8: memref<128x128xbf16, #tpu.memory_space<vmem>>, %arg9: memref<128x128xbf16, #tpu.memory_space<vmem>>, %arg10: memref<128x896xbf16, #tpu.memory_space<vmem>>, %arg11: memref<1x128xf32, #tpu.memory_space<vmem>>, %arg12: memref<1x128xf32, #tpu.memory_space<vmem>>, %arg13: memref<1x128xf32, #tpu.memory_space<vmem>>, %arg14: memref<1x128xf32, #tpu.memory_space<vmem>>, %arg15: memref<1x128xf32, #tpu.memory_space<vmem>>, %arg16: memref<1x128xf32, #tpu.memory_space<vmem>>, %arg17: memref<1x128xf32, #tpu.memory_space<vmem>>, %arg18: memref<1x128xf32, #tpu.memory_space<vmem>>, %arg19: memref<1x896xf32, #tpu.memory_space<vmem>>, %arg20: memref<128x896xf32, #tpu.memory_space<vmem>>) attributes {dimension_semantics = [#tpu.dimension_semantics<parallel>], iteration_bounds = array<i64: 2>, scalar_prefetch = 0 : i64, scratch_operands = 0 : i64, tpu.core_type = #tpu.core_type<tc>, window_params = [{transform_indices = @transform_0, window_bounds = array<i64: 128, 896>}, {pipeline_mode = #tpu.pipeline_mode<synchronous>, transform_indices = @transform_1, window_bounds = array<i64: 896, 128>}, {pipeline_mode = #tpu.pipeline_mode<synchronous>, transform_indices = @transform_2, window_bounds = array<i64: 128, 128>}, {pipeline_mode = #tpu.pipeline_mode<synchronous>, transform_indices = @transform_3, window_bounds = array<i64: 128, 128>}, {pipeline_mode = #tpu.pipeline_mode<synchronous>, transform_indices = @transform_4, window_bounds = array<i64: 128, 128>}, {pipeline_mode = #tpu.pipeline_mode<synchronous>, transform_indices = @transform_5, window_bounds = array<i64: 128, 128>}, {pipeline_mode = #tpu.pipeline_mode<synchronous>, transform_indices = @transform_6, window_bounds = array<i64: 128, 128>}, {pipeline_mode = #tpu.pipeline_mode<synchronous>, transform_indices = @transform_7, window_bounds = array<i64: 128, 128>}, {pipeline_mode = #tpu.pipeline_mode<synchronous>, transform_indices = @transform_8, window_bounds = array<i64: 128, 128>}, {pipeline_mode = #tpu.pipeline_mode<synchronous>, transform_indices = @transform_9, window_bounds = array<i64: 128, 896>}, {pipeline_mode = #tpu.pipeline_mode<synchronous>, transform_indices = @transform_10, window_bounds = array<i64: 1, 128>}, {pipeline_mode = #tpu.pipeline_mode<synchronous>, transform_indices = @transform_11, window_bounds = array<i64: 1, 128>}, {pipeline_mode = #tpu.pipeline_mode<synchronous>, transform_indices = @transform_12, window_bounds = array<i64: 1, 128>}, {pipeline_mode = #tpu.pipeline_mode<synchronous>, transform_indices = @transform_13, window_bounds = array<i64: 1, 128>}, {pipeline_mode = #tpu.pipeline_mode<synchronous>, transform_indices = @transform_14, window_bounds = array<i64: 1, 128>}, {pipeline_mode = #tpu.pipeline_mode<synchronous>, transform_indices = @transform_15, window_bounds = array<i64: 1, 128>}, {pipeline_mode = #tpu.pipeline_mode<synchronous>, transform_indices = @transform_16, window_bounds = array<i64: 1, 128>}, {pipeline_mode = #tpu.pipeline_mode<synchronous>, transform_indices = @transform_17, window_bounds = array<i64: 1, 128>}, {pipeline_mode = #tpu.pipeline_mode<synchronous>, transform_indices = @transform_18, window_bounds = array<i64: 1, 896>}, {transform_indices = @transform_19, window_bounds = array<i64: 128, 896>}]} {
    %c0 = arith.constant 0 : index
    %c0_0 = arith.constant 0 : index
    %0 = vector.load %arg1[%c0, %c0_0] : memref<128x896xbf16, #tpu.memory_space<vmem>>, vector<128x896xbf16>
    %c0_1 = arith.constant 0 : index
    %c0_2 = arith.constant 0 : index
    %1 = vector.load %arg2[%c0_1, %c0_2] : memref<896x128xbf16, #tpu.memory_space<vmem>>, vector<896x128xbf16>
    %cst = arith.constant dense<0.000000e+00> : vector<128x128xf32>
    %2 = tpu.matmul %0, %1, %cst {dimension_numbers = #tpu.dot_dimension_numbers<[1], [0], [0], [1], [0, 0, 1, 1], [], []>} : vector<128x896xbf16>, vector<896x128xbf16>, vector<128x128xf32> -> vector<128x128xf32>
    %c0_3 = arith.constant 0 : index
    %c0_4 = arith.constant 0 : index
    %3 = vector.load %arg11[%c0_3, %c0_4] : memref<1x128xf32, #tpu.memory_space<vmem>>, vector<1x128xf32>
    %4 = vector.broadcast %3 : vector<1x128xf32> to vector<128x128xf32>
    %5 = arith.addf %2, %4 : vector<128x128xf32>
    %cst_5 = arith.constant 0.000000e+00 : f32
    %6 = vector.broadcast %cst_5 : f32 to vector<128x128xf32>
    %7 = arith.maximumf %5, %6 : vector<128x128xf32>
    %8 = arith.truncf %7 : vector<128x128xf32> to vector<128x128xbf16>
    %c0_6 = arith.constant 0 : index
    %c0_7 = arith.constant 0 : index
    %9 = vector.load %arg3[%c0_6, %c0_7] : memref<128x128xbf16, #tpu.memory_space<vmem>>, vector<128x128xbf16>
    %cst_8 = arith.constant dense<0.000000e+00> : vector<128x128xf32>
    %10 = tpu.matmul %8, %9, %cst_8 {dimension_numbers = #tpu.dot_dimension_numbers<[1], [0], [0], [1], [0, 0, 1, 1], [], []>} : vector<128x128xbf16>, vector<128x128xbf16>, vector<128x128xf32> -> vector<128x128xf32>
    %c0_9 = arith.constant 0 : index
    %c0_10 = arith.constant 0 : index
    %11 = vector.load %arg12[%c0_9, %c0_10] : memref<1x128xf32, #tpu.memory_space<vmem>>, vector<1x128xf32>
    %12 = vector.broadcast %11 : vector<1x128xf32> to vector<128x128xf32>
    %13 = arith.addf %10, %12 : vector<128x128xf32>
    %cst_11 = arith.constant 0.000000e+00 : f32
    %14 = vector.broadcast %cst_11 : f32 to vector<128x128xf32>
    %15 = arith.maximumf %13, %14 : vector<128x128xf32>
    %16 = arith.truncf %15 : vector<128x128xf32> to vector<128x128xbf16>
    %c0_12 = arith.constant 0 : index
    %c0_13 = arith.constant 0 : index
    %17 = vector.load %arg4[%c0_12, %c0_13] : memref<128x128xbf16, #tpu.memory_space<vmem>>, vector<128x128xbf16>
    %cst_14 = arith.constant dense<0.000000e+00> : vector<128x128xf32>
    %18 = tpu.matmul %16, %17, %cst_14 {dimension_numbers = #tpu.dot_dimension_numbers<[1], [0], [0], [1], [0, 0, 1, 1], [], []>} : vector<128x128xbf16>, vector<128x128xbf16>, vector<128x128xf32> -> vector<128x128xf32>
    %c0_15 = arith.constant 0 : index
    %c0_16 = arith.constant 0 : index
    %19 = vector.load %arg13[%c0_15, %c0_16] : memref<1x128xf32, #tpu.memory_space<vmem>>, vector<1x128xf32>
    %20 = vector.broadcast %19 : vector<1x128xf32> to vector<128x128xf32>
    %21 = arith.addf %18, %20 : vector<128x128xf32>
    %cst_17 = arith.constant 0.000000e+00 : f32
    %22 = vector.broadcast %cst_17 : f32 to vector<128x128xf32>
    %23 = arith.maximumf %21, %22 : vector<128x128xf32>
    %24 = arith.truncf %23 : vector<128x128xf32> to vector<128x128xbf16>
    %c0_18 = arith.constant 0 : index
    %c0_19 = arith.constant 0 : index
    %25 = vector.load %arg5[%c0_18, %c0_19] : memref<128x128xbf16, #tpu.memory_space<vmem>>, vector<128x128xbf16>
    %cst_20 = arith.constant dense<0.000000e+00> : vector<128x128xf32>
    %26 = tpu.matmul %24, %25, %cst_20 {dimension_numbers = #tpu.dot_dimension_numbers<[1], [0], [0], [1], [0, 0, 1, 1], [], []>} : vector<128x128xbf16>, vector<128x128xbf16>, vector<128x128xf32> -> vector<128x128xf32>
    %c0_21 = arith.constant 0 : index
    %c0_22 = arith.constant 0 : index
    %27 = vector.load %arg14[%c0_21, %c0_22] : memref<1x128xf32, #tpu.memory_space<vmem>>, vector<1x128xf32>
    %28 = vector.broadcast %27 : vector<1x128xf32> to vector<128x128xf32>
    %29 = arith.addf %26, %28 : vector<128x128xf32>
    %cst_23 = arith.constant 0.000000e+00 : f32
    %30 = vector.broadcast %cst_23 : f32 to vector<128x128xf32>
    %31 = arith.maximumf %29, %30 : vector<128x128xf32>
    %32 = arith.truncf %31 : vector<128x128xf32> to vector<128x128xbf16>
    %c0_24 = arith.constant 0 : index
    %c0_25 = arith.constant 0 : index
    %33 = vector.load %arg6[%c0_24, %c0_25] : memref<128x128xbf16, #tpu.memory_space<vmem>>, vector<128x128xbf16>
    %cst_26 = arith.constant dense<0.000000e+00> : vector<128x128xf32>
    %34 = tpu.matmul %32, %33, %cst_26 {dimension_numbers = #tpu.dot_dimension_numbers<[1], [0], [0], [1], [0, 0, 1, 1], [], []>} : vector<128x128xbf16>, vector<128x128xbf16>, vector<128x128xf32> -> vector<128x128xf32>
    %c0_27 = arith.constant 0 : index
    %c0_28 = arith.constant 0 : index
    %35 = vector.load %arg15[%c0_27, %c0_28] : memref<1x128xf32, #tpu.memory_space<vmem>>, vector<1x128xf32>
    %36 = vector.broadcast %35 : vector<1x128xf32> to vector<128x128xf32>
    %37 = arith.addf %34, %36 : vector<128x128xf32>
    %cst_29 = arith.constant 0.000000e+00 : f32
    %38 = vector.broadcast %cst_29 : f32 to vector<128x128xf32>
    %39 = arith.maximumf %37, %38 : vector<128x128xf32>
    %40 = arith.truncf %39 : vector<128x128xf32> to vector<128x128xbf16>
    %c0_30 = arith.constant 0 : index
    %c0_31 = arith.constant 0 : index
    %41 = vector.load %arg7[%c0_30, %c0_31] : memref<128x128xbf16, #tpu.memory_space<vmem>>, vector<128x128xbf16>
    %cst_32 = arith.constant dense<0.000000e+00> : vector<128x128xf32>
    %42 = tpu.matmul %40, %41, %cst_32 {dimension_numbers = #tpu.dot_dimension_numbers<[1], [0], [0], [1], [0, 0, 1, 1], [], []>} : vector<128x128xbf16>, vector<128x128xbf16>, vector<128x128xf32> -> vector<128x128xf32>
    %c0_33 = arith.constant 0 : index
    %c0_34 = arith.constant 0 : index
    %43 = vector.load %arg16[%c0_33, %c0_34] : memref<1x128xf32, #tpu.memory_space<vmem>>, vector<1x128xf32>
    %44 = vector.broadcast %43 : vector<1x128xf32> to vector<128x128xf32>
    %45 = arith.addf %42, %44 : vector<128x128xf32>
    %cst_35 = arith.constant 0.000000e+00 : f32
    %46 = vector.broadcast %cst_35 : f32 to vector<128x128xf32>
    %47 = arith.maximumf %45, %46 : vector<128x128xf32>
    %48 = arith.truncf %47 : vector<128x128xf32> to vector<128x128xbf16>
    %c0_36 = arith.constant 0 : index
    %c0_37 = arith.constant 0 : index
    %49 = vector.load %arg8[%c0_36, %c0_37] : memref<128x128xbf16, #tpu.memory_space<vmem>>, vector<128x128xbf16>
    %cst_38 = arith.constant dense<0.000000e+00> : vector<128x128xf32>
    %50 = tpu.matmul %48, %49, %cst_38 {dimension_numbers = #tpu.dot_dimension_numbers<[1], [0], [0], [1], [0, 0, 1, 1], [], []>} : vector<128x128xbf16>, vector<128x128xbf16>, vector<128x128xf32> -> vector<128x128xf32>
    %c0_39 = arith.constant 0 : index
    %c0_40 = arith.constant 0 : index
    %51 = vector.load %arg17[%c0_39, %c0_40] : memref<1x128xf32, #tpu.memory_space<vmem>>, vector<1x128xf32>
    %52 = vector.broadcast %51 : vector<1x128xf32> to vector<128x128xf32>
    %53 = arith.addf %50, %52 : vector<128x128xf32>
    %cst_41 = arith.constant 0.000000e+00 : f32
    %54 = vector.broadcast %cst_41 : f32 to vector<128x128xf32>
    %55 = arith.maximumf %53, %54 : vector<128x128xf32>
    %56 = arith.truncf %55 : vector<128x128xf32> to vector<128x128xbf16>
    %c0_42 = arith.constant 0 : index
    %c0_43 = arith.constant 0 : index
    %57 = vector.load %arg9[%c0_42, %c0_43] : memref<128x128xbf16, #tpu.memory_space<vmem>>, vector<128x128xbf16>
    %cst_44 = arith.constant dense<0.000000e+00> : vector<128x128xf32>
    %58 = tpu.matmul %56, %57, %cst_44 {dimension_numbers = #tpu.dot_dimension_numbers<[1], [0], [0], [1], [0, 0, 1, 1], [], []>} : vector<128x128xbf16>, vector<128x128xbf16>, vector<128x128xf32> -> vector<128x128xf32>
    %c0_45 = arith.constant 0 : index
    %c0_46 = arith.constant 0 : index
    %59 = vector.load %arg18[%c0_45, %c0_46] : memref<1x128xf32, #tpu.memory_space<vmem>>, vector<1x128xf32>
    %60 = vector.broadcast %59 : vector<1x128xf32> to vector<128x128xf32>
    %61 = arith.addf %58, %60 : vector<128x128xf32>
    %cst_47 = arith.constant 0.000000e+00 : f32
    %62 = vector.broadcast %cst_47 : f32 to vector<128x128xf32>
    %63 = arith.maximumf %61, %62 : vector<128x128xf32>
    %64 = arith.truncf %63 : vector<128x128xf32> to vector<128x128xbf16>
    %c0_48 = arith.constant 0 : index
    %c0_49 = arith.constant 0 : index
    %65 = vector.load %arg10[%c0_48, %c0_49] : memref<128x896xbf16, #tpu.memory_space<vmem>>, vector<128x896xbf16>
    %cst_50 = arith.constant dense<0.000000e+00> : vector<128x896xf32>
    %66 = tpu.matmul %64, %65, %cst_50 {dimension_numbers = #tpu.dot_dimension_numbers<[1], [0], [0], [1], [0, 0, 1, 1], [], []>} : vector<128x128xbf16>, vector<128x896xbf16>, vector<128x896xf32> -> vector<128x896xf32>
    %c0_51 = arith.constant 0 : index
    %c0_52 = arith.constant 0 : index
    %67 = vector.load %arg19[%c0_51, %c0_52] : memref<1x896xf32, #tpu.memory_space<vmem>>, vector<1x896xf32>
    %68 = vector.broadcast %67 : vector<1x896xf32> to vector<128x896xf32>
    %69 = arith.addf %66, %68 : vector<128x896xf32>
    %cst_53 = arith.constant 5.000000e-01 : f32
    %70 = vector.broadcast %cst_53 : f32 to vector<128x896xf32>
    %71 = arith.mulf %70, %69 : vector<128x896xf32>
    %72 = math.tanh %71 : vector<128x896xf32>
    %cst_54 = arith.constant 5.000000e-01 : f32
    %73 = vector.broadcast %cst_54 : f32 to vector<128x896xf32>
    %74 = arith.mulf %73, %72 : vector<128x896xf32>
    %cst_55 = arith.constant 5.000000e-01 : f32
    %75 = vector.broadcast %cst_55 : f32 to vector<128x896xf32>
    %76 = arith.addf %74, %75 : vector<128x896xf32>
    %c0_56 = arith.constant 0 : index
    %c0_57 = arith.constant 0 : index
    %77 = vector.load %arg20[%c0_56, %c0_57] : memref<128x896xf32, #tpu.memory_space<vmem>>, vector<128x896xf32>
    tpu.vector_store %arg20[%c0_56, %c0_57], %76 {strides = array<i32>} : memref<128x896xf32, #tpu.memory_space<vmem>>, vector<128x896xf32>,
    return
  }
  func.func @transform_0(%arg0: i32) -> (i32, i32) {
    %c0_i32 = arith.constant 0 : i32
    %c0_i32_0 = arith.constant 0 : i32
    return %arg0, %c0_i32 : i32, i32
  }
  func.func @transform_1(%arg0: i32) -> (i32, i32) {
    %c0_i32 = arith.constant 0 : i32
    %c0_i32_0 = arith.constant 0 : i32
    %c0_i32_1 = arith.constant 0 : i32
    return %c0_i32, %c0_i32_0 : i32, i32
  }
  func.func @transform_2(%arg0: i32) -> (i32, i32) {
    %c0_i32 = arith.constant 0 : i32
    %c0_i32_0 = arith.constant 0 : i32
    %c0_i32_1 = arith.constant 0 : i32
    return %c0_i32, %c0_i32_0 : i32, i32
  }
  func.func @transform_3(%arg0: i32) -> (i32, i32) {
    %c0_i32 = arith.constant 0 : i32
    %c0_i32_0 = arith.constant 0 : i32
    %c0_i32_1 = arith.constant 0 : i32
    return %c0_i32, %c0_i32_0 : i32, i32
  }
  func.func @transform_4(%arg0: i32) -> (i32, i32) {
    %c0_i32 = arith.constant 0 : i32
    %c0_i32_0 = arith.constant 0 : i32
    %c0_i32_1 = arith.constant 0 : i32
    return %c0_i32, %c0_i32_0 : i32, i32
  }
  func.func @transform_5(%arg0: i32) -> (i32, i32) {
    %c0_i32 = arith.constant 0 : i32
    %c0_i32_0 = arith.constant 0 : i32
    %c0_i32_1 = arith.constant 0 : i32
    return %c0_i32, %c0_i32_0 : i32, i32
  }
  func.func @transform_6(%arg0: i32) -> (i32, i32) {
    %c0_i32 = arith.constant 0 : i32
    %c0_i32_0 = arith.constant 0 : i32
    %c0_i32_1 = arith.constant 0 : i32
    return %c0_i32, %c0_i32_0 : i32, i32
  }
  func.func @transform_7(%arg0: i32) -> (i32, i32) {
    %c0_i32 = arith.constant 0 : i32
    %c0_i32_0 = arith.constant 0 : i32
    %c0_i32_1 = arith.constant 0 : i32
    return %c0_i32, %c0_i32_0 : i32, i32
  }
  func.func @transform_8(%arg0: i32) -> (i32, i32) {
    %c0_i32 = arith.constant 0 : i32
    %c0_i32_0 = arith.constant 0 : i32
    %c0_i32_1 = arith.constant 0 : i32
    return %c0_i32, %c0_i32_0 : i32, i32
  }
  func.func @transform_9(%arg0: i32) -> (i32, i32) {
    %c0_i32 = arith.constant 0 : i32
    %c0_i32_0 = arith.constant 0 : i32
    %c0_i32_1 = arith.constant 0 : i32
    return %c0_i32, %c0_i32_0 : i32, i32
  }
  func.func @transform_10(%arg0: i32) -> (i32, i32) {
    %c0_i32 = arith.constant 0 : i32
    %c0_i32_0 = arith.constant 0 : i32
    %c0_i32_1 = arith.constant 0 : i32
    return %c0_i32, %c0_i32_0 : i32, i32
  }
  func.func @transform_11(%arg0: i32) -> (i32, i32) {
    %c0_i32 = arith.constant 0 : i32
    %c0_i32_0 = arith.constant 0 : i32
    %c0_i32_1 = arith.constant 0 : i32
    return %c0_i32, %c0_i32_0 : i32, i32
  }
  func.func @transform_12(%arg0: i32) -> (i32, i32) {
    %c0_i32 = arith.constant 0 : i32
    %c0_i32_0 = arith.constant 0 : i32
    %c0_i32_1 = arith.constant 0 : i32
    return %c0_i32, %c0_i32_0 : i32, i32
  }
  func.func @transform_13(%arg0: i32) -> (i32, i32) {
    %c0_i32 = arith.constant 0 : i32
    %c0_i32_0 = arith.constant 0 : i32
    %c0_i32_1 = arith.constant 0 : i32
    return %c0_i32, %c0_i32_0 : i32, i32
  }
  func.func @transform_14(%arg0: i32) -> (i32, i32) {
    %c0_i32 = arith.constant 0 : i32
    %c0_i32_0 = arith.constant 0 : i32
    %c0_i32_1 = arith.constant 0 : i32
    return %c0_i32, %c0_i32_0 : i32, i32
  }
  func.func @transform_15(%arg0: i32) -> (i32, i32) {
    %c0_i32 = arith.constant 0 : i32
    %c0_i32_0 = arith.constant 0 : i32
    %c0_i32_1 = arith.constant 0 : i32
    return %c0_i32, %c0_i32_0 : i32, i32
  }
  func.func @transform_16(%arg0: i32) -> (i32, i32) {
    %c0_i32 = arith.constant 0 : i32
    %c0_i32_0 = arith.constant 0 : i32
    %c0_i32_1 = arith.constant 0 : i32
    return %c0_i32, %c0_i32_0 : i32, i32
  }
  func.func @transform_17(%arg0: i32) -> (i32, i32) {
    %c0_i32 = arith.constant 0 : i32
    %c0_i32_0 = arith.constant 0 : i32
    %c0_i32_1 = arith.constant 0 : i32
    return %c0_i32, %c0_i32_0 : i32, i32
  }
  func.func @transform_18(%arg0: i32) -> (i32, i32) {
    %c0_i32 = arith.constant 0 : i32
    %c0_i32_0 = arith.constant 0 : i32
    %c0_i32_1 = arith.constant 0 : i32
    return %c0_i32, %c0_i32_0 : i32, i32
  }
  func.func @transform_19(%arg0: i32) -> (i32, i32) {
    %c0_i32 = arith.constant 0 : i32
    %c0_i32_0 = arith.constant 0 : i32
    return %arg0, %c0_i32 : i32, i32
  }
}

</mosaic_0001>

<bundles_post_ra>
// kernel: tpu_custom_call.1
= control target key start
LH: loop header
LB: loop body
LE: loop exit
PB: predicated region body
PF: predicated region fallthrough
CT: control target
= control target key end

     0   :  { %s8024_s0 = inlined_call_operand.hbm [shape: bf16[256,896], index: 0, kind: input, shape index: {}]   ;;  %s8025_s1 = inlined_call_operand.hbm [shape: bf16[896,128], index: 1, kind: input, shape index: {}]   ;;  %s8026_s2 = inlined_call_operand.hbm [shape: bf16[128,128], index: 2, kind: input, shape index: {}]   ;;  %s8027_s3 = inlined_call_operand.hbm [shape: bf16[128,128], index: 3, kind: input, shape index: {}]   ;;  %s8028_s4 = inlined_call_operand.hbm [shape: bf16[128,128], index: 4, kind: input, shape index: {}]   ;;  %s8029_s5 = inlined_call_operand.hbm [shape: bf16[128,128], index: 5, kind: input, shape index: {}]   ;;  %s8030_s6 = inlined_call_operand.hbm [shape: bf16[128,128], index: 6, kind: input, shape index: {}]   ;;  %s8031_s7 = inlined_call_operand.hbm [shape: bf16[128,128], index: 7, kind: input, shape index: {}]   ;;  %s8032_s8 = inlined_call_operand.hbm [shape: bf16[128,128], index: 8, kind: input, shape index: {}]   ;;  %s8033_s9 = inlined_call_operand.hbm [shape: bf16[128,896], index: 9, kind: input, shape index: {}]   ;;  %s8034_s10 = inlined_call_operand.vmem [shape: f32[1,128], index: 10, kind: input, shape index: {}]   ;;  %s8035_s11 = inlined_call_operand.vmem [shape: f32[1,128], index: 11, kind: input, shape index: {}]   ;;  %s8036_s12 = inlined_call_operand.vmem [shape: f32[1,128], index: 12, kind: input, shape index: {}]   ;;  %s8037_s13 = inlined_call_operand.vmem [shape: f32[1,128], index: 13, kind: input, shape index: {}]   ;;  %s8038_s14 = inlined_call_operand.vmem [shape: f32[1,128], index: 14, kind: input, shape index: {}]   ;;  %s8039_s15 = inlined_call_operand.vmem [shape: f32[1,128], index: 15, kind: input, shape index: {}]   ;;  %s8040_s16 = inlined_call_operand.vmem [shape: f32[1,128], index: 16, kind: input, shape index: {}]   ;;  %s8041_s17 = inlined_call_operand.vmem [shape: f32[1,128], index: 17, kind: input, shape index: {}]   ;;  %s8042_s18 = inlined_call_operand.vmem [shape: f32[1,896], index: 18, kind: input, shape index: {}]   ;;  %s8043_s19 = inlined_call_operand.hbm [shape: f32[256,896], index: 19, kind: output, shape index: {}]  }
   0x1   :  { %8055 = sst [smem:[#allocation27_spill]] %s8024_s0 }
   0x2   :  { %8056 = sst [smem:[#allocation28_spill]] %s8025_s1 }
   0x3   :  { %8057 = sst [smem:[#allocation29_spill]] %s8026_s2 }
   0x4   :  { %8058 = sst [smem:[#allocation30_spill]] %s8027_s3 }
   0x5   :  { %8059 = sst [smem:[#allocation31_spill]] %s8028_s4 }
   0x6   :  { %8060 = sst [smem:[#allocation32_spill]] %s8029_s5 }
   0x7   :  { %8061 = sst [smem:[#allocation33_spill]] %s8030_s6 }
   0x8   :  { %8062 = sst [smem:[#allocation34_spill]] %s8035_s11 }
   0x9   :  { %8063 = sst [smem:[#allocation35_spill]] %s8036_s12 }
   0xa   :  { %8064 = sst [smem:[#allocation36_spill]] %s8037_s13 }
   0xb   :  { %8065 = sst [smem:[#allocation37_spill]] %s8038_s14 }
   0xc   :  { %8066 = sst [smem:[#allocation38_spill]] %s8039_s15 }
   0xd   :  { %8067 = sst [smem:[#allocation39_spill]] %s8040_s16 }
   0xe   :  { %8068 = sst [smem:[#allocation40_spill]] %s8041_s17 }
   0xf   :  { %8069 = sst [smem:[#allocation41_spill]] %s8042_s18 }
  0x10   :  { %8070 = sst [smem:[#allocation42_spill]] %s8043_s19 }
  0x11   :  { %24 = vsyncpa [#allocation3], 0 }
  0x12   :  { %26 = vsyncpa [#allocation3 + $0x1], 0 }
  0x13   :  { %27 = vsyncpa [#allocation6], 0 }
  0x14   :  { %28 = vsyncpa [#allocation9], 0 }
  0x15   :  { %29 = vsyncpa [#allocation12], 0 }
  0x16   :  { %30 = vsyncpa [#allocation15], 0 }
  0x17   :  { %31 = vsyncpa [#allocation18], 0 }
  0x18   :  { %32 = vsyncpa [#allocation4], 0 }
  0x19   :  { %34 = vsyncpa [#allocation4 + $0x1], 0  ;;  %s6897_s0 = smov 0   ;;  %s6899_s30 = smov 0  }
  0x1a   :  { %s6901_s20 = smov 0   ;;  %s6903_s21 = smov 0  }
  0x1b LB: > { %s6779_s1 = smov [#allocation5]   ;;  %s6918_s2 = sadd.s32 4294967295, %s6777_s21   ;;  %s6777_s21 = sphi %s6903_s21, %s8114_s21   ;;  %s6773_s20 = sphi %s6901_s20, %s8113_s20   ;;  %s6769_s30 = sphi %s6899_s30, %s8112_s30   ;;  %s6765_s0 = sphi %s6897_s0, %s8111_s0  }
  0x1c   : > { %s487_s22 = sshll.u32 %s6779_s1, 4  ;;  %p4879_p0 = scmp.ge.s32.totalorder %s6777_s21, 1  ;;  %s6923_s22 = int_to_ptr.vmem [resolvable:$true] %s487_s22 }
  0x1d   : > { %p8050_p1 = scmp.eq.s32.totalorder %s6918_s2, 0  ;;  %p475_p2 = scmp.lt.s32.totalorder %s6777_s21, 3 }
  0x1e   : > { %s6780_s24 = smov [#allocation8]   ;;  %s6781_s26 = smov [#allocation11]  }
  0x1f   : > { %p6925_p3 = pnand %p4879_p0, %p475_p2  ;;  %s513_s25 = sshll.u32 %s6780_s24, 4  ;;  %s6938_s25 = int_to_ptr.vmem [resolvable:$true] %s513_s25 }
  0x20   : > { %s539_s27 = sshll.u32 %s6781_s26, 4  ;;  %s8073_s1 = sld [smem:[#allocation28_spill]]  ;;  %s6940_s27 = int_to_ptr.vmem [resolvable:$true] %s539_s27 }
  0x21   : > { %s8071_s23 = scalar_select %p6925_p3, 1, 0 }
  0x22   : > { %p5809_p5 = pneg %p6925_p3 }
  0x24   : > { %p6934_p6 = pnand %p5809_p5, %p8050_p1 }
  0x26   : > { %s6409_s19 = scalar_lea.hbm %s8073_s1, 7168  ;;  %p6950_p8 = pneg %p6934_p6 }
  0x27   : > { %p6410_p7 = scmp.ne.s32.totalorder %s8073_s1, %s6409_s19  ;;  %p6416_p11 = scmp.lt.u32.totalorder %s6409_s19, %s8073_s1 }
  0x29   : > { %p6412_p9 = pnand %p6950_p8, %p6410_p7 }
  0x2b   : > { %p6413_p10 = pneg %p6412_p9 }
  0x2d   : > { %p6418_p12 = pnand %p6416_p11, %p6413_p10 }
  0x2f   : > { %6421 = shalt.err (!%p6418_p12)
}
  0x30   : > { %s6422_s17 = scalar_lea.vmem %s6923_s22, 7168  ;;  %p6430_p5 = scmp.lt.s32.totalorder %s6923_s22, %s6923_s22 }
  0x31   : > { %p6423_p13 = scmp.ne.s32.totalorder %s6923_s22, %s6422_s17  ;;  %p6431_p4 = scmp.lt.s32.totalorder %s6422_s17, %s6422_s17 }
  0x33   : > { %p6425_p0 = pnand %p6423_p13, %p6950_p8  ;;  %p6432_p7 = por %p6431_p4, %p6430_p5 }
  0x35   : > { %p6426_p2 = pneg %p6425_p0 }
  0x37   : > { %p6433_p9 = pnand %p6432_p7, %p6426_p2 }
  0x39   : > { %6436 = shalt.err (!%p6433_p9)
}
  0x3a   : > { %s6782_s18 = smov 64   ;;  %s6783_s16 = smov 4  }
  0x3b   : > { %5812 = dma.hbm_to_vmem [thread:$0]  (!%p6934_p6), %s8073_s1, 7168, %s6923_s22, [#allocation6], %s6782_s18, %s6782_s18, %s6783_s16  }
  0x3c   : > { %s8075_s15 = sld [smem:[#allocation30_spill]] }
  0x42   : > { %s6437_s17 = scalar_lea.hbm %s8075_s15, 1024 }
  0x43   : > { %p6438_p4 = scmp.ne.s32.totalorder %s8075_s15, %s6437_s17  ;;  %p6444_p12 = scmp.lt.u32.totalorder %s6437_s17, %s8075_s15 }
  0x45   : > { %p6440_p10 = pnand %p6438_p4, %p6950_p8 }
  0x47   : > { %p6441_p11 = pneg %p6440_p10 }
  0x49   : > { %p6446_p13 = pnand %p6444_p12, %p6441_p11 }
  0x4b   : > { %6449 = shalt.err (!%p6446_p13)
}
  0x4c   : > { %s6450_s22 = scalar_lea.vmem %s6938_s25, 1024  ;;  %p6458_p7 = scmp.lt.s32.totalorder %s6938_s25, %s6938_s25 }
  0x4d   : > { %p6451_p0 = scmp.ne.s32.totalorder %s6938_s25, %s6450_s22  ;;  %p6459_p9 = scmp.lt.s32.totalorder %s6450_s22, %s6450_s22 }
  0x4f   : > { %p6453_p2 = pnand %p6451_p0, %p6950_p8  ;;  %p6460_p4 = por %p6459_p9, %p6458_p7 }
  0x51   : > { %p6454_p5 = pneg %p6453_p2 }
  0x53   : > { %p6461_p10 = pnand %p6460_p4, %p6454_p5 }
  0x55   : > { %6464 = shalt.err (!%p6461_p10)
}
  0x56   : > { %5818 = dma.hbm_to_vmem [thread:$0]  (!%p6934_p6), %s8075_s15, 1024, %s6938_s25, [#allocation9], %s6782_s18, %s6782_s18, %s6783_s16  }
  0x57   : > { %s8076_s5 = sld [smem:[#allocation32_spill]] }
  0x5d   : > { %s6465_s19 = scalar_lea.hbm %s8076_s5, 1024 }
  0x5e   : > { %p6466_p11 = scmp.ne.s32.totalorder %s8076_s5, %s6465_s19  ;;  %p6472_p0 = scmp.lt.u32.totalorder %s6465_s19, %s8076_s5 }
  0x60   : > { %p6468_p12 = pnand %p6466_p11, %p6950_p8 }
  0x62   : > { %p6469_p13 = pneg %p6468_p12 }
  0x64   : > { %p6474_p2 = pnand %p6472_p0, %p6469_p13 }
  0x66   : > { %6477 = shalt.err (!%p6474_p2)
}
  0x67   : > { %s6478_s25 = scalar_lea.vmem %s6940_s27, 1024  ;;  %p6486_p4 = scmp.lt.s32.totalorder %s6940_s27, %s6940_s27 }
  0x68   : > { %p6479_p5 = scmp.ne.s32.totalorder %s6940_s27, %s6478_s25  ;;  %p6487_p10 = scmp.lt.s32.totalorder %s6478_s25, %s6478_s25 }
  0x6a   : > { %p6481_p7 = pnand %p6479_p5, %p6950_p8  ;;  %p6488_p11 = por %p6487_p10, %p6486_p4 }
  0x6c   : > { %p6482_p9 = pneg %p6481_p7 }
  0x6e   : > { %p6489_p12 = pnand %p6488_p11, %p6482_p9 }
  0x70   : > { %6492 = shalt.err (!%p6489_p12)
}
  0x71   : > { %5824 = dma.hbm_to_vmem [thread:$0]  (!%p6934_p6), %s8076_s5, 1024, %s6940_s27, [#allocation12], %s6782_s18, %s6782_s18, %s6783_s16  }
  0x72   : > { %s6784_s12 = smov [#allocation14]   ;;  %s6785_s14 = smov [#allocation7]  }
  0x73   : > { %s565_s13 = sshll.u32 %s6784_s12, 4  ;;  %s500_s19 = sshll.u32 %s6785_s14, 4  ;;  %s566_s13 = int_to_ptr.vmem [resolvable:$true] %s565_s13  ;;  %s501_s19 = int_to_ptr.vmem [resolvable:$true] %s500_s19 }
  0x74   : > { %s6493_s26 = scalar_lea.hbm %s8031_s7, 1024 }
  0x75   : > { %p6494_p13 = scmp.ne.s32.totalorder %s8031_s7, %s6493_s26  ;;  %p6500_p5 = scmp.lt.u32.totalorder %s6493_s26, %s8031_s7 }
  0x77   : > { %p6496_p0 = pnand %p6494_p13, %p6950_p8 }
  0x79   : > { %p6497_p2 = pneg %p6496_p0 }
  0x7b   : > { %p6502_p7 = pnand %p6500_p5, %p6497_p2 }
  0x7d   : > { %6505 = shalt.err (!%p6502_p7)
}
  0x7e   : > { %s6506_s27 = scalar_lea.vmem %s566_s13, 1024  ;;  %p6514_p11 = scmp.lt.s32.totalorder %s566_s13, %s566_s13 }
  0x7f   : > { %p6507_p9 = scmp.ne.s32.totalorder %s566_s13, %s6506_s27  ;;  %p6515_p12 = scmp.lt.s32.totalorder %s6506_s27, %s6506_s27 }
  0x81   : > { %p6509_p4 = pnand %p6507_p9, %p6950_p8  ;;  %p6516_p1 = por %p6515_p12, %p6514_p11 }
  0x83   : > { %p6510_p10 = pneg %p6509_p4 }
  0x85   : > { %p6517_p3 = pnand %p6516_p1, %p6510_p10 }
  0x87   : > { %6520 = shalt.err (!%p6517_p3)
}
  0x88   : > { %5830 = dma.hbm_to_vmem [thread:$0]  (!%p6934_p6), %s8031_s7, 1024, %s566_s13, [#allocation15], %s6782_s18, %s6782_s18, %s6783_s16  }
  0x89   : > { %s8077_s28 = sld [smem:[#allocation29_spill]] }
  0x8f   : > { %s6521_s29 = scalar_lea.hbm %s8077_s28, 1024 }
  0x90   : > { %p6522_p1 = scmp.ne.s32.totalorder %s8077_s28, %s6521_s29  ;;  %p6528_p0 = scmp.lt.u32.totalorder %s6521_s29, %s8077_s28 }
  0x92   : > { %p6524_p3 = pnand %p6522_p1, %p6950_p8 }
  0x94   : > { %p6525_p13 = pneg %p6524_p3 }
  0x96   : > { %p6530_p2 = pnand %p6528_p0, %p6525_p13 }
  0x98   : > { %6533 = shalt.err (!%p6530_p2)
}
  0x99   : > { %s6534_s27 = scalar_lea.vmem %s501_s19, 1024  ;;  %p6542_p4 = scmp.lt.s32.totalorder %s501_s19, %s501_s19 }
  0x9a   : > { %p6535_p5 = scmp.ne.s32.totalorder %s501_s19, %s6534_s27  ;;  %p6543_p10 = scmp.lt.s32.totalorder %s6534_s27, %s6534_s27 }
  0x9c   : > { %p6537_p7 = pnand %p6535_p5, %p6950_p8  ;;  %p6544_p11 = por %p6543_p10, %p6542_p4 }
  0x9e   : > { %p6538_p9 = pneg %p6537_p7 }
  0xa0   : > { %p6545_p12 = pnand %p6544_p11, %p6538_p9 }
  0xa2   : > { %6548 = shalt.err (!%p6545_p12)
}
  0xa3   : > { %5815 = dma.hbm_to_vmem [thread:$0]  (!%p6934_p6), %s8077_s28, 1024, %s501_s19, [#allocation6], %s6782_s18, %s6782_s18, %s6783_s16  }
  0xa4   : > { %s6786_s11 = smov [#allocation10]   ;;  %s6787_s14 = smov [#allocation13]  }
  0xa5   : > { %s526_s12 = sshll.u32 %s6786_s11, 4  ;;  %s552_s29 = sshll.u32 %s6787_s14, 4  ;;  %s527_s12 = int_to_ptr.vmem [resolvable:$true] %s526_s12  ;;  %s553_s29 = int_to_ptr.vmem [resolvable:$true] %s552_s29 }
  0xa6   : > { %s8078_s4 = sld [smem:[#allocation31_spill]] }
  0xac   : > { %s6549_s25 = scalar_lea.hbm %s8078_s4, 1024 }
  0xad   : > { %p6550_p1 = scmp.ne.s32.totalorder %s8078_s4, %s6549_s25  ;;  %p6556_p0 = scmp.lt.u32.totalorder %s6549_s25, %s8078_s4 }
  0xaf   : > { %p6552_p3 = pnand %p6550_p1, %p6950_p8 }
  0xb1   : > { %p6553_p13 = pneg %p6552_p3 }
  0xb3   : > { %p6558_p2 = pnand %p6556_p0, %p6553_p13 }
  0xb5   : > { %6561 = shalt.err (!%p6558_p2)
}
  0xb6   : > { %s6562_s19 = scalar_lea.vmem %s527_s12, 1024  ;;  %p6570_p4 = scmp.lt.s32.totalorder %s527_s12, %s527_s12 }
  0xb7   : > { %p6563_p5 = scmp.ne.s32.totalorder %s527_s12, %s6562_s19  ;;  %p6571_p10 = scmp.lt.s32.totalorder %s6562_s19, %s6562_s19 }
  0xb9   : > { %p6565_p7 = pnand %p6563_p5, %p6950_p8  ;;  %p6572_p11 = por %p6571_p10, %p6570_p4 }
  0xbb   : > { %p6566_p9 = pneg %p6565_p7 }
  0xbd   : > { %p6573_p12 = pnand %p6572_p11, %p6566_p9 }
  0xbf   : > { %6576 = shalt.err (!%p6573_p12)
}
  0xc0   : > { %5821 = dma.hbm_to_vmem [thread:$0]  (!%p6934_p6), %s8078_s4, 1024, %s527_s12, [#allocation9], %s6782_s18, %s6782_s18, %s6783_s16  }
  0xc1   : > { %s8079_s6 = sld [smem:[#allocation33_spill]] }
  0xc7   : > { %s6577_s26 = scalar_lea.hbm %s8079_s6, 1024 }
  0xc8   : > { %p6578_p1 = scmp.ne.s32.totalorder %s8079_s6, %s6577_s26  ;;  %p6584_p0 = scmp.lt.u32.totalorder %s6577_s26, %s8079_s6 }
  0xca   : > { %p6580_p3 = pnand %p6578_p1, %p6950_p8 }
  0xcc   : > { %p6581_p13 = pneg %p6580_p3 }
  0xce   : > { %p6586_p2 = pnand %p6584_p0, %p6581_p13 }
  0xd0   : > { %6589 = shalt.err (!%p6586_p2)
}
  0xd1   : > { %s6590_s13 = scalar_lea.vmem %s553_s29, 1024  ;;  %p6598_p4 = scmp.lt.s32.totalorder %s553_s29, %s553_s29 }
  0xd2   : > { %p6591_p5 = scmp.ne.s32.totalorder %s553_s29, %s6590_s13  ;;  %p6599_p10 = scmp.lt.s32.totalorder %s6590_s13, %s6590_s13 }
  0xd4   : > { %p6593_p7 = pnand %p6591_p5, %p6950_p8  ;;  %p6600_p11 = por %p6599_p10, %p6598_p4 }
  0xd6   : > { %p6594_p9 = pneg %p6593_p7 }
  0xd8   : > { %p6601_p12 = pnand %p6600_p11, %p6594_p9 }
  0xda   : > { %6604 = shalt.err (!%p6601_p12)
}
  0xdb   : > { %5827 = dma.hbm_to_vmem [thread:$0]  (!%p6934_p6), %s8079_s6, 1024, %s553_s29, [#allocation12], %s6782_s18, %s6782_s18, %s6783_s16  }
  0xdc   : > { %s6788_s5 = smov [#allocation16]   ;;  %s6789_s11 = smov [#allocation17]  }
  0xdd   : > { %s578_s1 = sshll.u32 %s6788_s5, 4  ;;  %s591_s14 = sshll.u32 %s6789_s11, 4  ;;  %s579_s1 = int_to_ptr.vmem [resolvable:$true] %s578_s1  ;;  %s592_s14 = int_to_ptr.vmem [resolvable:$true] %s591_s14 }
  0xde   : > { %s6605_s25 = scalar_lea.hbm %s8032_s8, 1024 }
  0xdf   : > { %p6606_p1 = scmp.ne.s32.totalorder %s8032_s8, %s6605_s25  ;;  %p6612_p0 = scmp.lt.u32.totalorder %s6605_s25, %s8032_s8 }
  0xe1   : > { %p6608_p3 = pnand %p6606_p1, %p6950_p8 }
  0xe3   : > { %p6609_p13 = pneg %p6608_p3 }
  0xe5   : > { %p6614_p2 = pnand %p6612_p0, %p6609_p13 }
  0xe7   : > { %6617 = shalt.err (!%p6614_p2)
}
  0xe8   : > { %s6618_s29 = scalar_lea.vmem %s579_s1, 1024  ;;  %p6626_p4 = scmp.lt.s32.totalorder %s579_s1, %s579_s1 }
  0xe9   : > { %p6619_p5 = scmp.ne.s32.totalorder %s579_s1, %s6618_s29  ;;  %p6627_p10 = scmp.lt.s32.totalorder %s6618_s29, %s6618_s29 }
  0xeb   : > { %p6621_p7 = pnand %p6619_p5, %p6950_p8  ;;  %p6628_p11 = por %p6627_p10, %p6626_p4 }
  0xed   : > { %p6622_p9 = pneg %p6621_p7 }
  0xef   : > { %p6629_p12 = pnand %p6628_p11, %p6622_p9 }
  0xf1   : > { %6632 = shalt.err (!%p6629_p12)
}
  0xf2   : > { %5833 = dma.hbm_to_vmem [thread:$0]  (!%p6934_p6), %s8032_s8, 1024, %s579_s1, [#allocation15], %s6782_s18, %s6782_s18, %s6783_s16  }
  0xf3   : > { %s6633_s17 = scalar_lea.hbm %s8033_s9, 7168 }
  0xf4   : > { %p6634_p1 = scmp.ne.s32.totalorder %s8033_s9, %s6633_s17  ;;  %p6640_p0 = scmp.lt.u32.totalorder %s6633_s17, %s8033_s9 }
  0xf6   : > { %p6636_p3 = pnand %p6634_p1, %p6950_p8 }
  0xf8   : > { %p6637_p13 = pneg %p6636_p3 }
  0xfa   : > { %p6642_p2 = pnand %p6640_p0, %p6637_p13 }
  0xfc   : > { %6645 = shalt.err (!%p6642_p2)
}
  0xfd   : > { %s6646_s12 = scalar_lea.vmem %s592_s14, 7168  ;;  %p6654_p4 = scmp.lt.s32.totalorder %s592_s14, %s592_s14 }
  0xfe   : > { %p6647_p5 = scmp.ne.s32.totalorder %s592_s14, %s6646_s12  ;;  %p6655_p10 = scmp.lt.s32.totalorder %s6646_s12, %s6646_s12 }
 0x100   : > { %p6649_p7 = pnand %p6647_p5, %p6950_p8  ;;  %p6656_p11 = por %p6655_p10, %p6654_p4 }
 0x102   : > { %p6650_p9 = pneg %p6649_p7 }
 0x104   : > { %p6657_p12 = pnand %p6656_p11, %p6650_p9 }
 0x106   : > { %6660 = shalt.err (!%p6657_p12)
}
 0x107   : > { %s8052_s18 = smov 448   ;;  %s8053_s24 = smov 28  }
 0x108   : > { %5836 = dma.hbm_to_vmem [thread:$0]  (!%p6934_p6), %s8033_s9, 7168, %s592_s14, [#allocation18], %s8052_s18, %s8052_s18, %s8053_s24  }
 0x109   : > { %s4878_s29 = sadd.s32 4294967294, %s6777_s21   ;;  %s7154_s19 = sadd.s32 1, %s6777_s21  }
 0x10a   : > { %s47_s5 = sadd.s32 1, %s6773_s20  ;;  %s44_s11 = ssub.s32 %s6777_s21, %s7154_s19 }
 0x10b   : > { %p54_p8 = scmp.ne.s32.totalorder %s6773_s20, %s6769_s30  ;;  %p45_p1 = scmp.eq.s32.totalorder %s44_s11, 0 }
 0x10c   : > { %p55_p3 = scmp.eq.s32.totalorder %s6777_s21, 0  ;;  %p60_p13 = scmp.ne.s32.totalorder %s6769_s30, %s6765_s0 }
 0x10d   : > { %p462_p0 = scmp.eq.s32.totalorder %s6918_s2, 1  ;;  %p8080_p5 = scmp.eq.s32.totalorder %s6918_s2, 0 }
 0x10e   : > { %s7166_s3 = scalar_select %p45_p1, %s6773_s20, %s47_s5  }
 0x10f   : > { %p56_p2 = por %p55_p3, %p54_p8  ;;  %p7170_p7 = por %p8080_p5, %p60_p13 }
 0x110   : > { %p7174_p6 = por %p462_p0, %p54_p8  ;;  %p468_p9 = scmp.eq.s32.totalorder %s4878_s29, 1 }
 0x111   : > { %p5854_p4 = scmp.lt.s32.totalorder %s6777_s21, 2  ;;  %s632_s17 = sand.u32 1, %s6773_s20  }
 0x112   : > { %s8082_s14 = scalar_select %p7174_p6, 1, 0 }
 0x113   : > { %p7180_p10 = por %p468_p9, %p60_p13  ;;  %s5764_s22 = smul.u32 448, %s632_s17 }
 0x114   : > { %p7184_p11 = pnand %p5854_p4, %p56_p2  ;;  %s5765_s13 = smul.u32 7168, %s6777_s21 }
 0x115   : > { %s8083_s25 = scalar_select %p7180_p10, 1, 0 }
 0x116   : > { %s8085_s1 = sld [smem:[#allocation27_spill]]  ;;  %s636_s29 = scalar_lea.vmem [#allocation2], %s5764_s22 }
 0x117   : > { %s644_s11 = sshll.u32 %s636_s29, 4  ;;  %s7196_s18 = scalar_lea.sflag [#allocation3], %s632_s17  ;;  %s7194_s11 = int_to_ptr.vmem [resolvable:$true] %s644_s11 }
 0x118   : > { %p6663_p8 = pneg %p7184_p11 }
 0x11c   : > { %s7192_s5 = scalar_lea.hbm %s8085_s1, %s5765_s13  ;;  %s6666_s16 = scalar_lea.hbm %s8085_s1, 14336 }
 0x11d   : > { %s6661_s24 = scalar_lea.hbm %s7192_s5, 7168  ;;  %p6667_p13 = scmp.lt.u32.totalorder %s7192_s5, %s8085_s1 }
 0x11e   : > { %p6662_p12 = scmp.ne.s32.totalorder %s7192_s5, %s6661_s24  ;;  %p6668_p0 = scmp.lt.u32.totalorder %s6666_s16, %s6661_s24 }
 0x11f   : > { %p6670_p5 = scmp.lt.u32.totalorder %s6661_s24, %s7192_s5 }
 0x120   : > { %p6664_p1 = pnand %p6663_p8, %p6662_p12  ;;  %p6669_p2 = por %p6668_p0, %p6667_p13 }
 0x122   : > { %p6665_p3 = pneg %p6664_p1  ;;  %p6671_p9 = por %p6670_p5, %p6669_p2 }
 0x124   : > { %p6672_p4 = pnand %p6671_p9, %p6665_p3 }
 0x126   : > { %6675 = shalt.err (!%p6672_p4)
}
 0x127   : > { %s6676_s17 = scalar_lea.vmem %s7194_s11, 7168  ;;  %s6792_s22 = smov [#allocation2]  }
 0x128   : > { %p6677_p12 = scmp.ne.s32.totalorder %s7194_s11, %s6676_s17  ;;  %s6681_s29 = sshll.u32 %s6792_s22, 4  ;;  %s6682_s29 = int_to_ptr.vmem [resolvable:$false] %s6681_s29 }
 0x129   : > { %s6683_s4 = scalar_lea.vmem %s6682_s29, 14336  ;;  %p6684_p6 = scmp.lt.s32.totalorder %s7194_s11, %s6682_s29 }
 0x12a   : > { %p6679_p1 = pnand %p6677_p12, %p6663_p8  ;;  %p6685_p13 = scmp.lt.s32.totalorder %s6683_s4, %s6676_s17 }
 0x12c   : > { %p6680_p10 = pneg %p6679_p1  ;;  %p6686_p0 = por %p6685_p13, %p6684_p6 }
 0x12e   : > { %p6687_p2 = pnand %p6686_p0, %p6680_p10 }
 0x130   : > { %6690 = shalt.err (!%p6687_p2)
}
 0x131   : > { %s8086_s6 = smov 28   ;;  %s8087_s24 = smov 448  }
 0x132   : > { %5840 = dma.hbm_to_vmem [thread:$0]  (!%p7184_p11), %s7192_s5, 7168, %s7194_s11, %s7196_s18, %s8087_s24, %s8087_s24, %s8086_s6  }
 0x133   : > { %p8088_p8 = scmp.ne.s32.totalorder %s8071_s23, 0 }
 0x134   : > { %s7230_s13 = sand.u32 (!%p8088_p8), 1, %s6769_s30  }
 0x135   : > { %656 = sbr.rel (%p8088_p8) target bundleno = 2598 (0xa26), region = 96  ;;  %s659_s16 = scalar_lea.sflag (!%p8088_p8), [#allocation3], %s7230_s13 }
 0x136   : > { %s5766_s12 = smul.u32 (!%p8088_p8), 448, %s7230_s13 }
 0x138   : > { %s7234_s17 = scalar_lea.vmem (!%p8088_p8), [#allocation2], %s5766_s12 }
 0x13c   : > { %6736 = dma.done.wait (%p7170_p7), %s659_s16, 7168  }
 0x13d   : > { %6738 = vsyncadd (%p7170_p7), %s659_s16, 4294960128  ;;  %p8089_p6 = scmp.eq.s32.totalorder %s6918_s2, 0 }
 0x13f   : > { %6740 = dma.done.wait (%p8089_p6), [#allocation6], 8192   ;;  %p8090_p10 = pmov %p8089_p6 }
 0x140   : > { %p8091_p11 = pmov %p8089_p6 }
 0x141   : > { %6742 = vsyncadd (%p8090_p10), [#allocation6], 4294959104 }
 0x142   : > { %6744 = dma.done.wait (%p8091_p11), [#allocation9], 2048   ;;  %p8092_p3 = pmov %p8089_p6 }
 0x144   : > { %6746 = vsyncadd (%p8092_p3), [#allocation9], 4294965248  ;;  %p8093_p5 = pmov %p8092_p3 }
 0x145   : > { %p8094_p9 = pmov %p8092_p3 }
 0x146   : > { %6748 = dma.done.wait (%p8093_p5), [#allocation12], 2048  }
 0x147   : > { %6750 = vsyncadd (%p8094_p9), [#allocation12], 4294965248  ;;  %p8095_p7 = pmov %p8092_p3 }
 0x148   : > { %p8096_p4 = pmov %p8092_p3 }
 0x149   : > { %6752 = dma.done.wait (%p8095_p7), [#allocation15], 2048  }
 0x14a   : > { %6754 = vsyncadd (%p8096_p4), [#allocation15], 4294965248  ;;  %p8097_p12 = pmov %p8092_p3 }
 0x14b   : > { %p8098_p1 = pmov %p8092_p3 }
 0x14c   : > { %6756 = dma.done.wait (%p8097_p12), [#allocation18], 7168  }
 0x14d   : > { %6758 = vsyncadd (%p8098_p1), [#allocation18], 4294960128  ;;  %v5913_v0 = vld [vmem:[#allocation5 + $0x40] sm:$0xff]   ;;  %v5917_v4 = vld [vmem:[#allocation5 + $0x48] sm:$0xff]   ;;  %s8099_s5 = sld [smem:[#allocation34_spill]]  ;;  %s8100_s29 = sld [smem:[#allocation35_spill]] }
 0x14e   : > { %v5914_v1 = vld [vmem:[#allocation5] sm:$0xff]   ;;  %5140 = vmatprep.subr.bf16.mxu0 %v5913_v0  ;;  %v5918_v5 = vld [vmem:[#allocation5 + $0x8] sm:$0xff]   ;;  %v5921_v8 = vld [vmem:[#allocation5 + $0x50] sm:$0xff]   ;;  %s8101_s24 = sld [smem:[#allocation36_spill]]  ;;  %s8103_s26 = sld [smem:[#allocation38_spill]] }
 0x14f   : > { %v5915_v2 = vld [vmem:[#allocation5 + $0xc0] sm:$0xff]   ;;  %5141 = vmatpush3.bf16.msra.mxu0 %v5914_v1  ;;  %v5919_v6 = vld [vmem:[#allocation5 + $0xc8] sm:$0xff]   ;;  %v5922_v9 = vld [vmem:[#allocation5 + $0x10] sm:$0xff]   ;;  %s8104_s11 = sld [smem:[#allocation39_spill]]  ;;  %s8105_s4 = sld [smem:[#allocation40_spill]] }
 0x150   : > { %v5916_v3 = vld [vmem:[#allocation5 + $0x80] sm:$0xff]   ;;  %5204 = vmatprep.subr.bf16.mxu1 %v5915_v2  ;;  %5142 = vmatprep.subr.bf16.mxu0 %v5917_v4  ;;  %v5920_v7 = vld [vmem:[#allocation5 + $0x88] sm:$0xff]   ;;  %v5923_v10 = vld [vmem:[#allocation5 + $0xd0] sm:$0xff]   ;;  %s8106_s12 = sld [smem:[#allocation41_spill]]  ;;  %s5767_s16 = smul.u32 896, %s7230_s13 }
 0x151   : > { %5205 = vmatpush3.bf16.msra.mxu1 %v5916_v3  ;;  %v5924_v11 = vld [vmem:[#allocation5 + $0x90] sm:$0xff]   ;;  %v5925_v12 = vld [vmem:[#allocation5 + $0x58] sm:$0xff]   ;;  %v5929_v16 = vld [vmem:[#allocation5 + $0x60] sm:$0xff]   ;;  %s5768_s23 = smul.u32 14336, %s6918_s2  ;;  %p8108_p0 = scmp.ne.s32.totalorder %s8082_s14, 0 }
 0x152   : > { %5206 = vmatprep.subr.bf16.mxu1 %v5919_v6  ;;  %v5926_v13 = vld [vmem:[#allocation5 + $0x18] sm:$0xff]   ;;  %v5930_v17 = vld [vmem:[#allocation5 + $0x20] sm:$0xff]   ;;  %v5933_v20 = vld [vmem:[#allocation5 + $0x68] sm:$0xff]  }
 0x153   : > { %5143 = vmatpush3.bf16.msra.mxu0 %v5918_v5  ;;  %v5927_v14 = vld [vmem:[#allocation5 + $0xd8] sm:$0xff]   ;;  %v5931_v18 = vld [vmem:[#allocation5 + $0xe0] sm:$0xff]   ;;  %v5934_v21 = vld [vmem:[#allocation5 + $0x28] sm:$0xff]  }
 0x154   : > { %5144 = vmatprep.subr.bf16.mxu0 %v5921_v8  ;;  %v5928_v15 = vld [vmem:[#allocation5 + $0x98] sm:$0xff]   ;;  %v5932_v19 = vld [vmem:[#allocation5 + $0xa0] sm:$0xff]   ;;  %v5935_v22 = vld [vmem:[#allocation5 + $0xe8] sm:$0xff]  }
 0x155   : > { %5207 = vmatpush3.bf16.msra.mxu1 %v5920_v7  ;;  %v5936_v23 = vld [vmem:[#allocation5 + $0xa8] sm:$0xff]   ;;  %v5937_v24 = vld [vmem:[#allocation5 + $0x70] sm:$0xff]   ;;  %v5941_v28 = vld [vmem:[#allocation5 + $0x78] sm:$0xff]  }
 0x156   : > { %5208 = vmatprep.subr.bf16.mxu1 %v5923_v10  ;;  %v5938_v25 = vld [vmem:[#allocation5 + $0x30] sm:$0xff]   ;;  %v5942_v29 = vld [vmem:[#allocation5 + $0x38] sm:$0xff]   ;;  %v5946_v32 = vld [vmem:[%s7234_s17 + $0x4] ss:$28 sps:$4 sm:$0xff]  }
 0x157   : > { %5145 = vmatpush3.bf16.msra.mxu0 %v5922_v9  ;;  %v5939_v26 = vld [vmem:[#allocation5 + $0xf0] sm:$0xff]   ;;  %v5943_v30 = vld [vmem:[#allocation5 + $0xf8] sm:$0xff]   ;;  %1595 = vmatprep.mubr.bf16.mxu0 %v5946_v32  ;;  %v5948_v34 = vld [vmem:[#allocation5 + $0x140] sm:$0xff]  }
 0x158   : > { %5146 = vmatprep.subr.bf16.mxu0 %v5925_v12  ;;  %v5940_v27 = vld [vmem:[#allocation5 + $0xb0] sm:$0xff]   ;;  %v5944_v31 = vld [vmem:[%s7234_s17] ss:$28 sps:$4 sm:$0xff]   ;;  %v5949_v35 = vld [vmem:[%s7234_s17 + $0x8] ss:$28 sps:$4 sm:$0xff]  }
 0x159   : > { %5209 = vmatpush3.bf16.msra.mxu1 %v5924_v11  ;;  %v5947_v33 = vld [vmem:[#allocation5 + $0xb8] sm:$0xff]   ;;  %v5951_v36 = vld [vmem:[%s7234_s17 + $0xc] ss:$28 sps:$4 sm:$0xff]   ;;  %v5952_v37 = vld [vmem:[#allocation5 + $0x100] sm:$0xff]  }
 0x15a   : > { %5210 = vmatprep.subr.bf16.mxu1 %v5927_v14  ;;  %1692 = vmatprep.mubr.bf16.mxu1 %v5951_v36  ;;  %v5953_v38 = vld [vmem:[%s7234_s17 + $0x3c] ss:$28 sps:$4 sm:$0xff]   ;;  %v5956_v40 = vld [vmem:[#allocation5 + $0x148] sm:$0xff]   ;;  %v5957_v41 = vld [vmem:[%s7234_s17 + $0x44] ss:$28 sps:$4 sm:$0xff]  }
 0x15b   : > { %5147 = vmatpush3.bf16.msra.mxu0 %v5926_v13  ;;  %v5955_v39 = vld [vmem:[%s7234_s17 + $0x38] ss:$28 sps:$4 sm:$0xff]   ;;  %v5959_v42 = vld [vmem:[#allocation5 + $0x108] sm:$0xff]   ;;  %v5960_v43 = vld [vmem:[%s7234_s17 + $0x40] ss:$28 sps:$4 sm:$0xff]  }
 0x15c   : > { %5148 = vmatprep.subr.bf16.mxu0 %v5929_v16  ;;  %v5961_v44 = vld [vmem:[#allocation5 + $0x180] sm:$0xff]   ;;  %v5962_v45 = vld [vmem:[%s7234_s17 + $0x74] ss:$28 sps:$4 sm:$0xff]   ;;  %v5966_v47 = vld [vmem:[%s7234_s17 + $0x7c] ss:$28 sps:$4 sm:$0xff]  }
 0x15d   : > { %5211 = vmatpush3.bf16.msra.mxu1 %v5928_v15  ;;  %v5965_v46 = vld [vmem:[#allocation5 + $0x150] sm:$0xff]   ;;  %v5970_v50 = vld [vmem:[#allocation5 + $0x188] sm:$0xff]   ;;  %v5974_v53 = vld [vmem:[#allocation5 + $0x158] sm:$0xff]  }
 0x15e   : > { %5212 = vmatprep.subr.bf16.mxu1 %v5931_v18  ;;  %v5964_v48 = vld [vmem:[%s7234_s17 + $0x70] ss:$28 sps:$4 sm:$0xff]   ;;  %v5969_v52 = vld [vmem:[%s7234_s17 + $0x78] ss:$28 sps:$4 sm:$0xff]   ;;  %v5973_v57 = vld [vmem:[%s7234_s17 + $0xa8] ss:$28 sps:$4 sm:$0xff]  }
 0x15f   : > { %5149 = vmatpush3.bf16.msra.mxu0 %v5930_v17  ;;  %v5968_v49 = vld [vmem:[#allocation5 + $0x110] sm:$0xff]   ;;  %v5971_v51 = vld [vmem:[%s7234_s17 + $0xac] ss:$28 sps:$4 sm:$0xff]   ;;  %v5977_v55 = vld [vmem:[#allocation5 + $0x118] sm:$0xff]  }
 0x160   : > { %5150 = vmatprep.subr.bf16.mxu0 %v5933_v20  ;;  %v5975_v54 = vld [vmem:[%s7234_s17 + $0xb4] ss:$28 sps:$4 sm:$0xff]   ;;  %v5983_v58 = vld [vmem:[#allocation5 + $0x160] sm:$0xff]   ;;  %v5984_v62 = vld [vmem:[%s7234_s17 + $0xec] ss:$28 sps:$4 sm:$0xff]  }
 0x161   : > { %5213 = vmatpush3.bf16.msra.mxu1 %v5932_v19  ;;  %v5979_v56 = vld [vmem:[#allocation5 + $0x190] sm:$0xff]   ;;  %v5980_v60 = vld [vmem:[%s7234_s17 + $0xe4] ss:$28 sps:$4 sm:$0xff]   ;;  %v5988_v63 = vld [vmem:[#allocation5 + $0x198] sm:$0xff]  }
 0x162   : > { %5214 = vmatprep.subr.bf16.mxu1 %v5935_v22  ;;  %v5978_v59 = vld [vmem:[%s7234_s17 + $0xb0] ss:$28 sps:$4 sm:$0xff]   ;;  %v5986_v61 = vld [vmem:[#allocation5 + $0x120] sm:$0xff]   ;;  %v5989_v2 = vld [vmem:[%s7234_s17 + $0x11c] ss:$28 sps:$4 sm:$0xff]  }
 0x163   : > { %5151 = vmatpush3.bf16.msra.mxu0 %v5934_v21  ;;  %v5992_v0 = vld [vmem:[#allocation5 + $0x168] sm:$0xff]   ;;  %v5982_v1 = vld [vmem:[%s7234_s17 + $0xe0] ss:$28 sps:$4 sm:$0xff]   ;;  %v6001_v7 = vld [vmem:[#allocation5 + $0x170] sm:$0xff]  }
 0x164   : > { %5152 = vmatprep.subr.bf16.mxu0 %v5937_v24  ;;  %v5995_v3 = vld [vmem:[#allocation5 + $0x128] sm:$0xff]   ;;  %v5997_v4 = vld [vmem:[#allocation5 + $0x1a0] sm:$0xff]   ;;  %v6004_v8 = vld [vmem:[#allocation5 + $0x130] sm:$0xff]  }
 0x165   : > { %5215 = vmatpush3.bf16.msra.mxu1 %v5936_v23  ;;  %v5987_v5 = vld [vmem:[%s7234_s17 + $0xe8] ss:$28 sps:$4 sm:$0xff]   ;;  %v5991_v10 = vld [vmem:[%s7234_s17 + $0x118] ss:$28 sps:$4 sm:$0xff]   ;;  %v5996_v13 = vld [vmem:[%s7234_s17 + $0x120] ss:$28 sps:$4 sm:$0xff]  }
 0x166   : > { %5216 = vmatprep.subr.bf16.mxu1 %v5939_v26  ;;  %v5993_v6 = vld [vmem:[%s7234_s17 + $0x124] ss:$28 sps:$4 sm:$0xff]   ;;  %v6006_v9 = vld [vmem:[#allocation5 + $0x1a8] sm:$0xff]   ;;  %v5998_v11 = vld [vmem:[%s7234_s17 + $0x154] ss:$28 sps:$4 sm:$0xff]  }
 0x167   : > { %5153 = vmatpush3.bf16.msra.mxu0 %v5938_v25  ;;  %v6010_v12 = vld [vmem:[#allocation5 + $0x178] sm:$0xff]   ;;  %v6015_v16 = vld [vmem:[#allocation5 + $0x1b0] sm:$0xff]   ;;  %v6007_v19 = vld [vmem:[%s7234_s17 + $0x18c] ss:$28 sps:$4 sm:$0xff]  }
 0x168   : > { %5154 = vmatprep.subr.bf16.mxu0 %v5941_v28  ;;  %v6013_v14 = vld [vmem:[#allocation5 + $0x138] sm:$0xff]   ;;  %v6000_v18 = vld [vmem:[%s7234_s17 + $0x150] ss:$28 sps:$4 sm:$0xff]   ;;  %v6009_v22 = vld [vmem:[%s7234_s17 + $0x188] ss:$28 sps:$4 sm:$0xff]  }
 0x169   : > { %5217 = vmatpush3.bf16.msra.mxu1 %v5940_v27  ;;  %v6002_v15 = vld [vmem:[%s7234_s17 + $0x15c] ss:$28 sps:$4 sm:$0xff]   ;;  %v6011_v21 = vld [vmem:[%s7234_s17 + $0x194] ss:$28 sps:$4 sm:$0xff]   ;;  %v6022_v27 = vld [vmem:[%s7234_s17 + $0x4c] ss:$28 sps:$4 sm:$0xff]  }
 0x16a   : > { %5218 = vmatprep.subr.bf16.mxu1 %v5943_v30  ;;  %v6019_v17 = vld [vmem:[#allocation5 + $0x1b8] sm:$0xff]   ;;  %v6018_v23 = vld [vmem:[%s7234_s17 + $0x14] ss:$28 sps:$4 sm:$0xff]   ;;  %v6024_v30 = vld [vmem:[%s7234_s17 + $0x48] ss:$28 sps:$4 sm:$0xff]  }
 0x16b   : > { %5155 = vmatpush3.bf16.msra.mxu0 %v5942_v29  ;;  %v6005_v20 = vld [vmem:[%s7234_s17 + $0x158] ss:$28 sps:$4 sm:$0xff]   ;;  %v6014_v24 = vld [vmem:[%s7234_s17 + $0x190] ss:$28 sps:$4 sm:$0xff]   ;;  %v6028_v29 = vld [vmem:[%s7234_s17 + $0x88] ss:$28 sps:$4 sm:$0xff]  }
 0x16c   : > { %5268 = vmatprep.subr.bf16.mxu0 %v5948_v34  ;;  %v6020_v25 = vld [vmem:[%s7234_s17 + $0x18] ss:$28 sps:$4 sm:$0xff]   ;;  %v6016_v26 = vld [vmem:[%s7234_s17 + $0x10] ss:$28 sps:$4 sm:$0xff]   ;;  %v6029_v32 = vld [vmem:[%s7234_s17 + $0xc0] ss:$28 sps:$4 sm:$0xff]  }
 0x16d   : > { %5219 = vmatpush3.bf16.msra.mxu1 %v5947_v33  ;;  %v6021_v28 = vld [vmem:[%s7234_s17 + $0x50] ss:$28 sps:$4 sm:$0xff]   ;;  %v6036_v33 = vld [vmem:[%s7234_s17 + $0xf8] ss:$28 sps:$4 sm:$0xff]   ;;  %v6027_v34 = vld [vmem:[%s7234_s17 + $0x80] ss:$28 sps:$4 sm:$0xff]  }
 0x16e   : > { %1596 = vmatmul.mubr.bf16.vlgmr.msra.gmra.mrb[0].mxu0 %v5944_v31  ;;  %5476 = vmatprep.subr.bf16.mxu1 %v5961_v44  ;;  %v6025_v31 = vld [vmem:[%s7234_s17 + $0x84] ss:$28 sps:$4 sm:$0xff]   ;;  %v6037_v36 = vld [vmem:[%s7234_s17 + $0x130] ss:$28 sps:$4 sm:$0xff]  }
 0x16f   : > { %5269 = vmatpush3.bf16.msra.mxu0 %v5952_v37  ;;  %1603 = vmatprep.mubr.bf16.mxu0 %v5953_v38  ;;  %v6044_v37 = vld [vmem:[%s7234_s17 + $0x168] ss:$28 sps:$4 sm:$0xff]   ;;  %v6032_v38 = vld [vmem:[%s7234_s17 + $0xb8] ss:$28 sps:$4 sm:$0xff]  }
 0x170   : > { %1693 = vmatmul.mubr.bf16.vlgmr.msra.gmra.mrb[0].mxu1 %v5949_v35  ;;  %5270 = vmatprep.subr.bf16.mxu0 %v5956_v40  ;;  %v6030_v35 = vld [vmem:[%s7234_s17 + $0xbc] ss:$28 sps:$4 sm:$0xff]  }
 0x171   : > { %1700 = vmatprep.mubr.bf16.mxu1 %v5957_v41  ;;  %5477 = vmatpush3.bf16.msra.mxu1 %v5961_v44  ;;  %v6045_v40 = vld [vmem:[%s7234_s17 + $0x1a0] ss:$28 sps:$4 sm:$0xff]   ;;  %v6035_v41 = vld [vmem:[%s7234_s17 + $0xf0] ss:$28 sps:$4 sm:$0xff]  }
 0x172   : > { %5478 = vmatprep.subr.bf16.mxu1 %v5970_v50  ;;  %v6041_v44 = vld [vmem:[%s7234_s17 + $0x164] ss:$28 sps:$4 sm:$0xff]  }
 0x173   : > { %5271 = vmatpush3.bf16.msra.mxu0 %v5959_v42  ;;  %v6038_v42 = vld [vmem:[%s7234_s17 + $0x12c] ss:$28 sps:$4 sm:$0xff]  }
 0x174   : > { %5272 = vmatprep.subr.bf16.mxu0 %v5965_v46  ;;  %v6046_v46 = vld [vmem:[%s7234_s17 + $0x19c] ss:$28 sps:$4 sm:$0xff]  }
 0x175   : > { %5479 = vmatpush3.bf16.msra.mxu1 %v5970_v50  ;;  %v6051_v50 = vld [vmem:[#allocation7 + $0x10] sm:$0xff]  }
 0x176   : > { %1604 = vmatmul.mubr.bf16.gmra.mrb[4].mxu0 %v5955_v39  ;;  %5480 = vmatprep.subr.bf16.mxu1 %v5979_v56  ;;  %v6033_v39 = vld [vmem:[%s7234_s17 + $0xf4] ss:$28 sps:$4 sm:$0xff]  }
 0x177   : > { %1611 = vmatprep.mubr.bf16.mxu0 %v5962_v45  ;;  %5273 = vmatpush3.bf16.msra.mxu0 %v5968_v49  ;;  %v6043_v45 = vld [vmem:[%s7234_s17 + $0x160] ss:$28 sps:$4 sm:$0xff]   ;;  %v6050_v49 = vld [vmem:[#allocation7 + $0x8] sm:$0xff]  }
 0x178   : > { %1701 = vmatmul.mubr.bf16.gmra.mrb[4].mxu1 %v5960_v43  ;;  %5274 = vmatprep.subr.bf16.mxu0 %v5974_v53  ;;  %v6040_v43 = vld [vmem:[%s7234_s17 + $0x128] ss:$28 sps:$4 sm:$0xff]  }
 0x179   : > { %1708 = vmatprep.mubr.bf16.mxu1 %v5966_v47  ;;  %5481 = vmatpush3.bf16.msra.mxu1 %v5979_v56  ;;  %v6048_v47 = vld [vmem:[%s7234_s17 + $0x198] ss:$28 sps:$4 sm:$0xff]   ;;  %v6054_v53 = vld [vmem:[#allocation7 + $0x28] sm:$0xff]   ;;  %s8102_s17 = sld [smem:[#allocation37_spill]] }
 0x17a   : > { %5482 = vmatprep.subr.bf16.mxu1 %v5988_v63 }
 0x17b   : > { %5275 = vmatpush3.bf16.msra.mxu0 %v5977_v55  ;;  %v6056_v55 = vld [vmem:[#allocation7 + $0x38] sm:$0xff]  }
 0x17c   : > { %5276 = vmatprep.subr.bf16.mxu0 %v5983_v58 }
 0x17d   : > { %5483 = vmatpush3.bf16.msra.mxu1 %v5988_v63 }
 0x17e   : > { %1612 = vmatmul.mubr.bf16.gmra.mrb[8].mxu0 %v5964_v48  ;;  %5484 = vmatprep.subr.bf16.mxu1 %v5997_v4  ;;  %v6049_v48 = vld [vmem:[#allocation7] sm:$0xff]  }
 0x17f   : > { %1619 = vmatprep.mubr.bf16.mxu0 %v5971_v51  ;;  %5277 = vmatpush3.bf16.msra.mxu0 %v5986_v61  ;;  %v6052_v51 = vld [vmem:[#allocation7 + $0x18] sm:$0xff]  }
 0x180   : > { %1709 = vmatmul.mubr.bf16.gmra.mrb[8].mxu1 %v5969_v52  ;;  %5278 = vmatprep.subr.bf16.mxu0 %v5992_v0  ;;  %v6053_v52 = vld [vmem:[#allocation7 + $0x20] sm:$0xff]  }
 0x181   : > { %1716 = vmatprep.mubr.bf16.mxu1 %v5975_v54  ;;  %5485 = vmatpush3.bf16.msra.mxu1 %v5997_v4  ;;  %v6055_v54 = vld [vmem:[#allocation7 + $0x30] sm:$0xff]  }
 0x182   : > { %5486 = vmatprep.subr.bf16.mxu1 %v6006_v9 }
 0x183   : > { %5279 = vmatpush3.bf16.msra.mxu0 %v5995_v3 }
 0x184   : > { %5280 = vmatprep.subr.bf16.mxu0 %v6001_v7  ;;  %v6058_v7 = vld [vmem:[#allocation8 + $0x8] sm:$0xff]  }
 0x185   : > { %5487 = vmatpush3.bf16.msra.mxu1 %v6006_v9 }
 0x186   : > { %1620 = vmatmul.mubr.bf16.gmra.mrb[12].mxu0 %v5973_v57  ;;  %5488 = vmatprep.subr.bf16.mxu1 %v6015_v16  ;;  %v7319_v57 = vld [vmem:[%s8034_s10] ss:$0 sm:$0xff] }
 0x187   : > { %1627 = vmatprep.mubr.bf16.mxu0 %v5980_v60  ;;  %5281 = vmatpush3.bf16.msra.mxu0 %v6004_v8 }
 0x188   : > { %1717 = vmatmul.mubr.bf16.gmra.mrb[12].mxu1 %v5978_v59  ;;  %5282 = vmatprep.subr.bf16.mxu0 %v6010_v12 }
 0x189   : > { %1724 = vmatprep.mubr.bf16.mxu1 %v5984_v62  ;;  %5489 = vmatpush3.bf16.msra.mxu1 %v6015_v16 }
 0x18a   : > { %5490 = vmatprep.subr.bf16.mxu1 %v6019_v17 }
 0x18b   : > { %5283 = vmatpush3.bf16.msra.mxu0 %v6013_v14 }
 0x18d   : > { %5491 = vmatpush3.bf16.msra.mxu1 %v6019_v17 }
 0x18e   : > { %1628 = vmatmul.mubr.bf16.gmra.mrb[16].mxu0 %v5982_v1  ;;  %5508 = vmatprep.subr.bf16.mxu1 %v6049_v48 }
 0x18f   : > { %1635 = vmatprep.mubr.bf16.mxu0 %v5989_v2 }
 0x190   : > { %1725 = vmatmul.mubr.bf16.gmra.mrb[16].mxu1 %v5987_v5 }
 0x191   : > { %1732 = vmatprep.mubr.bf16.mxu1 %v5993_v6  ;;  %v6057_v6 = vld [vmem:[#allocation8] sm:$0xff]  }
 0x192   : > { %5540 = vmatprep.subr.bf16.mxu0 %v6057_v6 }
 0x196   : > { %1636 = vmatmul.mubr.bf16.gmra.mrb[20].mxu0 %v5991_v10 }
 0x197   : > { %1643 = vmatprep.mubr.bf16.mxu0 %v5998_v11 }
 0x198   : > { %1733 = vmatmul.mubr.bf16.gmra.mrb[20].mxu1 %v5996_v13 }
 0x199   : > { %1740 = vmatprep.mubr.bf16.mxu1 %v6002_v15  ;;  %v6059_v15 = vld [vmem:[#allocation8 + $0x10] sm:$0xff]  }
 0x19e   : > { %1644 = vmatmul.mubr.bf16.gmra.mrb[24].mxu0 %v6000_v18 }
 0x19f   : > { %1651 = vmatprep.mubr.bf16.mxu0 %v6007_v19 }
 0x1a0   : > { %1741 = vmatmul.mubr.bf16.gmra.mrb[24].mxu1 %v6005_v20 }
 0x1a1   : > { %1748 = vmatprep.mubr.bf16.mxu1 %v6011_v21 }
 0x1a6   : > { %1652 = vmatmul.mubr.bf16.gmra.mrb[28].mxu0 %v6009_v22 }
 0x1a7   : > { %1789 = vmatprep.mubr.bf16.mxu0 %v6018_v23 }
 0x1a8   : > { %1749 = vmatmul.mubr.bf16.gmra.mrb[28].mxu1 %v6014_v24 }
 0x1a9   : > { %5492 = vmatprep.mubr.bf16.mxu1 %v6020_v25  ;;  %v6060_v25 = vld [vmem:[#allocation8 + $0x18] sm:$0xff]  }
 0x1ae   : > { %1790 = vmatmul.mubr.bf16.vlgmr.msra.gmra.mrb[32].mxu0 %v6016_v26 }
 0x1af   : > { %1797 = vmatprep.mubr.bf16.mxu0 %v6022_v27  ;;  %5541 = vmatpush3.bf16.msra.mxu0 %v6057_v6 }
 0x1b0   : > { %5493 = vmatmul.mubr.bf16.vlgmr.msra.gmra.mrb[32].mxu1 %v6021_v28  ;;  %5542 = vmatprep.subr.bf16.mxu0 %v6058_v7 }
 0x1b1   : > { %5496 = vmatprep.mubr.bf16.mxu1 %v6028_v29  ;;  %5509 = vmatpush3.bf16.msra.mxu1 %v6049_v48 }
 0x1b2   : > { %5510 = vmatprep.subr.bf16.mxu1 %v6050_v49 }
 0x1b3   : > { %5543 = vmatpush3.bf16.msra.mxu0 %v6058_v7 }
 0x1b4   : > { %5544 = vmatprep.subr.bf16.mxu0 %v6059_v15 }
 0x1b5   : > { %5511 = vmatpush3.bf16.msra.mxu1 %v6050_v49 }
 0x1b6   : > { %1798 = vmatmul.mubr.bf16.gmra.mrb[36].mxu0 %v6024_v30  ;;  %5512 = vmatprep.subr.bf16.mxu1 %v6051_v50 }
 0x1b7   : > { %1805 = vmatprep.mubr.bf16.mxu0 %v6025_v31  ;;  %5545 = vmatpush3.bf16.msra.mxu0 %v6059_v15 }
 0x1b8   : > { %5497 = vmatmul.mubr.bf16.gmra.mrb[36].mxu1 %v6029_v32  ;;  %5546 = vmatprep.subr.bf16.mxu0 %v6060_v25 }
 0x1b9   : > { %5500 = vmatprep.mubr.bf16.mxu1 %v6036_v33  ;;  %5513 = vmatpush3.bf16.msra.mxu1 %v6051_v50  ;;  %v6061_v33 = vld [vmem:[#allocation8 + $0x20] sm:$0xff]  }
 0x1ba   : > { %5514 = vmatprep.subr.bf16.mxu1 %v6052_v51 }
 0x1bb   : > { %5547 = vmatpush3.bf16.msra.mxu0 %v6060_v25 }
 0x1bc   : > { %5548 = vmatprep.subr.bf16.mxu0 %v6061_v33 }
 0x1bd   : > { %5515 = vmatpush3.bf16.msra.mxu1 %v6052_v51  ;;  %v6063_v51 = vld [vmem:[#allocation8 + $0x30] sm:$0xff]  }
 0x1be   : > { %1806 = vmatmul.mubr.bf16.gmra.mrb[40].mxu0 %v6027_v34  ;;  %5516 = vmatprep.subr.bf16.mxu1 %v6053_v52 }
 0x1bf   : > { %1813 = vmatprep.mubr.bf16.mxu0 %v6030_v35  ;;  %5549 = vmatpush3.bf16.msra.mxu0 %v6061_v33 }
 0x1c0   : > { %5501 = vmatmul.mubr.bf16.gmra.mrb[40].mxu1 %v6037_v36 }
 0x1c1   : > { %5504 = vmatprep.mubr.bf16.mxu1 %v6044_v37  ;;  %5517 = vmatpush3.bf16.msra.mxu1 %v6053_v52 }
 0x1c2   : > { %5518 = vmatprep.subr.bf16.mxu1 %v6054_v53 }
 0x1c5   : > { %5519 = vmatpush3.bf16.msra.mxu1 %v6054_v53 }
 0x1c6   : > { %1814 = vmatmul.mubr.bf16.gmra.mrb[44].mxu0 %v6032_v38  ;;  %5520 = vmatprep.subr.bf16.mxu1 %v6055_v54 }
 0x1c7   : > { %1821 = vmatprep.mubr.bf16.mxu0 %v6033_v39 }
 0x1c8   : > { %5505 = vmatmul.mubr.bf16.gmra.mrb[44].mxu1 %v6045_v40 }
 0x1c9   : > { %5521 = vmatpush3.bf16.msra.mxu1 %v6055_v54 }
 0x1ca   : > { %5522 = vmatprep.subr.bf16.mxu1 %v6056_v55 }
 0x1cd   : > { %5523 = vmatpush3.bf16.msra.mxu1 %v6056_v55 }
 0x1ce   : > { %1822 = vmatmul.mubr.bf16.gmra.mrb[48].mxu0 %v6035_v41 }
 0x1cf   : > { %1829 = vmatprep.mubr.bf16.mxu0 %v6038_v42 }
 0x1d6   : > { %1830 = vmatmul.mubr.bf16.gmra.mrb[52].mxu0 %v6040_v43  ;;  %v6062_v43 = vld [vmem:[#allocation8 + $0x28] sm:$0xff]  }
 0x1d7   : > { %1837 = vmatprep.mubr.bf16.mxu0 %v6041_v44  ;;  %5550 = vmatprep.subr.bf16.mxu0 %v6062_v43 }
 0x1d8   : > { %5551 = vmatpush3.bf16.msra.mxu0 %v6062_v43 }
 0x1d9   : > { %5552 = vmatprep.subr.bf16.mxu0 %v6063_v51 }
 0x1dc   : > { %5553 = vmatpush3.bf16.msra.mxu0 %v6063_v51 }
 0x1de   : > { %1838 = vmatmul.mubr.bf16.gmra.mrb[56].mxu0 %v6043_v45 }
 0x1df   : > { %1845 = vmatprep.mubr.bf16.mxu0 %v6046_v46 }
 0x1e6   : > { %1846 = vmatmul.mubr.bf16.gmra.mrb[60].mxu0 %v6048_v47 }
 0x241   : > { %v5156_v56 = vpop.f32.mrb[0].mxu0 }
 0x242   : > { %v5157_v58 = vpop.f32.mrb[1].mxu0 }
 0x243   : > { %v5158_v59 = vadd.f32 %v5157_v58, %v5156_v56  ;;  %v5159_v60 = vpop.f32.mrb[2].mxu0  ;;  %v5220_v61 = vpop.f32.mrb[0].mxu1 }
 0x244   : > { %v5160_v62 = vpop.f32.mrb[3].mxu0  ;;  %v5221_v1 = vpop.f32.mrb[1].mxu1 }
 0x245   : > { %v1598_v63 = vadd.f32 %v5158_v59, %v7319_v57  ;;  %v5161_v0 = vadd.f32 %v5160_v62, %v5159_v60  ;;  %v5222_v2 = vadd.f32 %v5221_v1, %v5220_v61  ;;  %v5223_v3 = vpop.f32.mrb[2].mxu1 }
 0x246   : > { %v5224_v5 = vpop.f32.mrb[3].mxu1 }
 0x247   : > { %v1601_v4 = vadd.f32 %v5161_v0, %v7319_v57  ;;  %v7323_v8 = vadd.f32 %v5222_v2, %v1598_v63  ;;  %v5225_v9 = vadd.f32 %v5224_v5, %v5223_v3 }
 0x249   : > { %v5162_v10 = vpop.f32.mrb[4].mxu0  ;;  %v7325_v11 = vadd.f32 %v5225_v9, %v1601_v4 }
 0x24a   : > { %v5163_v12 = vpop.f32.mrb[5].mxu0 }
 0x24b   : > { %v5164_v13 = vadd.f32 %v5163_v12, %v5162_v10  ;;  %v5165_v14 = vpop.f32.mrb[6].mxu0  ;;  %v5226_v16 = vpop.f32.mrb[4].mxu1 }
 0x24c   : > { %v5166_v17 = vpop.f32.mrb[7].mxu0  ;;  %v5227_v20 = vpop.f32.mrb[5].mxu1 }
 0x24d   : > { %v1606_v18 = vadd.f32 %v5164_v13, %v7319_v57  ;;  %v5167_v19 = vadd.f32 %v5166_v17, %v5165_v14  ;;  %v5228_v21 = vadd.f32 %v5227_v20, %v5226_v16  ;;  %v5229_v22 = vpop.f32.mrb[6].mxu1 }
 0x24e   : > { %v5230_v24 = vpop.f32.mrb[7].mxu1 }
 0x24f   : > { %v1609_v23 = vadd.f32 %v5167_v19, %v7319_v57  ;;  %v7329_v26 = vadd.f32 %v5228_v21, %v1606_v18  ;;  %v5231_v27 = vadd.f32 %v5230_v24, %v5229_v22 }
 0x251   : > { %v5168_v28 = vpop.f32.mrb[8].mxu0  ;;  %v7331_v29 = vadd.f32 %v5231_v27, %v1609_v23 }
 0x252   : > { %v5169_v30 = vpop.f32.mrb[9].mxu0 }
 0x253   : > { %v5170_v31 = vadd.f32 %v5169_v30, %v5168_v28  ;;  %v5171_v32 = vpop.f32.mrb[10].mxu0  ;;  %v5232_v34 = vpop.f32.mrb[8].mxu1 }
 0x254   : > { %v5172_v35 = vpop.f32.mrb[11].mxu0  ;;  %v5233_v38 = vpop.f32.mrb[9].mxu1 }
 0x255   : > { %v1614_v36 = vadd.f32 %v5170_v31, %v7319_v57  ;;  %v5173_v37 = vadd.f32 %v5172_v35, %v5171_v32  ;;  %v5234_v39 = vadd.f32 %v5233_v38, %v5232_v34  ;;  %v5235_v40 = vpop.f32.mrb[10].mxu1 }
 0x256   : > { %v5236_v42 = vpop.f32.mrb[11].mxu1 }
 0x257   : > { %v1617_v41 = vadd.f32 %v5173_v37, %v7319_v57  ;;  %v7335_v44 = vadd.f32 %v5234_v39, %v1614_v36  ;;  %v5237_v45 = vadd.f32 %v5236_v42, %v5235_v40 }
 0x259   : > { %v5174_v46 = vpop.f32.mrb[12].mxu0  ;;  %v7337_v47 = vadd.f32 %v5237_v45, %v1617_v41 }
 0x25a   : > { %v5175_v48 = vpop.f32.mrb[13].mxu0 }
 0x25b   : > { %v5176_v49 = vadd.f32 %v5175_v48, %v5174_v46  ;;  %v5177_v50 = vpop.f32.mrb[14].mxu0  ;;  %v5238_v52 = vpop.f32.mrb[12].mxu1 }
 0x25c   : > { %v5178_v53 = vpop.f32.mrb[15].mxu0  ;;  %v5239_v56 = vpop.f32.mrb[13].mxu1 }
 0x25d   : > { %v1622_v54 = vadd.f32 %v5176_v49, %v7319_v57  ;;  %v5179_v55 = vadd.f32 %v5178_v53, %v5177_v50  ;;  %v5240_v58 = vadd.f32 %v5239_v56, %v5238_v52  ;;  %v5241_v59 = vpop.f32.mrb[14].mxu1 }
 0x25e   : > { %v5242_v61 = vpop.f32.mrb[15].mxu1 }
 0x25f   : > { %v1625_v60 = vadd.f32 %v5179_v55, %v7319_v57  ;;  %v7341_v62 = vadd.f32 %v5240_v58, %v1622_v54  ;;  %v5243_v63 = vadd.f32 %v5242_v61, %v5241_v59 }
 0x261   : > { %v5180_v0 = vpop.f32.mrb[16].mxu0  ;;  %v7343_v1 = vadd.f32 %v5243_v63, %v1625_v60 }
 0x262   : > { %v5181_v2 = vpop.f32.mrb[17].mxu0 }
 0x263   : > { %v5182_v3 = vadd.f32 %v5181_v2, %v5180_v0  ;;  %v5183_v4 = vpop.f32.mrb[18].mxu0  ;;  %v5244_v5 = vpop.f32.mrb[16].mxu1 }
 0x264   : > { %v5184_v6 = vpop.f32.mrb[19].mxu0  ;;  %v5245_v10 = vpop.f32.mrb[17].mxu1 }
 0x265   : > { %v1630_v7 = vadd.f32 %v5182_v3, %v7319_v57  ;;  %v5185_v9 = vadd.f32 %v5184_v6, %v5183_v4  ;;  %v5246_v12 = vadd.f32 %v5245_v10, %v5244_v5  ;;  %v5247_v13 = vpop.f32.mrb[18].mxu1 }
 0x266   : > { %v5248_v15 = vpop.f32.mrb[19].mxu1 }
 0x267   : > { %v1633_v14 = vadd.f32 %v5185_v9, %v7319_v57  ;;  %v7347_v16 = vadd.f32 %v5246_v12, %v1630_v7  ;;  %v5249_v17 = vadd.f32 %v5248_v15, %v5247_v13 }
 0x269   : > { %v5186_v18 = vpop.f32.mrb[20].mxu0  ;;  %v7349_v19 = vadd.f32 %v5249_v17, %v1633_v14 }
 0x26a   : > { %v5187_v20 = vpop.f32.mrb[21].mxu0 }
 0x26b   : > { %v5188_v21 = vadd.f32 %v5187_v20, %v5186_v18  ;;  %v5189_v22 = vpop.f32.mrb[22].mxu0  ;;  %v5250_v23 = vpop.f32.mrb[20].mxu1 }
 0x26c   : > { %v5190_v24 = vpop.f32.mrb[23].mxu0  ;;  %v5251_v28 = vpop.f32.mrb[21].mxu1 }
 0x26d   : > { %v1638_v25 = vadd.f32 %v5188_v21, %v7319_v57  ;;  %v5191_v27 = vadd.f32 %v5190_v24, %v5189_v22  ;;  %v5252_v30 = vadd.f32 %v5251_v28, %v5250_v23  ;;  %v5253_v31 = vpop.f32.mrb[22].mxu1 }
 0x26e   : > { %v5254_v33 = vpop.f32.mrb[23].mxu1 }
 0x26f   : > { %v1641_v32 = vadd.f32 %v5191_v27, %v7319_v57  ;;  %v7353_v34 = vadd.f32 %v5252_v30, %v1638_v25  ;;  %v5255_v35 = vadd.f32 %v5254_v33, %v5253_v31 }
 0x271   : > { %v5192_v36 = vpop.f32.mrb[24].mxu0  ;;  %v7355_v37 = vadd.f32 %v5255_v35, %v1641_v32 }
 0x272   : > { %v5193_v38 = vpop.f32.mrb[25].mxu0 }
 0x273   : > { %v5194_v39 = vadd.f32 %v5193_v38, %v5192_v36  ;;  %v5195_v40 = vpop.f32.mrb[26].mxu0  ;;  %v5256_v41 = vpop.f32.mrb[24].mxu1 }
 0x274   : > { %v5196_v42 = vpop.f32.mrb[27].mxu0  ;;  %v5257_v46 = vpop.f32.mrb[25].mxu1 }
 0x275   : > { %v1646_v43 = vadd.f32 %v5194_v39, %v7319_v57  ;;  %v5197_v45 = vadd.f32 %v5196_v42, %v5195_v40  ;;  %v5258_v48 = vadd.f32 %v5257_v46, %v5256_v41  ;;  %v5259_v49 = vpop.f32.mrb[26].mxu1 }
 0x276   : > { %v5260_v51 = vpop.f32.mrb[27].mxu1 }
 0x277   : > { %v1649_v50 = vadd.f32 %v5197_v45, %v7319_v57  ;;  %v7359_v52 = vadd.f32 %v5258_v48, %v1646_v43  ;;  %v5261_v53 = vadd.f32 %v5260_v51, %v5259_v49 }
 0x279   : > { %v5198_v54 = vpop.f32.mrb[28].mxu0  ;;  %v7361_v55 = vadd.f32 %v5261_v53, %v1649_v50 }
 0x27a   : > { %v5199_v56 = vpop.f32.mrb[29].mxu0 }
 0x27b   : > { %v5200_v58 = vadd.f32 %v5199_v56, %v5198_v54  ;;  %v5201_v59 = vpop.f32.mrb[30].mxu0  ;;  %v5262_v60 = vpop.f32.mrb[28].mxu1 }
 0x27c   : > { %v5202_v61 = vpop.f32.mrb[31].mxu0  ;;  %v5263_v2 = vpop.f32.mrb[29].mxu1 }
 0x27d   : > { %v1654_v63 = vadd.f32 %v5200_v58, %v7319_v57  ;;  %v5203_v0 = vadd.f32 %v5202_v61, %v5201_v59  ;;  %v5264_v3 = vadd.f32 %v5263_v2, %v5262_v60  ;;  %v5265_v4 = vpop.f32.mrb[30].mxu1 }
 0x27e   : > { %v5266_v6 = vpop.f32.mrb[31].mxu1 }
 0x27f   : > { %v1657_v5 = vadd.f32 %v5203_v0, %v7319_v57  ;;  %v7365_v7 = vadd.f32 %v5264_v3, %v1654_v63  ;;  %v5267_v9 = vadd.f32 %v5266_v6, %v5265_v4 }
 0x281   : > { %v5284_v10 = vpop.f32.mrb[32].mxu0  ;;  %v7367_v12 = vadd.f32 %v5267_v9, %v1657_v5 }
 0x282   : > { %v5285_v13 = vpop.f32.mrb[33].mxu0 }
 0x283   : > { %v5286_v14 = vadd.f32 %v5285_v13, %v5284_v10  ;;  %v5287_v15 = vpop.f32.mrb[34].mxu0  ;;  %v5494_v18 = vpop.f32.mrb[32].mxu1 }
 0x284   : > { %v5288_v17 = vpop.f32.mrb[35].mxu0  ;;  %v1888_v22 = vpop.f32.mrb[33].mxu1 }
 0x285   : > { %v5289_v20 = vadd.f32 %v5288_v17, %v5287_v15  ;;  %v1792_v21 = vadd.f32 %v5286_v14, %v7323_v8  ;;  %v5495_v23 = vpop.f32.mrb[34].mxu1 }
 0x286   : > { %v1891_v25 = vpop.f32.mrb[35].mxu1 }
 0x287   : > { %v1889_v24 = vadd.f32 %v1888_v22, %v1792_v21  ;;  %v1795_v57 = vadd.f32 %v5289_v20, %v7325_v11 }
 0x289   : > { %v1892_v27 = vadd.f32 %v1891_v25, %v1795_v57  ;;  %v5290_v28 = vpop.f32.mrb[36].mxu0  ;;  %v1951_v31 = vmax.f32 %v1889_v24, 0.0 }
 0x28a   : > { %v5291_v30 = vpop.f32.mrb[37].mxu0 }
 0x28b   : > { %v1952_v32 = vmax.f32 %v1892_v27, 0.0  ;;  %v5292_v33 = vadd.f32 %v5291_v30, %v5290_v28  ;;  %v5293_v35 = vpop.f32.mrb[38].mxu0  ;;  %v5498_v38 = vpop.f32.mrb[36].mxu1 }
 0x28c   : > { %v5294_v36 = vpop.f32.mrb[39].mxu0  ;;  %v1904_v8 = vpop.f32.mrb[37].mxu1 }
 0x28d   : > { %v1967_v39 = vpack.c.bf16 %v1952_v32, %v1951_v31  ;;  %v1800_v40 = vadd.f32 %v5292_v33, %v7329_v26  ;;  %v5295_v41 = vadd.f32 %v5294_v36, %v5293_v35  ;;  %v5499_v42 = vpop.f32.mrb[38].mxu1 }
 0x28e   : > { %v1907_v11 = vpop.f32.mrb[39].mxu1 }
 0x28f   : > { %v1897_v43 = vadd.f32 %v5494_v18, %v1800_v40  ;;  %v1803_v45 = vadd.f32 %v5295_v41, %v7331_v29  ;;  %5524 = vmatprep.mubr.bf16.mxu1 %v1967_v39 }
 0x291   : > { %v1900_v46 = vadd.f32 %v5495_v23, %v1803_v45  ;;  %v5296_v48 = vpop.f32.mrb[40].mxu0  ;;  %v1953_v50 = vmax.f32 %v1897_v43, 0.0 }
 0x292   : > { %v5297_v49 = vpop.f32.mrb[41].mxu0 }
 0x293   : > { %v1954_v51 = vmax.f32 %v1900_v46, 0.0  ;;  %v5298_v53 = vadd.f32 %v5297_v49, %v5296_v48  ;;  %v5299_v54 = vpop.f32.mrb[42].mxu0  ;;  %v5502_v58 = vpop.f32.mrb[40].mxu1 }
 0x294   : > { %v5300_v56 = vpop.f32.mrb[43].mxu0  ;;  %v1920_v61 = vpop.f32.mrb[41].mxu1 }
 0x295   : > { %v1968_v59 = vpack.c.bf16 %v1954_v51, %v1953_v50  ;;  %v5301_v60 = vadd.f32 %v5300_v56, %v5299_v54  ;;  %v1808_v26 = vadd.f32 %v5298_v53, %v7335_v44  ;;  %v5503_v63 = vpop.f32.mrb[42].mxu1 }
 0x296   : > { %v1923_v2 = vpop.f32.mrb[43].mxu1 }
 0x297   : > { %v1905_v0 = vadd.f32 %v1904_v8, %v1808_v26  ;;  %5525 = vmatmul.mubr.bf16.vlgmr.msra.gmra.mrb[48].mxu1 %v1968_v59  ;;  %v1811_v29 = vadd.f32 %v5301_v60, %v7337_v47 }
 0x299   : > { %v1908_v3 = vadd.f32 %v1907_v11, %v1811_v29  ;;  %v5302_v4 = vpop.f32.mrb[44].mxu0  ;;  %v1955_v6 = vmax.f32 %v1905_v0, 0.0 }
 0x29a   : > { %v5303_v5 = vpop.f32.mrb[45].mxu0 }
 0x29b   : > { %v1956_v9 = vmax.f32 %v1908_v3, 0.0  ;;  %v5304_v10 = vadd.f32 %v5303_v5, %v5302_v4  ;;  %v5305_v13 = vpop.f32.mrb[46].mxu0  ;;  %v7375_v15 = vpop.f32.mrb[44].mxu1 }
 0x29c   : > { %v5306_v14 = vpop.f32.mrb[47].mxu0  ;;  %v1936_v20 = vpop.f32.mrb[45].mxu1 }
 0x29d   : > { %v1969_v17 = vpack.c.bf16 %v1956_v9, %v1955_v6  ;;  %v1816_v44 = vadd.f32 %v5304_v10, %v7341_v62  ;;  %v5307_v18 = vadd.f32 %v5306_v14, %v5305_v13  ;;  %v5507_v21 = vpop.f32.mrb[46].mxu1 }
 0x29e   : > { %v1939_v23 = vpop.f32.mrb[47].mxu1 }
 0x29f   : > { %v1913_v22 = vadd.f32 %v5498_v38, %v1816_v44  ;;  %v1819_v47 = vadd.f32 %v5307_v18, %v7343_v1  ;;  %5528 = vmatprep.mubr.bf16.mxu1 %v1969_v17 }
 0x2a1   : > { %v1916_v24 = vadd.f32 %v5499_v42, %v1819_v47  ;;  %v5308_v57 = vpop.f32.mrb[48].mxu0  ;;  %v1957_v27 = vmax.f32 %v1913_v22, 0.0  ;;  %v6065_v22 = vld [vmem:[#allocation10] sm:$0xff]   ;;  %v6066_v47 = vld [vmem:[#allocation10 + $0x8] sm:$0xff]  }
 0x2a2   : > { %v5309_v25 = vpop.f32.mrb[49].mxu0  ;;  %5572 = vmatprep.subr.bf16.mxu1 %v6065_v22 }
 0x2a3   : > { %v1958_v28 = vmax.f32 %v1916_v24, 0.0  ;;  %v5310_v30 = vadd.f32 %v5309_v25, %v5308_v57  ;;  %v5311_v31 = vpop.f32.mrb[50].mxu0  ;;  %5573 = vmatpush3.bf16.msra.mxu1 %v6065_v22  ;;  %v6072_v22 = vld [vmem:[#allocation10 + $0x38] sm:$0xff]  }
 0x2a4   : > { %v5312_v32 = vpop.f32.mrb[51].mxu0  ;;  %5574 = vmatprep.subr.bf16.mxu1 %v6066_v47 }
 0x2a5   : > { %v5313_v33 = vadd.f32 %v5312_v32, %v5311_v31  ;;  %v1824_v35 = vadd.f32 %v5310_v30, %v7347_v16  ;;  %v1970_v62 = vpack.c.bf16 %v1958_v28, %v1957_v27 }
 0x2a7   : > { %v1921_v36 = vadd.f32 %v1920_v61, %v1824_v35  ;;  %5529 = vmatmul.mubr.bf16.gmra.mrb[52].mxu1 %v1970_v62  ;;  %v1827_v38 = vadd.f32 %v5313_v33, %v7349_v19 }
 0x2a8   : > { %5575 = vmatpush3.bf16.msra.mxu1 %v6066_v47  ;;  %v6073_v47 = vld [vmem:[#allocation11] sm:$0xff]  }
 0x2a9   : > { %v1924_v39 = vadd.f32 %v1923_v2, %v1827_v38  ;;  %v5314_v1 = vpop.f32.mrb[52].mxu0  ;;  %v1959_v41 = vmax.f32 %v1921_v36, 0.0 }
 0x2aa   : > { %v5315_v40 = vpop.f32.mrb[53].mxu0 }
 0x2ab   : > { %v1960_v8 = vmax.f32 %v1924_v39, 0.0  ;;  %v5316_v42 = vadd.f32 %v5315_v40, %v5314_v1  ;;  %v5317_v43 = vpop.f32.mrb[54].mxu0 }
 0x2ac   : > { %v5318_v45 = vpop.f32.mrb[55].mxu0 }
 0x2ad   : > { %v1971_v11 = vpack.c.bf16 %v1960_v8, %v1959_v41  ;;  %v1832_v46 = vadd.f32 %v5316_v42, %v7353_v34  ;;  %v5319_v48 = vadd.f32 %v5318_v45, %v5317_v43 }
 0x2af   : > { %v1929_v49 = vadd.f32 %v5502_v58, %v1832_v46  ;;  %v1835_v16 = vadd.f32 %v5319_v48, %v7355_v37  ;;  %5532 = vmatprep.mubr.bf16.mxu1 %v1971_v11 }
 0x2b1   : > { %v1932_v50 = vadd.f32 %v5503_v63, %v1835_v16  ;;  %v5320_v51 = vpop.f32.mrb[56].mxu0  ;;  %v1961_v19 = vmax.f32 %v1929_v49, 0.0 }
 0x2b2   : > { %v5321_v53 = vpop.f32.mrb[57].mxu0 }
 0x2b3   : > { %v1962_v54 = vmax.f32 %v1932_v50, 0.0  ;;  %v5322_v56 = vadd.f32 %v5321_v53, %v5320_v51  ;;  %v5323_v59 = vpop.f32.mrb[58].mxu0 }
 0x2b4   : > { %v5324_v60 = vpop.f32.mrb[59].mxu0 }
 0x2b5   : > { %v5325_v26 = vadd.f32 %v5324_v60, %v5323_v59  ;;  %v1840_v61 = vadd.f32 %v5322_v56, %v7359_v52  ;;  %v1972_v0 = vpack.c.bf16 %v1962_v54, %v1961_v19 }
 0x2b7   : > { %v1937_v29 = vadd.f32 %v1936_v20, %v1840_v61  ;;  %5533 = vmatmul.mubr.bf16.gmra.mrb[56].mxu1 %v1972_v0  ;;  %v1843_v34 = vadd.f32 %v5325_v26, %v7361_v55  ;;  %v6064_v20 = vld [vmem:[#allocation8 + $0x38] sm:$0xff]  }
 0x2b8   : > { %5554 = vmatprep.subr.bf16.mxu0 %v6064_v20 }
 0x2b9   : > { %v1940_v58 = vadd.f32 %v1939_v23, %v1843_v34  ;;  %v5326_v2 = vpop.f32.mrb[60].mxu0  ;;  %v1963_v3 = vmax.f32 %v1937_v29, 0.0  ;;  %5555 = vmatpush3.bf16.msra.mxu0 %v6064_v20  ;;  %v5016_v23 = vld [vmem:[%s8099_s5] ss:$0 sm:$0xff]  ;;  %v6071_v20 = vld [vmem:[#allocation10 + $0x30] sm:$0xff]   ;;  %s8107_s5 = sld [smem:[#allocation42_spill]] }
 0x2ba   : > { %v5327_v37 = vpop.f32.mrb[61].mxu0  ;;  %5604 = vmatprep.subr.bf16.mxu0 %v6073_v47 }
 0x2bb   : > { %v1964_v63 = vmax.f32 %v1940_v58, 0.0  ;;  %v5328_v4 = vadd.f32 %v5327_v37, %v5326_v2  ;;  %v5329_v5 = vpop.f32.mrb[62].mxu0 }
 0x2bc   : > { %v5330_v6 = vpop.f32.mrb[63].mxu0 }
 0x2bd   : > { %v1973_v9 = vpack.c.bf16 %v1964_v63, %v1963_v3  ;;  %v1848_v10 = vadd.f32 %v5328_v4, %v7365_v7  ;;  %v5331_v13 = vadd.f32 %v5330_v6, %v5329_v5  ;;  %v6067_v7 = vld [vmem:[#allocation10 + $0x10] sm:$0xff]  }
 0x2be   : > { %5576 = vmatprep.subr.bf16.mxu1 %v6067_v7 }
 0x2bf   : > { %v1945_v14 = vadd.f32 %v7375_v15, %v1848_v10  ;;  %v1851_v52 = vadd.f32 %v5331_v13, %v7367_v12  ;;  %5536 = vmatprep.mubr.bf16.mxu1 %v1973_v9  ;;  %v6068_v15 = vld [vmem:[#allocation10 + $0x18] sm:$0xff]   ;;  %5577 = vmatpush3.bf16.msra.mxu1 %v6067_v7  ;;  %v6069_v12 = vld [vmem:[#allocation10 + $0x20] sm:$0xff]   ;;  %v6074_v7 = vld [vmem:[#allocation11 + $0x8] sm:$0xff]   ;;  %s7976_s2 = scalar_lea.hbm %s8107_s5, %s5768_s23 }
 0x2c0   : > { %5578 = vmatprep.subr.bf16.mxu1 %v6068_v15 }
 0x2c1   : > { %v1948_v17 = vadd.f32 %v5507_v21, %v1851_v52  ;;  %v1965_v44 = vmax.f32 %v1945_v14, 0.0  ;;  %v6070_v21 = vld [vmem:[#allocation10 + $0x28] sm:$0xff]  }
 0x2c3   : > { %v1966_v55 = vmax.f32 %v1948_v17, 0.0  ;;  %5579 = vmatpush3.bf16.msra.mxu1 %v6068_v15  ;;  %v6075_v15 = vld [vmem:[#allocation11 + $0x10] sm:$0xff]  }
 0x2c4   : > { %5580 = vmatprep.subr.bf16.mxu1 %v6069_v12 }
 0x2c5   : > { %v1974_v18 = vpack.c.bf16 %v1966_v55, %v1965_v44 }
 0x2c7   : > { %5537 = vmatmul.mubr.bf16.gmra.mrb[60].mxu1 %v1974_v18 }
 0x2c8   : > { %5581 = vmatpush3.bf16.msra.mxu1 %v6069_v12  ;;  %v6076_v12 = vld [vmem:[#allocation11 + $0x18] sm:$0xff]  }
 0x2c9   : > { %5582 = vmatprep.subr.bf16.mxu1 %v6070_v21 }
 0x2cc   : > { %5583 = vmatpush3.bf16.msra.mxu1 %v6070_v21  ;;  %v6077_v21 = vld [vmem:[#allocation11 + $0x20] sm:$0xff]  }
 0x2cd   : > { %5584 = vmatprep.subr.bf16.mxu1 %v6071_v20 }
 0x2d0   : > { %5585 = vmatpush3.bf16.msra.mxu1 %v6071_v20 }
 0x2d1   : > { %5586 = vmatprep.subr.bf16.mxu1 %v6072_v22 }
 0x2d4   : > { %5587 = vmatpush3.bf16.msra.mxu1 %v6072_v22  ;;  %v6079_v22 = vld [vmem:[#allocation11 + $0x30] sm:$0xff]  }
 0x36a   : > { %v5526_v24 = vpop.f32.mrb[48].mxu1 }
 0x36b   : > { %v2089_v57 = vadd.f32 %v5526_v24, %v5016_v23  ;;  %v2080_v25 = vpop.f32.mrb[49].mxu1  ;;  %v5025_v24 = vld [vmem:[%s8100_s29] ss:$0 sm:$0xff]  ;;  %s6794_s29 = smov [#allocation19]  }
 0x36c   : > { %v2081_v27 = vadd.f32 %v5016_v23, %v2080_v25  ;;  %v5527_v28 = vpop.f32.mrb[50].mxu1 }
 0x36d   : > { %v2092_v30 = vadd.f32 %v5527_v28, %v5016_v23  ;;  %v2083_v31 = vpop.f32.mrb[51].mxu1  ;;  %v2145_v33 = vmax.f32 %v2089_v57, 0.0 }
 0x36e   : > { %v2084_v32 = vadd.f32 %v5016_v23, %v2083_v31  ;;  %v2143_v62 = vmax.f32 %v2081_v27, 0.0 }
 0x36f   : > { %v2146_v35 = vmax.f32 %v2092_v30, 0.0 }
 0x370   : > { %v2144_v36 = vmax.f32 %v2084_v32, 0.0 }
 0x371   : > { %v2160_v38 = vpack.c.bf16 %v2146_v35, %v2145_v33 }
 0x372   : > { %v2159_v39 = vpack.c.bf16 %v2144_v36, %v2143_v62 }
 0x374   : > { %5556 = vmatprep.mubr.bf16.mxu0 %v2159_v39 }
 0x375   : > { %5557 = vmatmul.mubr.bf16.vlgmr.msra.gmra.mrb[64].mxu0 %v2160_v38 }
 0x376   : > { %5605 = vmatpush3.bf16.msra.mxu0 %v6073_v47  ;;  %v6080_v47 = vld [vmem:[#allocation11 + $0x38] sm:$0xff]  }
 0x377   : > { %5606 = vmatprep.subr.bf16.mxu0 %v6074_v7 }
 0x37a   : > { %v5530_v1 = vpop.f32.mrb[52].mxu1  ;;  %5607 = vmatpush3.bf16.msra.mxu0 %v6074_v7  ;;  %v6081_v7 = vld [vmem:[#allocation13] sm:$0xff]  }
 0x37b   : > { %v2105_v40 = vadd.f32 %v5530_v1, %v5016_v23  ;;  %v2096_v41 = vpop.f32.mrb[53].mxu1  ;;  %5608 = vmatprep.subr.bf16.mxu0 %v6075_v15  ;;  %5636 = vmatprep.subr.bf16.mxu1 %v6081_v7 }
 0x37c   : > { %v2097_v8 = vadd.f32 %v5016_v23, %v2096_v41  ;;  %v5531_v42 = vpop.f32.mrb[54].mxu1 }
 0x37d   : > { %v2108_v43 = vadd.f32 %v5531_v42, %v5016_v23  ;;  %v2099_v45 = vpop.f32.mrb[55].mxu1  ;;  %v2149_v46 = vmax.f32 %v2105_v40, 0.0 }
 0x37e   : > { %v2100_v11 = vadd.f32 %v5016_v23, %v2099_v45  ;;  %v2147_v49 = vmax.f32 %v2097_v8, 0.0  ;;  %5609 = vmatpush3.bf16.msra.mxu0 %v6075_v15  ;;  %v6082_v15 = vld [vmem:[#allocation13 + $0x8] sm:$0xff]  }
 0x37f   : > { %v2150_v48 = vmax.f32 %v2108_v43, 0.0  ;;  %5610 = vmatprep.subr.bf16.mxu0 %v6076_v12 }
 0x380   : > { %v2148_v16 = vmax.f32 %v2100_v11, 0.0 }
 0x381   : > { %v2162_v50 = vpack.c.bf16 %v2150_v48, %v2149_v46 }
 0x382   : > { %v2161_v51 = vpack.c.bf16 %v2148_v16, %v2147_v49  ;;  %5611 = vmatpush3.bf16.msra.mxu0 %v6076_v12  ;;  %v6083_v12 = vld [vmem:[#allocation13 + $0x10] sm:$0xff]  }
 0x383   : > { %5612 = vmatprep.subr.bf16.mxu0 %v6077_v21 }
 0x384   : > { %5560 = vmatprep.mubr.bf16.mxu0 %v2161_v51 }
 0x385   : > { %5561 = vmatmul.mubr.bf16.gmra.mrb[68].mxu0 %v2162_v50 }
 0x386   : > { %5613 = vmatpush3.bf16.msra.mxu0 %v6077_v21  ;;  %v6084_v21 = vld [vmem:[#allocation13 + $0x18] sm:$0xff]  }
 0x38a   : > { %v5534_v53 = vpop.f32.mrb[56].mxu1 }
 0x38b   : > { %v2121_v19 = vadd.f32 %v5534_v53, %v5016_v23  ;;  %v2112_v54 = vpop.f32.mrb[57].mxu1 }
 0x38c   : > { %v2113_v56 = vadd.f32 %v5016_v23, %v2112_v54  ;;  %v5535_v59 = vpop.f32.mrb[58].mxu1 }
 0x38d   : > { %v2124_v60 = vadd.f32 %v5535_v59, %v5016_v23  ;;  %v2115_v26 = vpop.f32.mrb[59].mxu1  ;;  %v2153_v0 = vmax.f32 %v2121_v19, 0.0 }
 0x38e   : > { %v2116_v61 = vadd.f32 %v5016_v23, %v2115_v26  ;;  %v2151_v34 = vmax.f32 %v2113_v56, 0.0 }
 0x38f   : > { %v2154_v29 = vmax.f32 %v2124_v60, 0.0 }
 0x390   : > { %v2152_v58 = vmax.f32 %v2116_v61, 0.0 }
 0x391   : > { %v2164_v2 = vpack.c.bf16 %v2154_v29, %v2153_v0 }
 0x392   : > { %v2163_v37 = vpack.c.bf16 %v2152_v58, %v2151_v34 }
 0x394   : > { %5564 = vmatprep.mubr.bf16.mxu0 %v2163_v37 }
 0x395   : > { %5565 = vmatmul.mubr.bf16.gmra.mrb[72].mxu0 %v2164_v2 }
 0x39a   : > { %v5538_v3 = vpop.f32.mrb[60].mxu1 }
 0x39b   : > { %v2137_v63 = vadd.f32 %v5538_v3, %v5016_v23  ;;  %v2128_v4 = vpop.f32.mrb[61].mxu1 }
 0x39c   : > { %v2129_v5 = vadd.f32 %v5016_v23, %v2128_v4  ;;  %v5539_v6 = vpop.f32.mrb[62].mxu1 }
 0x39d   : > { %v2140_v9 = vadd.f32 %v5539_v6, %v5016_v23  ;;  %v2131_v10 = vpop.f32.mrb[63].mxu1  ;;  %v2157_v14 = vmax.f32 %v2137_v63, 0.0 }
 0x39e   : > { %v2132_v13 = vadd.f32 %v5016_v23, %v2131_v10  ;;  %v2155_v17 = vmax.f32 %v2129_v5, 0.0  ;;  %v6078_v23 = vld [vmem:[#allocation11 + $0x28] sm:$0xff]  }
 0x39f   : > { %v2158_v52 = vmax.f32 %v2140_v9, 0.0  ;;  %5614 = vmatprep.subr.bf16.mxu0 %v6078_v23 }
 0x3a0   : > { %v2156_v44 = vmax.f32 %v2132_v13, 0.0  ;;  %5615 = vmatpush3.bf16.msra.mxu0 %v6078_v23  ;;  %v6085_v23 = vld [vmem:[#allocation13 + $0x20] sm:$0xff]  }
 0x3a1   : > { %v2166_v55 = vpack.c.bf16 %v2158_v52, %v2157_v14  ;;  %5616 = vmatprep.subr.bf16.mxu0 %v6079_v22 }
 0x3a2   : > { %v2165_v18 = vpack.c.bf16 %v2156_v44, %v2155_v17 }
 0x3a4   : > { %5568 = vmatprep.mubr.bf16.mxu0 %v2165_v18  ;;  %5617 = vmatpush3.bf16.msra.mxu0 %v6079_v22 }
 0x3a5   : > { %5569 = vmatmul.mubr.bf16.gmra.mrb[76].mxu0 %v2166_v55  ;;  %5618 = vmatprep.subr.bf16.mxu0 %v6080_v47 }
 0x3a8   : > { %5619 = vmatpush3.bf16.msra.mxu0 %v6080_v47  ;;  %v6087_v47 = vld [vmem:[#allocation13 + $0x30] sm:$0xff]  }
 0x448   : > { %v5558_v57 = vpop.f32.mrb[64].mxu0 }
 0x449   : > { %v2281_v25 = vadd.f32 %v5558_v57, %v5025_v24  ;;  %v2272_v27 = vpop.f32.mrb[65].mxu0  ;;  %v5034_v57 = vld [vmem:[%s8101_s24] ss:$0 sm:$0xff] }
 0x44a   : > { %v2273_v28 = vadd.f32 %v5025_v24, %v2272_v27  ;;  %v5559_v30 = vpop.f32.mrb[66].mxu0 }
 0x44b   : > { %v2284_v31 = vadd.f32 %v5559_v30, %v5025_v24  ;;  %v2275_v32 = vpop.f32.mrb[67].mxu0  ;;  %v2337_v35 = vmax.f32 %v2281_v25, 0.0 }
 0x44c   : > { %v2276_v33 = vadd.f32 %v5025_v24, %v2275_v32  ;;  %v2335_v36 = vmax.f32 %v2273_v28, 0.0 }
 0x44d   : > { %v2338_v62 = vmax.f32 %v2284_v31, 0.0 }
 0x44e   : > { %v2336_v38 = vmax.f32 %v2276_v33, 0.0 }
 0x44f   : > { %v2352_v39 = vpack.c.bf16 %v2338_v62, %v2337_v35 }
 0x450   : > { %v2351_v1 = vpack.c.bf16 %v2336_v38, %v2335_v36 }
 0x452   : > { %5588 = vmatprep.mubr.bf16.mxu1 %v2351_v1 }
 0x453   : > { %5589 = vmatmul.mubr.bf16.vlgmr.msra.gmra.mrb[64].mxu1 %v2352_v39 }
 0x454   : > { %5637 = vmatpush3.bf16.msra.mxu1 %v6081_v7  ;;  %v6088_v7 = vld [vmem:[#allocation13 + $0x38] sm:$0xff]  }
 0x455   : > { %5638 = vmatprep.subr.bf16.mxu1 %v6082_v15 }
 0x458   : > { %v5562_v40 = vpop.f32.mrb[68].mxu0  ;;  %5639 = vmatpush3.bf16.msra.mxu1 %v6082_v15  ;;  %v6089_v15 = vld [vmem:[#allocation14] sm:$0xff]  }
 0x459   : > { %v2297_v41 = vadd.f32 %v5562_v40, %v5025_v24  ;;  %v2288_v8 = vpop.f32.mrb[69].mxu0  ;;  %5640 = vmatprep.subr.bf16.mxu1 %v6083_v12  ;;  %5668 = vmatprep.subr.bf16.mxu0 %v6089_v15 }
 0x45a   : > { %v2289_v42 = vadd.f32 %v5025_v24, %v2288_v8  ;;  %v5563_v43 = vpop.f32.mrb[70].mxu0 }
 0x45b   : > { %v2300_v45 = vadd.f32 %v5563_v43, %v5025_v24  ;;  %v2291_v11 = vpop.f32.mrb[71].mxu0  ;;  %v2341_v48 = vmax.f32 %v2297_v41, 0.0 }
 0x45c   : > { %v2292_v46 = vadd.f32 %v5025_v24, %v2291_v11  ;;  %v2339_v16 = vmax.f32 %v2289_v42, 0.0  ;;  %5641 = vmatpush3.bf16.msra.mxu1 %v6083_v12  ;;  %v6090_v12 = vld [vmem:[#allocation14 + $0x8] sm:$0xff]  }
 0x45d   : > { %v2342_v49 = vmax.f32 %v2300_v45, 0.0  ;;  %5642 = vmatprep.subr.bf16.mxu1 %v6084_v21 }
 0x45e   : > { %v2340_v50 = vmax.f32 %v2292_v46, 0.0 }
 0x45f   : > { %v2354_v51 = vpack.c.bf16 %v2342_v49, %v2341_v48 }
 0x460   : > { %v2353_v53 = vpack.c.bf16 %v2340_v50, %v2339_v16  ;;  %5643 = vmatpush3.bf16.msra.mxu1 %v6084_v21  ;;  %v6091_v21 = vld [vmem:[#allocation14 + $0x10] sm:$0xff]  }
 0x461   : > { %5644 = vmatprep.subr.bf16.mxu1 %v6085_v23 }
 0x462   : > { %5592 = vmatprep.mubr.bf16.mxu1 %v2353_v53 }
 0x463   : > { %5593 = vmatmul.mubr.bf16.gmra.mrb[68].mxu1 %v2354_v51 }
 0x464   : > { %5645 = vmatpush3.bf16.msra.mxu1 %v6085_v23  ;;  %v6092_v23 = vld [vmem:[#allocation14 + $0x18] sm:$0xff]  }
 0x468   : > { %v5566_v19 = vpop.f32.mrb[72].mxu0 }
 0x469   : > { %v2313_v54 = vadd.f32 %v5566_v19, %v5025_v24  ;;  %v2304_v56 = vpop.f32.mrb[73].mxu0 }
 0x46a   : > { %v2305_v59 = vadd.f32 %v5025_v24, %v2304_v56  ;;  %v5567_v60 = vpop.f32.mrb[74].mxu0 }
 0x46b   : > { %v2316_v26 = vadd.f32 %v5567_v60, %v5025_v24  ;;  %v2307_v61 = vpop.f32.mrb[75].mxu0  ;;  %v2345_v29 = vmax.f32 %v2313_v54, 0.0 }
 0x46c   : > { %v2308_v0 = vadd.f32 %v5025_v24, %v2307_v61  ;;  %v2343_v58 = vmax.f32 %v2305_v59, 0.0 }
 0x46d   : > { %v2346_v34 = vmax.f32 %v2316_v26, 0.0 }
 0x46e   : > { %v2344_v2 = vmax.f32 %v2308_v0, 0.0 }
 0x46f   : > { %v2356_v37 = vpack.c.bf16 %v2346_v34, %v2345_v29 }
 0x470   : > { %v2355_v3 = vpack.c.bf16 %v2344_v2, %v2343_v58 }
 0x472   : > { %5596 = vmatprep.mubr.bf16.mxu1 %v2355_v3 }
 0x473   : > { %5597 = vmatmul.mubr.bf16.gmra.mrb[72].mxu1 %v2356_v37 }
 0x478   : > { %v5570_v63 = vpop.f32.mrb[76].mxu0 }
 0x479   : > { %v2329_v4 = vadd.f32 %v5570_v63, %v5025_v24  ;;  %v2320_v5 = vpop.f32.mrb[77].mxu0 }
 0x47a   : > { %v2321_v6 = vadd.f32 %v5025_v24, %v2320_v5  ;;  %v5571_v9 = vpop.f32.mrb[78].mxu0 }
 0x47b   : > { %v2332_v10 = vadd.f32 %v5571_v9, %v5025_v24  ;;  %v2323_v13 = vpop.f32.mrb[79].mxu0  ;;  %v2349_v52 = vmax.f32 %v2329_v4, 0.0 }
 0x47c   : > { %v2324_v14 = vadd.f32 %v5025_v24, %v2323_v13  ;;  %v2347_v44 = vmax.f32 %v2321_v6, 0.0  ;;  %v6086_v24 = vld [vmem:[#allocation13 + $0x28] sm:$0xff]  }
 0x47d   : > { %v2350_v17 = vmax.f32 %v2332_v10, 0.0  ;;  %5646 = vmatprep.subr.bf16.mxu1 %v6086_v24 }
 0x47e   : > { %v2348_v55 = vmax.f32 %v2324_v14, 0.0  ;;  %5647 = vmatpush3.bf16.msra.mxu1 %v6086_v24  ;;  %v6093_v24 = vld [vmem:[#allocation14 + $0x20] sm:$0xff]  }
 0x47f   : > { %v2358_v18 = vpack.c.bf16 %v2350_v17, %v2349_v52  ;;  %5648 = vmatprep.subr.bf16.mxu1 %v6087_v47 }
 0x480   : > { %v2357_v20 = vpack.c.bf16 %v2348_v55, %v2347_v44 }
 0x482   : > { %5600 = vmatprep.mubr.bf16.mxu1 %v2357_v20  ;;  %5649 = vmatpush3.bf16.msra.mxu1 %v6087_v47 }
 0x483   : > { %5601 = vmatmul.mubr.bf16.gmra.mrb[76].mxu1 %v2358_v18  ;;  %5650 = vmatprep.subr.bf16.mxu1 %v6088_v7 }
 0x486   : > { %5651 = vmatpush3.bf16.msra.mxu1 %v6088_v7  ;;  %v6095_v7 = vld [vmem:[#allocation14 + $0x30] sm:$0xff]  }
 0x526   : > { %v5590_v25 = vpop.f32.mrb[64].mxu1 }
 0x527   : > { %v2473_v27 = vadd.f32 %v5590_v25, %v5034_v57  ;;  %v2464_v28 = vpop.f32.mrb[65].mxu1  ;;  %v5043_v25 = vld [vmem:[%s8102_s17] ss:$0 sm:$0xff]  ;;  %s7552_s17 = scalar_lea.vmem [#allocation19], %s5767_s16 }
 0x528   : > { %v2465_v30 = vadd.f32 %v5034_v57, %v2464_v28  ;;  %v5591_v31 = vpop.f32.mrb[66].mxu1  ;;  %s4719_s18 = sshll.u32 %s7552_s17, 4  ;;  %s7978_s18 = int_to_ptr.vmem [resolvable:$true] %s4719_s18 }
 0x529   : > { %v2476_v32 = vadd.f32 %v5591_v31, %v5034_v57  ;;  %v2467_v33 = vpop.f32.mrb[67].mxu1  ;;  %v2529_v62 = vmax.f32 %v2473_v27, 0.0  ;;  %s6691_s22 = scalar_lea.vmem %s7978_s18, 14336 }
 0x52a   : > { %v2468_v35 = vadd.f32 %v5034_v57, %v2467_v33  ;;  %v2527_v38 = vmax.f32 %v2465_v30, 0.0  ;;  %p6692_p13 = scmp.ne.s32.totalorder %s7978_s18, %s6691_s22 }
 0x52b   : > { %v2530_v36 = vmax.f32 %v2476_v32, 0.0 }
 0x52c   : > { %v2528_v39 = vmax.f32 %v2468_v35, 0.0  ;;  %p6693_p2 = pnand %p6692_p13, %p8108_p0 }
 0x52d   : > { %v2544_v1 = vpack.c.bf16 %v2530_v36, %v2529_v62 }
 0x52e   : > { %v2543_v40 = vpack.c.bf16 %v2528_v39, %v2527_v38  ;;  %p6694_p8 = pneg %p6693_p2 }
 0x530   : > { %5620 = vmatprep.mubr.bf16.mxu0 %v2543_v40 }
 0x531   : > { %5621 = vmatmul.mubr.bf16.vlgmr.msra.gmra.mrb[80].mxu0 %v2544_v1 }
 0x532   : > { %5669 = vmatpush3.bf16.msra.mxu0 %v6089_v15  ;;  %v6096_v15 = vld [vmem:[#allocation14 + $0x38] sm:$0xff]  }
 0x533   : > { %5670 = vmatprep.subr.bf16.mxu0 %v6090_v12 }
 0x536   : > { %v5594_v41 = vpop.f32.mrb[68].mxu1  ;;  %5671 = vmatpush3.bf16.msra.mxu0 %v6090_v12  ;;  %v6097_v12 = vld [vmem:[#allocation16] sm:$0xff]  }
 0x537   : > { %v2489_v8 = vadd.f32 %v5594_v41, %v5034_v57  ;;  %v2480_v42 = vpop.f32.mrb[69].mxu1  ;;  %5672 = vmatprep.subr.bf16.mxu0 %v6091_v21  ;;  %5700 = vmatprep.subr.bf16.mxu1 %v6097_v12 }
 0x538   : > { %v2481_v43 = vadd.f32 %v5034_v57, %v2480_v42  ;;  %v5595_v45 = vpop.f32.mrb[70].mxu1 }
 0x539   : > { %v2492_v11 = vadd.f32 %v5595_v45, %v5034_v57  ;;  %v2483_v46 = vpop.f32.mrb[71].mxu1  ;;  %v2533_v49 = vmax.f32 %v2489_v8, 0.0 }
 0x53a   : > { %v2484_v48 = vadd.f32 %v5034_v57, %v2483_v46  ;;  %v2531_v50 = vmax.f32 %v2481_v43, 0.0  ;;  %5673 = vmatpush3.bf16.msra.mxu0 %v6091_v21  ;;  %v6098_v21 = vld [vmem:[#allocation16 + $0x8] sm:$0xff]  }
 0x53b   : > { %v2534_v16 = vmax.f32 %v2492_v11, 0.0  ;;  %5674 = vmatprep.subr.bf16.mxu0 %v6092_v23 }
 0x53c   : > { %v2532_v51 = vmax.f32 %v2484_v48, 0.0 }
 0x53d   : > { %v2546_v53 = vpack.c.bf16 %v2534_v16, %v2533_v49 }
 0x53e   : > { %v2545_v19 = vpack.c.bf16 %v2532_v51, %v2531_v50  ;;  %5675 = vmatpush3.bf16.msra.mxu0 %v6092_v23  ;;  %v6099_v23 = vld [vmem:[#allocation16 + $0x10] sm:$0xff]  }
 0x53f   : > { %5676 = vmatprep.subr.bf16.mxu0 %v6093_v24 }
 0x540   : > { %5624 = vmatprep.mubr.bf16.mxu0 %v2545_v19 }
 0x541   : > { %5625 = vmatmul.mubr.bf16.gmra.mrb[84].mxu0 %v2546_v53 }
 0x542   : > { %5677 = vmatpush3.bf16.msra.mxu0 %v6093_v24  ;;  %v6100_v24 = vld [vmem:[#allocation16 + $0x18] sm:$0xff]  }
 0x546   : > { %v5598_v54 = vpop.f32.mrb[72].mxu1 }
 0x547   : > { %v2505_v56 = vadd.f32 %v5598_v54, %v5034_v57  ;;  %v2496_v59 = vpop.f32.mrb[73].mxu1 }
 0x548   : > { %v2497_v60 = vadd.f32 %v5034_v57, %v2496_v59  ;;  %v5599_v26 = vpop.f32.mrb[74].mxu1 }
 0x549   : > { %v2508_v61 = vadd.f32 %v5599_v26, %v5034_v57  ;;  %v2499_v0 = vpop.f32.mrb[75].mxu1  ;;  %v2537_v34 = vmax.f32 %v2505_v56, 0.0 }
 0x54a   : > { %v2500_v29 = vadd.f32 %v5034_v57, %v2499_v0  ;;  %v2535_v2 = vmax.f32 %v2497_v60, 0.0 }
 0x54b   : > { %v2538_v58 = vmax.f32 %v2508_v61, 0.0 }
 0x54c   : > { %v2536_v37 = vmax.f32 %v2500_v29, 0.0 }
 0x54d   : > { %v2548_v3 = vpack.c.bf16 %v2538_v58, %v2537_v34 }
 0x54e   : > { %v2547_v63 = vpack.c.bf16 %v2536_v37, %v2535_v2 }
 0x550   : > { %5628 = vmatprep.mubr.bf16.mxu0 %v2547_v63 }
 0x551   : > { %5629 = vmatmul.mubr.bf16.gmra.mrb[88].mxu0 %v2548_v3 }
 0x556   : > { %v5602_v4 = vpop.f32.mrb[76].mxu1 }
 0x557   : > { %v2521_v5 = vadd.f32 %v5602_v4, %v5034_v57  ;;  %v2512_v6 = vpop.f32.mrb[77].mxu1 }
 0x558   : > { %v2513_v9 = vadd.f32 %v5034_v57, %v2512_v6  ;;  %v5603_v10 = vpop.f32.mrb[78].mxu1 }
 0x559   : > { %v2524_v13 = vadd.f32 %v5603_v10, %v5034_v57  ;;  %v2515_v14 = vpop.f32.mrb[79].mxu1  ;;  %v2541_v17 = vmax.f32 %v2521_v5, 0.0 }
 0x55a   : > { %v2516_v52 = vadd.f32 %v5034_v57, %v2515_v14  ;;  %v2539_v55 = vmax.f32 %v2513_v9, 0.0  ;;  %v6094_v57 = vld [vmem:[#allocation14 + $0x28] sm:$0xff]  }
 0x55b   : > { %v2542_v44 = vmax.f32 %v2524_v13, 0.0  ;;  %5678 = vmatprep.subr.bf16.mxu0 %v6094_v57 }
 0x55c   : > { %v2540_v18 = vmax.f32 %v2516_v52, 0.0  ;;  %5679 = vmatpush3.bf16.msra.mxu0 %v6094_v57  ;;  %v6101_v57 = vld [vmem:[#allocation16 + $0x20] sm:$0xff]  }
 0x55d   : > { %v2550_v20 = vpack.c.bf16 %v2542_v44, %v2541_v17  ;;  %5680 = vmatprep.subr.bf16.mxu0 %v6095_v7 }
 0x55e   : > { %v2549_v22 = vpack.c.bf16 %v2540_v18, %v2539_v55 }
 0x560   : > { %5632 = vmatprep.mubr.bf16.mxu0 %v2549_v22  ;;  %5681 = vmatpush3.bf16.msra.mxu0 %v6095_v7 }
 0x561   : > { %5633 = vmatmul.mubr.bf16.gmra.mrb[92].mxu0 %v2550_v20  ;;  %5682 = vmatprep.subr.bf16.mxu0 %v6096_v15 }
 0x564   : > { %5683 = vmatpush3.bf16.msra.mxu0 %v6096_v15  ;;  %v6103_v15 = vld [vmem:[#allocation16 + $0x30] sm:$0xff]  }
 0x604   : > { %v5622_v27 = vpop.f32.mrb[80].mxu0 }
 0x605   : > { %v2665_v28 = vadd.f32 %v5622_v27, %v5043_v25  ;;  %v2656_v30 = vpop.f32.mrb[81].mxu0  ;;  %v5052_v27 = vld [vmem:[%s8103_s26] ss:$0 sm:$0xff] }
 0x606   : > { %v2657_v31 = vadd.f32 %v5043_v25, %v2656_v30  ;;  %v5623_v32 = vpop.f32.mrb[82].mxu0 }
 0x607   : > { %v2668_v33 = vadd.f32 %v5623_v32, %v5043_v25  ;;  %v2659_v35 = vpop.f32.mrb[83].mxu0  ;;  %v2721_v36 = vmax.f32 %v2665_v28, 0.0 }
 0x608   : > { %v2660_v62 = vadd.f32 %v5043_v25, %v2659_v35  ;;  %v2719_v39 = vmax.f32 %v2657_v31, 0.0 }
 0x609   : > { %v2722_v38 = vmax.f32 %v2668_v33, 0.0 }
 0x60a   : > { %v2720_v1 = vmax.f32 %v2660_v62, 0.0 }
 0x60b   : > { %v2736_v40 = vpack.c.bf16 %v2722_v38, %v2721_v36 }
 0x60c   : > { %v2735_v41 = vpack.c.bf16 %v2720_v1, %v2719_v39 }
 0x60e   : > { %5652 = vmatprep.mubr.bf16.mxu1 %v2735_v41 }
 0x60f   : > { %5653 = vmatmul.mubr.bf16.vlgmr.msra.gmra.mrb[80].mxu1 %v2736_v40 }
 0x610   : > { %5701 = vmatpush3.bf16.msra.mxu1 %v6097_v12  ;;  %v6104_v12 = vld [vmem:[#allocation16 + $0x38] sm:$0xff]  }
 0x611   : > { %5702 = vmatprep.subr.bf16.mxu1 %v6098_v21 }
 0x614   : > { %v5626_v8 = vpop.f32.mrb[84].mxu0  ;;  %5703 = vmatpush3.bf16.msra.mxu1 %v6098_v21  ;;  %v6105_v21 = vld [vmem:[#allocation17] ss:$28 sps:$4 sm:$0xff]  }
 0x615   : > { %v2681_v42 = vadd.f32 %v5626_v8, %v5043_v25  ;;  %v2672_v43 = vpop.f32.mrb[85].mxu0  ;;  %5704 = vmatprep.subr.bf16.mxu1 %v6099_v23 }
 0x616   : > { %v2673_v45 = vadd.f32 %v5043_v25, %v2672_v43  ;;  %v5627_v11 = vpop.f32.mrb[86].mxu0 }
 0x617   : > { %v2684_v46 = vadd.f32 %v5627_v11, %v5043_v25  ;;  %v2675_v48 = vpop.f32.mrb[87].mxu0  ;;  %v2725_v16 = vmax.f32 %v2681_v42, 0.0 }
 0x618   : > { %v2676_v49 = vadd.f32 %v5043_v25, %v2675_v48  ;;  %v2723_v51 = vmax.f32 %v2673_v45, 0.0  ;;  %5705 = vmatpush3.bf16.msra.mxu1 %v6099_v23  ;;  %v6107_v23 = vld [vmem:[#allocation17 + $0x4] ss:$28 sps:$4 sm:$0xff]  }
 0x619   : > { %v2726_v50 = vmax.f32 %v2684_v46, 0.0  ;;  %5706 = vmatprep.subr.bf16.mxu1 %v6100_v24  ;;  %3708 = vmatprep.subr.bf16.mxu0 %v6107_v23 }
 0x61a   : > { %v2724_v53 = vmax.f32 %v2676_v49, 0.0 }
 0x61b   : > { %v2738_v19 = vpack.c.bf16 %v2726_v50, %v2725_v16 }
 0x61c   : > { %v2737_v54 = vpack.c.bf16 %v2724_v53, %v2723_v51  ;;  %5707 = vmatpush3.bf16.msra.mxu1 %v6100_v24  ;;  %v6110_v24 = vld [vmem:[#allocation17 + $0xc] ss:$28 sps:$4 sm:$0xff]  }
 0x61d   : > { %5708 = vmatprep.subr.bf16.mxu1 %v6101_v57 }
 0x61e   : > { %5656 = vmatprep.mubr.bf16.mxu1 %v2737_v54 }
 0x61f   : > { %5657 = vmatmul.mubr.bf16.gmra.mrb[84].mxu1 %v2738_v19 }
 0x620   : > { %5709 = vmatpush3.bf16.msra.mxu1 %v6101_v57  ;;  %v6113_v57 = vld [vmem:[#allocation17 + $0x3c] ss:$28 sps:$4 sm:$0xff]  }
 0x624   : > { %v5630_v56 = vpop.f32.mrb[88].mxu0 }
 0x625   : > { %v2697_v59 = vadd.f32 %v5630_v56, %v5043_v25  ;;  %v2688_v60 = vpop.f32.mrb[89].mxu0 }
 0x626   : > { %v2689_v26 = vadd.f32 %v5043_v25, %v2688_v60  ;;  %v5631_v61 = vpop.f32.mrb[90].mxu0 }
 0x627   : > { %v2700_v0 = vadd.f32 %v5631_v61, %v5043_v25  ;;  %v2691_v29 = vpop.f32.mrb[91].mxu0  ;;  %v2729_v58 = vmax.f32 %v2697_v59, 0.0 }
 0x628   : > { %v2692_v34 = vadd.f32 %v5043_v25, %v2691_v29  ;;  %v2727_v37 = vmax.f32 %v2689_v26, 0.0 }
 0x629   : > { %v2730_v2 = vmax.f32 %v2700_v0, 0.0 }
 0x62a   : > { %v2728_v3 = vmax.f32 %v2692_v34, 0.0 }
 0x62b   : > { %v2740_v63 = vpack.c.bf16 %v2730_v2, %v2729_v58 }
 0x62c   : > { %v2739_v4 = vpack.c.bf16 %v2728_v3, %v2727_v37 }
 0x62e   : > { %5660 = vmatprep.mubr.bf16.mxu1 %v2739_v4 }
 0x62f   : > { %5661 = vmatmul.mubr.bf16.gmra.mrb[88].mxu1 %v2740_v63 }
 0x634   : > { %v5634_v5 = vpop.f32.mrb[92].mxu0 }
 0x635   : > { %v2713_v6 = vadd.f32 %v5634_v5, %v5043_v25  ;;  %v2704_v9 = vpop.f32.mrb[93].mxu0 }
 0x636   : > { %v2705_v10 = vadd.f32 %v5043_v25, %v2704_v9  ;;  %v5635_v13 = vpop.f32.mrb[94].mxu0 }
 0x637   : > { %v2716_v14 = vadd.f32 %v5635_v13, %v5043_v25  ;;  %v2707_v52 = vpop.f32.mrb[95].mxu0  ;;  %v2733_v44 = vmax.f32 %v2713_v6, 0.0 }
 0x638   : > { %v2708_v17 = vadd.f32 %v5043_v25, %v2707_v52  ;;  %v2731_v18 = vmax.f32 %v2705_v10, 0.0  ;;  %v6102_v25 = vld [vmem:[#allocation16 + $0x28] sm:$0xff]  }
 0x639   : > { %v2734_v55 = vmax.f32 %v2716_v14, 0.0  ;;  %5710 = vmatprep.subr.bf16.mxu1 %v6102_v25 }
 0x63a   : > { %v2732_v20 = vmax.f32 %v2708_v17, 0.0  ;;  %5711 = vmatpush3.bf16.msra.mxu1 %v6102_v25  ;;  %v6111_v25 = vld [vmem:[#allocation17 + $0x38] ss:$28 sps:$4 sm:$0xff]  }
 0x63b   : > { %v2742_v22 = vpack.c.bf16 %v2734_v55, %v2733_v44  ;;  %5712 = vmatprep.subr.bf16.mxu1 %v6103_v15 }
 0x63c   : > { %v2741_v47 = vpack.c.bf16 %v2732_v20, %v2731_v18 }
 0x63e   : > { %5664 = vmatprep.mubr.bf16.mxu1 %v2741_v47  ;;  %5713 = vmatpush3.bf16.msra.mxu1 %v6103_v15 }
 0x63f   : > { %5665 = vmatmul.mubr.bf16.gmra.mrb[92].mxu1 %v2742_v22  ;;  %5714 = vmatprep.subr.bf16.mxu1 %v6104_v12 }
 0x642   : > { %5715 = vmatpush3.bf16.msra.mxu1 %v6104_v12 }
 0x643   : > { %3821 = vmatprep.subr.bf16.mxu1 %v6110_v24 }
 0x6e2   : > { %v5654_v28 = vpop.f32.mrb[80].mxu1 }
 0x6e3   : > { %v2857_v30 = vadd.f32 %v5654_v28, %v5052_v27  ;;  %v2848_v31 = vpop.f32.mrb[81].mxu1  ;;  %v6117_v28 = vld [vmem:[#allocation17 + $0x70] ss:$28 sps:$4 sm:$0xff]  }
 0x6e4   : > { %v2849_v32 = vadd.f32 %v5052_v27, %v2848_v31  ;;  %v5655_v33 = vpop.f32.mrb[82].mxu1  ;;  %v6123_v31 = vld [vmem:[#allocation17 + $0xa8] ss:$28 sps:$4 sm:$0xff]  }
 0x6e5   : > { %v2860_v35 = vadd.f32 %v5655_v33, %v5052_v27  ;;  %v2851_v62 = vpop.f32.mrb[83].mxu1  ;;  %v2913_v38 = vmax.f32 %v2857_v30, 0.0  ;;  %v6125_v30 = vld [vmem:[#allocation17 + $0xac] ss:$28 sps:$4 sm:$0xff]   ;;  %v6129_v33 = vld [vmem:[#allocation17 + $0xe0] ss:$28 sps:$4 sm:$0xff]  }
 0x6e6   : > { %v2852_v36 = vadd.f32 %v5052_v27, %v2851_v62  ;;  %v2911_v1 = vmax.f32 %v2849_v32, 0.0  ;;  %v6131_v32 = vld [vmem:[#allocation17 + $0xe4] ss:$28 sps:$4 sm:$0xff]   ;;  %v6135_v62 = vld [vmem:[#allocation17 + $0x118] ss:$28 sps:$4 sm:$0xff]  }
 0x6e7   : > { %v2914_v39 = vmax.f32 %v2860_v35, 0.0  ;;  %v6137_v35 = vld [vmem:[#allocation17 + $0x11c] ss:$28 sps:$4 sm:$0xff]  }
 0x6e8   : > { %v2912_v40 = vmax.f32 %v2852_v36, 0.0  ;;  %v7406_v36 = vld [vmem:[%s8104_s11] ss:$0 sm:$0xff]  ;;  %s4705_s11 = scalar_lea.sflag [#allocation4], %s7230_s13 }
 0x6e9   : > { %v2928_v41 = vpack.c.bf16 %v2914_v39, %v2913_v38 }
 0x6ea   : > { %v2927_v8 = vpack.c.bf16 %v2912_v40, %v2911_v1 }
 0x6ec   : > { %5684 = vmatprep.mubr.bf16.mxu0 %v2927_v8 }
 0x6ed   : > { %5685 = vmatmul.mubr.bf16.vlgmr.msra.gmra.mrb[96].mxu0 %v2928_v41 }
 0x6ee   : > { %3709 = vmatpush1.bf16.msra.mxu0 %v6105_v21 }
 0x6ef   : > { %3710 = vmatprep.subr.bf16.mxu0 %v6113_v57 }
 0x6f2   : > { %v5658_v42 = vpop.f32.mrb[84].mxu1  ;;  %3711 = vmatpush1.bf16.msra.mxu0 %v6111_v25 }
 0x6f3   : > { %v2873_v43 = vadd.f32 %v5658_v42, %v5052_v27  ;;  %v2864_v45 = vpop.f32.mrb[85].mxu1 }
 0x6f4   : > { %v2865_v11 = vadd.f32 %v5052_v27, %v2864_v45  ;;  %v5659_v46 = vpop.f32.mrb[86].mxu1 }
 0x6f5   : > { %v2876_v48 = vadd.f32 %v5659_v46, %v5052_v27  ;;  %v2867_v49 = vpop.f32.mrb[87].mxu1  ;;  %v2917_v50 = vmax.f32 %v2873_v43, 0.0 }
 0x6f6   : > { %v2868_v16 = vadd.f32 %v5052_v27, %v2867_v49  ;;  %v2915_v53 = vmax.f32 %v2865_v11, 0.0 }
 0x6f7   : > { %v2918_v51 = vmax.f32 %v2876_v48, 0.0 }
 0x6f8   : > { %v2916_v19 = vmax.f32 %v2868_v16, 0.0 }
 0x6f9   : > { %v2930_v54 = vpack.c.bf16 %v2918_v51, %v2917_v50  ;;  %v6108_v50 = vld [vmem:[#allocation17 + $0x8] ss:$28 sps:$4 sm:$0xff]  }
 0x6fa   : > { %v2929_v56 = vpack.c.bf16 %v2916_v19, %v2915_v53  ;;  %v6116_v51 = vld [vmem:[#allocation17 + $0x44] ss:$28 sps:$4 sm:$0xff]   ;;  %v6122_v19 = vld [vmem:[#allocation17 + $0x7c] ss:$28 sps:$4 sm:$0xff]  }
 0x6fb   : > { %v6114_v53 = vld [vmem:[#allocation17 + $0x40] ss:$28 sps:$4 sm:$0xff]  }
 0x6fc   : > { %5688 = vmatprep.mubr.bf16.mxu0 %v2929_v56  ;;  %v6120_v56 = vld [vmem:[#allocation17 + $0x78] ss:$28 sps:$4 sm:$0xff]  }
 0x6fd   : > { %5689 = vmatmul.mubr.bf16.gmra.mrb[100].mxu0 %v2930_v54 }
 0x702   : > { %v5662_v59 = vpop.f32.mrb[88].mxu1 }
 0x703   : > { %v2889_v60 = vadd.f32 %v5662_v59, %v5052_v27  ;;  %v2880_v26 = vpop.f32.mrb[89].mxu1 }
 0x704   : > { %v2881_v61 = vadd.f32 %v5052_v27, %v2880_v26  ;;  %v5663_v0 = vpop.f32.mrb[90].mxu1  ;;  %v6128_v26 = vld [vmem:[#allocation17 + $0xb4] ss:$28 sps:$4 sm:$0xff]  }
 0x705   : > { %v2892_v29 = vadd.f32 %v5663_v0, %v5052_v27  ;;  %v2883_v34 = vpop.f32.mrb[91].mxu1  ;;  %v2921_v2 = vmax.f32 %v2889_v60, 0.0 }
 0x706   : > { %v2884_v58 = vadd.f32 %v5052_v27, %v2883_v34  ;;  %v2919_v3 = vmax.f32 %v2881_v61, 0.0 }
 0x707   : > { %v2922_v37 = vmax.f32 %v2892_v29, 0.0 }
 0x708   : > { %v2920_v63 = vmax.f32 %v2884_v58, 0.0 }
 0x709   : > { %v2932_v4 = vpack.c.bf16 %v2922_v37, %v2921_v2  ;;  %v6126_v2 = vld [vmem:[#allocation17 + $0xb0] ss:$28 sps:$4 sm:$0xff]  }
 0x70a   : > { %v2931_v5 = vpack.c.bf16 %v2920_v63, %v2919_v3  ;;  %v6134_v63 = vld [vmem:[#allocation17 + $0xec] ss:$28 sps:$4 sm:$0xff]  }
 0x70c   : > { %5692 = vmatprep.mubr.bf16.mxu0 %v2931_v5 }
 0x70d   : > { %5693 = vmatmul.mubr.bf16.gmra.mrb[104].mxu0 %v2932_v4 }
 0x712   : > { %v5666_v6 = vpop.f32.mrb[92].mxu1 }
 0x713   : > { %v2905_v9 = vadd.f32 %v5666_v6, %v5052_v27  ;;  %v2896_v10 = vpop.f32.mrb[93].mxu1 }
 0x714   : > { %v2897_v13 = vadd.f32 %v5052_v27, %v2896_v10  ;;  %v5667_v14 = vpop.f32.mrb[94].mxu1  ;;  %v6132_v10 = vld [vmem:[#allocation17 + $0xe8] ss:$28 sps:$4 sm:$0xff]  }
 0x715   : > { %v2908_v52 = vadd.f32 %v5667_v14, %v5052_v27  ;;  %v2899_v17 = vpop.f32.mrb[95].mxu1  ;;  %v2925_v55 = vmax.f32 %v2905_v9, 0.0  ;;  %v6138_v14 = vld [vmem:[#allocation17 + $0x120] ss:$28 sps:$4 sm:$0xff]  }
 0x716   : > { %v2900_v44 = vadd.f32 %v5052_v27, %v2899_v17  ;;  %v2923_v20 = vmax.f32 %v2897_v13, 0.0  ;;  %v6119_v27 = vld [vmem:[#allocation17 + $0x74] ss:$28 sps:$4 sm:$0xff]   ;;  %v6140_v13 = vld [vmem:[#allocation17 + $0x124] ss:$28 sps:$4 sm:$0xff]  }
 0x717   : > { %v2926_v18 = vmax.f32 %v2908_v52, 0.0  ;;  %3712 = vmatprep.subr.bf16.mxu0 %v6119_v27 }
 0x718   : > { %v2924_v22 = vmax.f32 %v2900_v44, 0.0  ;;  %3713 = vmatpush1.bf16.msra.mxu0 %v6117_v28 }
 0x719   : > { %v2934_v47 = vpack.c.bf16 %v2926_v18, %v2925_v55  ;;  %3714 = vmatprep.subr.bf16.mxu0 %v6125_v30 }
 0x71a   : > { %v2933_v7 = vpack.c.bf16 %v2924_v22, %v2923_v20 }
 0x71c   : > { %5696 = vmatprep.mubr.bf16.mxu0 %v2933_v7  ;;  %3715 = vmatpush1.bf16.msra.mxu0 %v6123_v31 }
 0x71d   : > { %5697 = vmatmul.mubr.bf16.gmra.mrb[108].mxu0 %v2934_v47  ;;  %3716 = vmatprep.subr.bf16.mxu0 %v6131_v32 }
 0x720   : > { %3717 = vmatpush1.bf16.msra.mxu0 %v6129_v33 }
 0x721   : > { %3718 = vmatprep.subr.bf16.mxu0 %v6137_v35 }
 0x724   : > { %3719 = vmatpush1.bf16.msra.mxu0 %v6135_v62 }
 0x7c0   : > { %v5686_v38 = vpop.f32.mrb[96].mxu0 }
 0x7c1   : > { %v3049_v39 = vadd.f32 %v5686_v38, %v7406_v36  ;;  %v3040_v1 = vpop.f32.mrb[97].mxu0 }
 0x7c2   : > { %v3041_v40 = vadd.f32 %v7406_v36, %v3040_v1  ;;  %v5687_v41 = vpop.f32.mrb[98].mxu0 }
 0x7c3   : > { %v3052_v8 = vadd.f32 %v5687_v41, %v7406_v36  ;;  %v3043_v42 = vpop.f32.mrb[99].mxu0  ;;  %v3105_v45 = vmax.f32 %v3049_v39, 0.0  ;;  %v6143_v41 = vld [vmem:[#allocation17 + $0x154] ss:$28 sps:$4 sm:$0xff]  }
 0x7c4   : > { %v3044_v43 = vadd.f32 %v7406_v36, %v3043_v42  ;;  %v3103_v46 = vmax.f32 %v3041_v40, 0.0  ;;  %v6141_v42 = vld [vmem:[#allocation17 + $0x150] ss:$28 sps:$4 sm:$0xff]   ;;  %3720 = vmatprep.subr.bf16.mxu0 %v6143_v41 }
 0x7c5   : > { %v3106_v11 = vmax.f32 %v3052_v8, 0.0  ;;  %v6146_v8 = vld [vmem:[#allocation17 + $0x15c] ss:$28 sps:$4 sm:$0xff]   ;;  %3721 = vmatpush1.bf16.msra.mxu0 %v6141_v42 }
 0x7c6   : > { %v3104_v48 = vmax.f32 %v3044_v43, 0.0  ;;  %v6144_v43 = vld [vmem:[#allocation17 + $0x158] ss:$28 sps:$4 sm:$0xff]  }
 0x7c7   : > { %v3120_v49 = vpack.c.bf16 %v3106_v11, %v3105_v45  ;;  %v6149_v45 = vld [vmem:[#allocation17 + $0x18c] ss:$28 sps:$4 sm:$0xff]   ;;  %v6152_v11 = vld [vmem:[#allocation17 + $0x194] ss:$28 sps:$4 sm:$0xff]  }
 0x7c8   : > { %v3119_v16 = vpack.c.bf16 %v3104_v48, %v3103_v46  ;;  %v6147_v46 = vld [vmem:[#allocation17 + $0x188] ss:$28 sps:$4 sm:$0xff]   ;;  %3722 = vmatprep.subr.bf16.mxu0 %v6149_v45  ;;  %v6793_v48 = vmov 0  }
 0x7c9   : > { %3723 = vmatpush1.bf16.msra.mxu0 %v6147_v46  ;;  %3740 = vmatprep.mubr.bf16.mxu0 %v6793_v48 }
 0x7ca   : > { %5716 = vmatprep.mubr.bf16.mxu1 %v3119_v16  ;;  %v6168_v16 = vld [vmem:[#allocation17 + $0x18] ss:$28 sps:$4 sm:$0xff]  }
 0x7cb   : > { %5717 = vmatmul.mubr.bf16.vlgmr.msra.gmra.mrb[96].mxu1 %v3120_v49  ;;  %v6155_v49 = vld [vmem:[#allocation17 + $0x14] ss:$28 sps:$4 sm:$0xff]  }
 0x7cc   : > { %3822 = vmatpush1.bf16.msra.mxu1 %v6108_v50  ;;  %3934 = vmatprep.subr.bf16.mxu0 %v6155_v49  ;;  %v7429_v50 = vld [vmem:[%s8105_s4] ss:$0 sm:$0xff]  ;;  %s6695_s4 = sshll.u32 %s6794_s29, 4  ;;  %s6696_s4 = int_to_ptr.vmem [resolvable:$false] %s6695_s4 }
 0x7cd   : > { %3823 = vmatprep.subr.bf16.mxu1 %v6116_v51  ;;  %s6697_s6 = scalar_lea.vmem %s6696_s4, 28672  ;;  %p6698_p6 = scmp.lt.s32.totalorder %s7978_s18, %s6696_s4 }
 0x7ce   : > { %p6699_p10 = scmp.lt.s32.totalorder %s6697_s6, %s6691_s22 }
 0x7d0   : > { %v5690_v54 = vpop.f32.mrb[100].mxu0  ;;  %3824 = vmatpush1.bf16.msra.mxu1 %v6114_v53  ;;  %p6700_p11 = por %p6699_p10, %p6698_p6 }
 0x7d1   : > { %v3065_v59 = vadd.f32 %v5690_v54, %v7406_v36  ;;  %v3056_v60 = vpop.f32.mrb[101].mxu0  ;;  %3825 = vmatprep.subr.bf16.mxu1 %v6122_v19 }
 0x7d2   : > { %v3057_v61 = vadd.f32 %v7406_v36, %v3056_v60  ;;  %v5691_v0 = vpop.f32.mrb[102].mxu0  ;;  %p6701_p3 = pnand %p6700_p11, %p6694_p8 }
 0x7d3   : > { %v3068_v29 = vadd.f32 %v5691_v0, %v7406_v36  ;;  %v3059_v34 = vpop.f32.mrb[103].mxu0  ;;  %v3109_v37 = vmax.f32 %v3065_v59, 0.0 }
 0x7d4   : > { %v3060_v58 = vadd.f32 %v7406_v36, %v3059_v34  ;;  %3826 = vmatpush1.bf16.msra.mxu1 %v6120_v56  ;;  %v3107_v4 = vmax.f32 %v3057_v61, 0.0 }
 0x7d5   : > { %v3110_v3 = vmax.f32 %v3068_v29, 0.0  ;;  %3827 = vmatprep.subr.bf16.mxu1 %v6128_v26 }
 0x7d6   : > { %v3108_v5 = vmax.f32 %v3060_v58, 0.0 }
 0x7d7   : > { %v3122_v6 = vpack.c.bf16 %v3110_v3, %v3109_v37  ;;  %v6158_v3 = vld [vmem:[#allocation17 + $0x4c] ss:$28 sps:$4 sm:$0xff]  }
 0x7d8   : > { %v3121_v9 = vpack.c.bf16 %v3108_v5, %v3107_v4  ;;  %3828 = vmatpush1.bf16.msra.mxu1 %v6126_v2  ;;  %v6153_v2 = vld [vmem:[#allocation17 + $0x10] ss:$28 sps:$4 sm:$0xff]   ;;  %v6156_v4 = vld [vmem:[#allocation17 + $0x48] ss:$28 sps:$4 sm:$0xff]  }
 0x7d9   : > { %3829 = vmatprep.subr.bf16.mxu1 %v6134_v63  ;;  %v6169_v63 = vld [vmem:[#allocation17 + $0x50] ss:$28 sps:$4 sm:$0xff]   ;;  %v6161_v5 = vld [vmem:[#allocation17 + $0x84] ss:$28 sps:$4 sm:$0xff]  }
 0x7da   : > { %5720 = vmatprep.mubr.bf16.mxu1 %v3121_v9  ;;  %v6159_v9 = vld [vmem:[#allocation17 + $0x80] ss:$28 sps:$4 sm:$0xff]  }
 0x7db   : > { %5721 = vmatmul.mubr.bf16.gmra.mrb[100].mxu1 %v3122_v6 }
 0x7dc   : > { %3830 = vmatpush1.bf16.msra.mxu1 %v6132_v10  ;;  %v6173_v10 = vld [vmem:[#allocation17 + $0x88] ss:$28 sps:$4 sm:$0xff]  }
 0x7dd   : > { %3831 = vmatprep.subr.bf16.mxu1 %v6140_v13 }
 0x7e0   : > { %v5694_v52 = vpop.f32.mrb[104].mxu0  ;;  %3832 = vmatpush1.bf16.msra.mxu1 %v6138_v14 }
 0x7e1   : > { %v3081_v17 = vadd.f32 %v5694_v52, %v7406_v36  ;;  %v3072_v44 = vpop.f32.mrb[105].mxu0  ;;  %3833 = vmatprep.subr.bf16.mxu1 %v6146_v8  ;;  %v6164_v52 = vld [vmem:[#allocation17 + $0xbc] ss:$28 sps:$4 sm:$0xff]  }
 0x7e2   : > { %v3073_v55 = vadd.f32 %v7406_v36, %v3072_v44  ;;  %v5695_v18 = vpop.f32.mrb[106].mxu0  ;;  %v6184_v8 = vld [vmem:[#allocation17 + $0x1a0] ss:$28 sps:$4 sm:$0xff]  }
 0x7e3   : > { %v3084_v20 = vadd.f32 %v5695_v18, %v7406_v36  ;;  %v3075_v22 = vpop.f32.mrb[107].mxu0  ;;  %v3113_v7 = vmax.f32 %v3081_v17, 0.0 }
 0x7e4   : > { %v3076_v47 = vadd.f32 %v7406_v36, %v3075_v22  ;;  %v3111_v12 = vmax.f32 %v3073_v55, 0.0  ;;  %3834 = vmatpush1.bf16.msra.mxu1 %v6144_v43  ;;  %v6174_v55 = vld [vmem:[#allocation17 + $0xc0] ss:$28 sps:$4 sm:$0xff]  }
 0x7e5   : > { %v3114_v15 = vmax.f32 %v3084_v20, 0.0  ;;  %3835 = vmatprep.subr.bf16.mxu1 %v6152_v11  ;;  %v6180_v11 = vld [vmem:[#allocation17 + $0x198] ss:$28 sps:$4 sm:$0xff]  }
 0x7e6   : > { %v3112_v21 = vmax.f32 %v3076_v47, 0.0  ;;  %v6162_v47 = vld [vmem:[#allocation17 + $0xb8] ss:$28 sps:$4 sm:$0xff]  }
 0x7e7   : > { %v3124_v23 = vpack.c.bf16 %v3114_v15, %v3113_v7 }
 0x7e8   : > { %v3123_v24 = vpack.c.bf16 %v3112_v21, %v3111_v12  ;;  %v6167_v12 = vld [vmem:[#allocation17 + $0xf4] ss:$28 sps:$4 sm:$0xff]  }
 0x7ea   : > { %5724 = vmatprep.mubr.bf16.mxu1 %v3123_v24 }
 0x7eb   : > { %5725 = vmatmul.mubr.bf16.gmra.mrb[104].mxu1 %v3124_v23 }
 0x7f0   : > { %v5698_v57 = vpop.f32.mrb[108].mxu0 }
 0x7f1   : > { %v3097_v25 = vadd.f32 %v5698_v57, %v7406_v36  ;;  %v3088_v27 = vpop.f32.mrb[109].mxu0 }
 0x7f2   : > { %v3089_v28 = vadd.f32 %v7406_v36, %v3088_v27  ;;  %v5699_v30 = vpop.f32.mrb[110].mxu0  ;;  %v6178_v27 = vld [vmem:[#allocation17 + $0xf8] ss:$28 sps:$4 sm:$0xff]  }
 0x7f3   : > { %v3100_v31 = vadd.f32 %v5699_v30, %v7406_v36  ;;  %v3091_v32 = vpop.f32.mrb[111].mxu0  ;;  %v3117_v35 = vmax.f32 %v3097_v25, 0.0  ;;  %v6165_v25 = vld [vmem:[#allocation17 + $0xf0] ss:$28 sps:$4 sm:$0xff]  }
 0x7f4   : > { %v3092_v33 = vadd.f32 %v7406_v36, %v3091_v32  ;;  %v3115_v38 = vmax.f32 %v3089_v28, 0.0  ;;  %v6150_v36 = vld [vmem:[#allocation17 + $0x190] ss:$28 sps:$4 sm:$0xff]   ;;  %v6177_v32 = vld [vmem:[#allocation17 + $0x164] ss:$28 sps:$4 sm:$0xff]  }
 0x7f5   : > { %v3118_v62 = vmax.f32 %v3100_v31, 0.0  ;;  %3836 = vmatpush1.bf16.msra.mxu1 %v6150_v36  ;;  %v6172_v28 = vld [vmem:[#allocation17 + $0x12c] ss:$28 sps:$4 sm:$0xff]  }
 0x7f6   : > { %v3116_v39 = vmax.f32 %v3092_v33, 0.0  ;;  %5732 = vmatprep.subr.bf16.mxu1 %v6168_v16  ;;  %v6179_v30 = vld [vmem:[#allocation17 + $0x130] ss:$28 sps:$4 sm:$0xff]   ;;  %v6170_v31 = vld [vmem:[#allocation17 + $0x128] ss:$28 sps:$4 sm:$0xff]  }
 0x7f7   : > { %v3126_v1 = vpack.c.bf16 %v3118_v62, %v3117_v35  ;;  %v6175_v35 = vld [vmem:[#allocation17 + $0x160] ss:$28 sps:$4 sm:$0xff]   ;;  %v6183_v62 = vld [vmem:[#allocation17 + $0x168] ss:$28 sps:$4 sm:$0xff]  }
 0x7f8   : > { %v3125_v40 = vpack.c.bf16 %v3116_v39, %v3115_v38 }
 0x7fa   : > { %5728 = vmatprep.mubr.bf16.mxu1 %v3125_v40 }
 0x7fb   : > { %5729 = vmatmul.mubr.bf16.gmra.mrb[108].mxu1 %v3126_v1  ;;  %v6182_v1 = vld [vmem:[#allocation17 + $0x19c] ss:$28 sps:$4 sm:$0xff]  }
 0x7fc   : > { %3853 = vmatprep.mubr.bf16.mxu1 %v6793_v48 }
 0x89e   : > { %v5718_v51 = vpop.f32.mrb[96].mxu1 }
 0x89f   : > { %v3241_v53 = vadd.f32 %v5718_v51, %v7429_v50  ;;  %v3232_v19 = vpop.f32.mrb[97].mxu1 }
 0x8a0   : > { %v3233_v54 = vadd.f32 %v7429_v50, %v3232_v19  ;;  %v5719_v56 = vpop.f32.mrb[98].mxu1 }
 0x8a1   : > { %v3244_v59 = vadd.f32 %v5719_v56, %v7429_v50  ;;  %v3235_v60 = vpop.f32.mrb[99].mxu1  ;;  %v3297_v61 = vmax.f32 %v3241_v53, 0.0 }
 0x8a2   : > { %v3236_v26 = vadd.f32 %v7429_v50, %v3235_v60  ;;  %v3295_v29 = vmax.f32 %v3233_v54, 0.0 }
 0x8a3   : > { %v3298_v0 = vmax.f32 %v3244_v59, 0.0 }
 0x8a4   : > { %v3296_v34 = vmax.f32 %v3236_v26, 0.0 }
 0x8a5   : > { %v7435_v58 = vpack.c.bf16 %v3298_v0, %v3297_v61 }
 0x8a6   : > { %v7437_v37 = vpack.c.bf16 %v3296_v34, %v3295_v29 }
 0x8a8   : > { %3741 = vmatmul.mubr.bf16.vlgmr.msra.gmra.mrb[112].mxu0 %v7437_v37  ;;  %3854 = vmatmul.mubr.bf16.vlgmr.msra.gmra.mrb[112].mxu1 %v7437_v37 }
 0x8a9   : > { %3935 = vmatpush1.bf16.msra.mxu0 %v6153_v2  ;;  %3750 = vmatprep.mubr.bf16.mxu0 %v6793_v48 }
 0x8aa   : > { %3863 = vmatprep.mubr.bf16.mxu1 %v6793_v48  ;;  %3936 = vmatprep.subr.bf16.mxu0 %v6158_v3 }
 0x8ab   : > { %5733 = vmatpush3.bf16.msra.mxu1 %v6168_v16 }
 0x8ac   : > { %5734 = vmatprep.subr.bf16.mxu1 %v6169_v63 }
 0x8ad   : > { %3937 = vmatpush1.bf16.msra.mxu0 %v6156_v4 }
 0x8ae   : > { %v5722_v6 = vpop.f32.mrb[100].mxu1  ;;  %3938 = vmatprep.subr.bf16.mxu0 %v6161_v5 }
 0x8af   : > { %v3257_v13 = vadd.f32 %v5722_v6, %v7429_v50  ;;  %v3248_v14 = vpop.f32.mrb[101].mxu1  ;;  %5735 = vmatpush3.bf16.msra.mxu1 %v6169_v63  ;;  %v7500_v6 = vld [vmem:[%s8106_s12] sm:$0xff] }
 0x8b0   : > { %v3249_v17 = vadd.f32 %v7429_v50, %v3248_v14  ;;  %v5723_v44 = vpop.f32.mrb[102].mxu1  ;;  %3751 = vmatmul.mubr.bf16.gmra.mrb[116].mxu0 %v7435_v58  ;;  %3864 = vmatmul.mubr.bf16.gmra.mrb[116].mxu1 %v7435_v58 }
 0x8b1   : > { %v3260_v18 = vadd.f32 %v5723_v44, %v7429_v50  ;;  %v3251_v20 = vpop.f32.mrb[103].mxu1  ;;  %3760 = vmatprep.mubr.bf16.mxu0 %v6793_v48  ;;  %3873 = vmatprep.mubr.bf16.mxu1 %v6793_v48  ;;  %v3301_v7 = vmax.f32 %v3257_v13, 0.0 }
 0x8b2   : > { %v3252_v22 = vadd.f32 %v7429_v50, %v3251_v20  ;;  %3939 = vmatpush1.bf16.msra.mxu0 %v6159_v9  ;;  %5736 = vmatprep.subr.bf16.mxu1 %v6173_v10  ;;  %v3299_v21 = vmax.f32 %v3249_v17, 0.0 }
 0x8b3   : > { %v3302_v15 = vmax.f32 %v3260_v18, 0.0  ;;  %3940 = vmatprep.subr.bf16.mxu0 %v6164_v52  ;;  %5737 = vmatpush3.bf16.msra.mxu1 %v6173_v10 }
 0x8b4   : > { %v3300_v23 = vmax.f32 %v3252_v22, 0.0  ;;  %5738 = vmatprep.subr.bf16.mxu1 %v6174_v55 }
 0x8b5   : > { %v7451_v24 = vpack.c.bf16 %v3302_v15, %v3301_v7 }
 0x8b6   : > { %v7453_v57 = vpack.c.bf16 %v3300_v23, %v3299_v21  ;;  %3941 = vmatpush1.bf16.msra.mxu0 %v6162_v47 }
 0x8b7   : > { %3942 = vmatprep.subr.bf16.mxu0 %v6167_v12  ;;  %5739 = vmatpush3.bf16.msra.mxu1 %v6174_v55 }
 0x8b8   : > { %3761 = vmatmul.mubr.bf16.gmra.mrb[120].mxu0 %v7453_v57  ;;  %3874 = vmatmul.mubr.bf16.gmra.mrb[120].mxu1 %v7453_v57 }
 0x8b9   : > { %3770 = vmatprep.mubr.bf16.mxu0 %v6793_v48  ;;  %3883 = vmatprep.mubr.bf16.mxu1 %v6793_v48 }
 0x8ba   : > { %3943 = vmatpush1.bf16.msra.mxu0 %v6165_v25  ;;  %5740 = vmatprep.subr.bf16.mxu1 %v6178_v27 }
 0x8bb   : > { %3944 = vmatprep.subr.bf16.mxu0 %v6172_v28  ;;  %5741 = vmatpush3.bf16.msra.mxu1 %v6178_v27 }
 0x8bc   : > { %5742 = vmatprep.subr.bf16.mxu1 %v6179_v30 }
 0x8be   : > { %v5726_v33 = vpop.f32.mrb[104].mxu1  ;;  %3945 = vmatpush1.bf16.msra.mxu0 %v6170_v31 }
 0x8bf   : > { %v3273_v38 = vadd.f32 %v5726_v33, %v7429_v50  ;;  %v3264_v39 = vpop.f32.mrb[105].mxu1  ;;  %3946 = vmatprep.subr.bf16.mxu0 %v6177_v32  ;;  %5743 = vmatpush3.bf16.msra.mxu1 %v6179_v30 }
 0x8c0   : > { %v3265_v40 = vadd.f32 %v7429_v50, %v3264_v39  ;;  %v5727_v41 = vpop.f32.mrb[106].mxu1  ;;  %3771 = vmatmul.mubr.bf16.gmra.mrb[124].mxu0 %v7451_v24  ;;  %3884 = vmatmul.mubr.bf16.gmra.mrb[124].mxu1 %v7451_v24 }
 0x8c1   : > { %v3276_v42 = vadd.f32 %v5727_v41, %v7429_v50  ;;  %v3267_v43 = vpop.f32.mrb[107].mxu1  ;;  %3780 = vmatprep.mubr.bf16.mxu0 %v6793_v48  ;;  %3893 = vmatprep.mubr.bf16.mxu1 %v6793_v48  ;;  %v3305_v46 = vmax.f32 %v3273_v38, 0.0 }
 0x8c2   : > { %v3268_v45 = vadd.f32 %v7429_v50, %v3267_v43  ;;  %3947 = vmatpush1.bf16.msra.mxu0 %v6175_v35  ;;  %5744 = vmatprep.subr.bf16.mxu1 %v6183_v62  ;;  %v3303_v49 = vmax.f32 %v3265_v40, 0.0 }
 0x8c3   : > { %v3306_v36 = vmax.f32 %v3276_v42, 0.0  ;;  %3948 = vmatprep.subr.bf16.mxu0 %v6182_v1  ;;  %5745 = vmatpush3.bf16.msra.mxu1 %v6183_v62 }
 0x8c4   : > { %v3304_v16 = vmax.f32 %v3268_v45, 0.0  ;;  %5746 = vmatprep.subr.bf16.mxu1 %v6184_v8 }
 0x8c5   : > { %v3316_v51 = vpack.c.bf16 %v3306_v36, %v3305_v46 }
 0x8c6   : > { %v3315_v53 = vpack.c.bf16 %v3304_v16, %v3303_v49  ;;  %3949 = vmatpush1.bf16.msra.mxu0 %v6180_v11 }
 0x8c7   : > { %5747 = vmatpush3.bf16.msra.mxu1 %v6184_v8 }
 0x8c8   : > { %3781 = vmatmul.mubr.bf16.gmra.mrb[128].mxu0 %v3315_v53  ;;  %3894 = vmatmul.mubr.bf16.gmra.mrb[128].mxu1 %v3315_v53 }
 0x8c9   : > { %3790 = vmatprep.mubr.bf16.mxu0 %v6793_v48  ;;  %3903 = vmatprep.mubr.bf16.mxu1 %v6793_v48 }
 0x8ce   : > { %v5730_v19 = vpop.f32.mrb[108].mxu1 }
 0x8cf   : > { %v3289_v54 = vadd.f32 %v5730_v19, %v7429_v50  ;;  %v3280_v56 = vpop.f32.mrb[109].mxu1 }
 0x8d0   : > { %v3281_v59 = vadd.f32 %v7429_v50, %v3280_v56  ;;  %v5731_v60 = vpop.f32.mrb[110].mxu1  ;;  %3791 = vmatmul.mubr.bf16.gmra.mrb[132].mxu0 %v3316_v51  ;;  %3904 = vmatmul.mubr.bf16.gmra.mrb[132].mxu1 %v3316_v51 }
 0x8d1   : > { %v3292_v26 = vadd.f32 %v5731_v60, %v7429_v50  ;;  %v3283_v61 = vpop.f32.mrb[111].mxu1  ;;  %3800 = vmatprep.mubr.bf16.mxu0 %v6793_v48  ;;  %3913 = vmatprep.mubr.bf16.mxu1 %v6793_v48  ;;  %v3309_v29 = vmax.f32 %v3289_v54, 0.0 }
 0x8d2   : > { %v3284_v0 = vadd.f32 %v7429_v50, %v3283_v61  ;;  %v3307_v2 = vmax.f32 %v3281_v59, 0.0  ;;  %v3385_v50 = vlaneseq }
 0x8d3   : > { %v3310_v34 = vmax.f32 %v3292_v26, 0.0 }
 0x8d4   : > { %v3308_v3 = vmax.f32 %v3284_v0, 0.0 }
 0x8d5   : > { %v3318_v63 = vpack.c.bf16 %v3310_v34, %v3309_v29 }
 0x8d6   : > { %v3317_v4 = vpack.c.bf16 %v3308_v3, %v3307_v2 }
 0x8d8   : > { %3801 = vmatmul.mubr.bf16.gmra.mrb[136].mxu0 %v3317_v4  ;;  %3914 = vmatmul.mubr.bf16.gmra.mrb[136].mxu1 %v3317_v4 }
 0x8d9   : > { %3810 = vmatprep.mubr.bf16.mxu0 %v6793_v48  ;;  %3923 = vmatprep.mubr.bf16.mxu1 %v6793_v48 }
 0x8e0   : > { %3811 = vmatmul.mubr.bf16.gmra.mrb[140].mxu0 %v3318_v63  ;;  %3924 = vmatmul.mubr.bf16.gmra.mrb[140].mxu1 %v3318_v63 }
 0x8e1   : > { %5748 = vmatprep.mubr.bf16.mxu1 %v7437_v37  ;;  %3966 = vmatprep.mubr.bf16.mxu0 %v6793_v48 }
 0x8e8   : > { %3967 = vmatmul.mubr.bf16.vlgmr.msra.gmra.mrb[144].mxu0 %v7437_v37  ;;  %5749 = vmatmul.mubr.bf16.vlgmr.msra.gmra.mrb[144].mxu1 %v7435_v58 }
 0x8e9   : > { %5752 = vmatprep.mubr.bf16.mxu1 %v7453_v57  ;;  %3976 = vmatprep.mubr.bf16.mxu0 %v6793_v48 }
 0x8f0   : > { %3977 = vmatmul.mubr.bf16.gmra.mrb[148].mxu0 %v7435_v58  ;;  %5753 = vmatmul.mubr.bf16.gmra.mrb[148].mxu1 %v7451_v24  ;;  %v7493_v58 = vshrl.u32 %v3385_v50, 7 }
 0x8f1   : > { %5756 = vmatprep.mubr.bf16.mxu1 %v3315_v53  ;;  %3986 = vmatprep.mubr.bf16.mxu0 %v6793_v48 }
 0x8f2   : > { %v3387_v37 = vsub.s32 0, %v7493_v58  ;;  %v3395_v5 = vsub.s32 2, %v7493_v58  ;;  %v3391_v9 = vsub.s32 1, %v7493_v58  ;;  %v3399_v10 = vsub.s32 3, %v7493_v58 }
 0x8f3   : > { %v3403_v40 = vsub.s32 4, %v7493_v58  ;;  %v3411_v45 = vsub.s32 6, %v7493_v58  ;;  %v3407_v16 = vsub.s32 5, %v7493_v58 }
 0x8f4   : > { %v7505_v13 = vrot.slane %v7500_v6, %v3387_v37  ;;  %v7511_v14 = vrot.slane %v7500_v6, %v3391_v9  ;;  %v7514_v52 = vrot.slane %v7500_v6, %v3399_v10 }
 0x8f5   : > { %v7543_v10 = vrot.slane %v7500_v6, %v3407_v16 }
 0x8f8   : > { %3987 = vmatmul.mubr.bf16.gmra.mrb[152].mxu0 %v7453_v57  ;;  %5757 = vmatmul.mubr.bf16.gmra.mrb[152].mxu1 %v3316_v51 }
 0x8f9   : > { %5760 = vmatprep.mubr.bf16.mxu1 %v3317_v4  ;;  %3996 = vmatprep.mubr.bf16.mxu0 %v6793_v48 }
 0x900   : > { %3997 = vmatmul.mubr.bf16.gmra.mrb[156].mxu0 %v7451_v24  ;;  %5761 = vmatmul.mubr.bf16.gmra.mrb[156].mxu1 %v3318_v63 }
 0x901   : > { %4006 = vmatprep.mubr.bf16.mxu0 %v6793_v48 }
 0x908   : > { %4007 = vmatmul.mubr.bf16.gmra.mrb[160].mxu0 %v3315_v53 }
 0x909   : > { %4016 = vmatprep.mubr.bf16.mxu0 %v6793_v48 }
 0x910   : > { %4017 = vmatmul.mubr.bf16.gmra.mrb[164].mxu0 %v3316_v51 }
 0x911   : > { %4026 = vmatprep.mubr.bf16.mxu0 %v6793_v48 }
 0x918   : > { %4027 = vmatmul.mubr.bf16.gmra.mrb[168].mxu0 %v3317_v4  ;;  %v7540_v4 = vrot.slane %v7500_v6, %v3411_v45 }
 0x919   : > { %4036 = vmatprep.mubr.bf16.mxu0 %v6793_v48  ;;  %v7508_v48 = vrot.slane %v7500_v6, %v3395_v5 }
 0x920   : > { %4037 = vmatmul.mubr.bf16.gmra.mrb[172].mxu0 %v3318_v63  ;;  %v7537_v63 = vrot.slane %v7500_v6, %v3403_v40 }
 0x97b   : > { %v3742_v17 = vpop.f32.mrb[112].mxu0  ;;  %v3855_v44 = vpop.f32.mrb[112].mxu1 }
 0x97c   : > { %v3743_v55 = vadd.f32 %v3742_v17, %v7505_v13  ;;  %v3856_v18 = vadd.f32 %v3855_v44, %v7508_v48  ;;  %v3744_v20 = vpop.f32.mrb[113].mxu0  ;;  %v3857_v22 = vpop.f32.mrb[113].mxu1 }
 0x97d   : > { %v3745_v47 = vadd.f32 %v3744_v20, %v7511_v14  ;;  %v3858_v7 = vadd.f32 %v3857_v22, %v7514_v52  ;;  %v3746_v15 = vpop.f32.mrb[114].mxu0  ;;  %v3859_v12 = vpop.f32.mrb[114].mxu1 }
 0x97e   : > { %v4144_v21 = vmul.f32 0.5, %v3743_v55  ;;  %v4146_v23 = vmul.f32 0.5, %v3856_v18  ;;  %v3747_v24 = vadd.f32 %v3746_v15, %v7505_v13  ;;  %v3860_v57 = vadd.f32 %v3859_v12, %v7508_v48  ;;  %v3748_v25 = vpop.f32.mrb[115].mxu0  ;;  %v3861_v27 = vpop.f32.mrb[115].mxu1 }
 0x97f   : > { %v4145_v28 = vmul.f32 0.5, %v3745_v47  ;;  %v4147_v30 = vmul.f32 0.5, %v3858_v7  ;;  %v3749_v31 = vadd.f32 %v3748_v25, %v7511_v14  ;;  %v3862_v32 = vadd.f32 %v3861_v27, %v7514_v52 }
 0x980   : > { %6185 = vtanh.f32 %v4144_v21  ;;  %v4151_v33 = vmul.f32 0.5, %v3747_v24  ;;  %v4153_v35 = vmul.f32 0.5, %v3860_v57 }
 0x981   : > { %6187 = vtanh.f32 %v4146_v23  ;;  %v4152_v62 = vmul.f32 0.5, %v3749_v31  ;;  %v4154_v38 = vmul.f32 0.5, %v3862_v32 }
 0x982   : > { %6189 = vtanh.f32 %v4145_v28 }
 0x983   : > { %6191 = vtanh.f32 %v4147_v30  ;;  %v3752_v39 = vpop.f32.mrb[116].mxu0  ;;  %v3865_v1 = vpop.f32.mrb[116].mxu1 }
 0x984   : > { %6193 = vtanh.f32 %v4151_v33  ;;  %v3753_v41 = vadd.f32 %v3752_v39, %v7505_v13  ;;  %v3866_v8 = vadd.f32 %v3865_v1, %v7508_v48  ;;  %v3754_v42 = vpop.f32.mrb[117].mxu0  ;;  %v3867_v43 = vpop.f32.mrb[117].mxu1 }
 0x985   : > { %6195 = vtanh.f32 %v4153_v35  ;;  %v3755_v11 = vadd.f32 %v3754_v42, %v7511_v14  ;;  %v3868_v46 = vadd.f32 %v3867_v43, %v7514_v52  ;;  %v3756_v36 = vpop.f32.mrb[118].mxu0  ;;  %v3869_v49 = vpop.f32.mrb[118].mxu1 }
 0x986   : > { %6197 = vtanh.f32 %v4152_v62  ;;  %v4158_v51 = vmul.f32 0.5, %v3753_v41  ;;  %v4160_v53 = vmul.f32 0.5, %v3866_v8  ;;  %v3757_v19 = vadd.f32 %v3756_v36, %v7505_v13  ;;  %v3758_v54 = vpop.f32.mrb[119].mxu0  ;;  %v3871_v56 = vpop.f32.mrb[119].mxu1 }
 0x987   : > { %6199 = vtanh.f32 %v4154_v38  ;;  %v4159_v59 = vmul.f32 0.5, %v3755_v11  ;;  %v4161_v60 = vmul.f32 0.5, %v3868_v46  ;;  %v3870_v26 = vadd.f32 %v3869_v49, %v7508_v48 }
 0x988   : > { %6201 = vtanh.f32 %v4158_v51  ;;  %v4165_v61 = vmul.f32 0.5, %v3757_v19  ;;  %v3759_v0 = vadd.f32 %v3758_v54, %v7511_v14  ;;  %v3872_v29 = vadd.f32 %v3871_v56, %v7514_v52 }
 0x989   : > { %6203 = vtanh.f32 %v4160_v53  ;;  %v4167_v34 = vmul.f32 0.5, %v3870_v26 }
 0x98a   : > { %v6186_v2 = vpop.eup %6185  ;;  %6205 = vtanh.f32 %v4159_v59  ;;  %v4166_v3 = vmul.f32 0.5, %v3759_v0  ;;  %v4168_v37 = vmul.f32 0.5, %v3872_v29 }
 0x98b   : > { %v6188_v50 = vpop.eup %6187  ;;  %v4368_v58 = vmul.f32 0.5, %v6186_v2  ;;  %6207 = vtanh.f32 %v4161_v60  ;;  %v3762_v5 = vpop.f32.mrb[120].mxu0 }
 0x98c   : > { %v3875_v9 = vpop.f32.mrb[120].mxu1  ;;  %v6190_v17 = vpop.eup %6189  ;;  %v4370_v44 = vmul.f32 0.5, %v6188_v50  ;;  %6209 = vtanh.f32 %v4165_v61  ;;  %v3763_v55 = vadd.f32 %v3762_v5, %v7505_v13 }
 0x98d   : > { %v3876_v18 = vadd.f32 %v3875_v9, %v7508_v48  ;;  %v3764_v20 = vpop.f32.mrb[121].mxu0  ;;  %v3877_v22 = vpop.f32.mrb[121].mxu1  ;;  %v4480_v7 = vadd.f32 0.5, %v4368_v58  ;;  %v4369_v15 = vmul.f32 0.5, %v6190_v17  ;;  %6211 = vtanh.f32 %v4167_v34 }
 0x98e   : > { %v6192_v47 = vpop.eup %6191  ;;  %v3765_v12 = vadd.f32 %v3764_v20, %v7511_v14  ;;  %v3766_v21 = vpop.f32.mrb[122].mxu0  ;;  %v4482_v24 = vadd.f32 0.5, %v4370_v44  ;;  %6213 = vtanh.f32 %v4166_v3  ;;  %v4172_v25 = vmul.f32 0.5, %v3763_v55 }
 0x98f   : > { %v3879_v23 = vpop.f32.mrb[122].mxu1  ;;  %v6194_v6 = vpop.eup %6193  ;;  %v4371_v57 = vmul.f32 0.5, %v6192_v47  ;;  %4592 = vst [vmem:[%s7552_s17] sm:$0xff] %v4480_v7  ;;  %v4481_v31 = vadd.f32 0.5, %v4369_v15  ;;  %6215 = vtanh.f32 %v4168_v37  ;;  %v4174_v33 = vmul.f32 0.5, %v3876_v18 }
 0x990   : > { %v3768_v27 = vpop.f32.mrb[123].mxu0  ;;  %v7548_v28 = vpop.f32.mrb[123].mxu1  ;;  %v4375_v32 = vmul.f32 0.5, %v6194_v6  ;;  %4594 = vst [vmem:[%s7552_s17 + $0x10] sm:$0xff] %v4482_v24  ;;  %6217 = vtanh.f32 %v4172_v25  ;;  %v4173_v39 = vmul.f32 0.5, %v3765_v12  ;;  %v3878_v8 = vadd.f32 %v3877_v22, %v7514_v52 }
 0x991   : > { %v6196_v30 = vpop.eup %6195  ;;  %v4483_v62 = vadd.f32 0.5, %v4371_v57  ;;  %4593 = vst [vmem:[%s7552_s17 + $0x8] sm:$0xff] %v4481_v31  ;;  %6219 = vtanh.f32 %v4174_v33  ;;  %v3767_v11 = vadd.f32 %v3766_v21, %v7505_v13  ;;  %v3880_v51 = vadd.f32 %v3879_v23, %v7508_v48 }
 0x992   : > { %v6198_v35 = vpop.eup %6197  ;;  %v4377_v38 = vmul.f32 0.5, %v6196_v30  ;;  %v4487_v40 = vadd.f32 0.5, %v4375_v32  ;;  %6221 = vtanh.f32 %v4173_v39  ;;  %v4175_v16 = vmul.f32 0.5, %v3878_v8 }
 0x993   : > { %v6200_v1 = vpop.eup %6199  ;;  %v4376_v41 = vmul.f32 0.5, %v6198_v35  ;;  %4595 = vst [vmem:[%s7552_s17 + $0x18] sm:$0xff] %v4483_v62  ;;  %v3772_v53 = vpop.f32.mrb[124].mxu0  ;;  %v4179_v60 = vmul.f32 0.5, %v3767_v11  ;;  %v3769_v26 = vadd.f32 %v3768_v27, %v7511_v14  ;;  %v4181_v3 = vmul.f32 0.5, %v3880_v51 }
 0x994   : > { %v6202_v42 = vpop.eup %6201  ;;  %v4489_v43 = vadd.f32 0.5, %v4377_v38  ;;  %v4378_v45 = vmul.f32 0.5, %v6200_v1  ;;  %4599 = vst [vmem:[%s7552_s17 + $0x38] sm:$0xff] %v4487_v40  ;;  %v3885_v19 = vpop.f32.mrb[124].mxu1  ;;  %6223 = vtanh.f32 %v4175_v16  ;;  %v3882_v47 = vadd.f32 %v7548_v28, %v7514_v52 }
 0x995   : > { %v6204_v46 = vpop.eup %6203  ;;  %v4488_v36 = vadd.f32 0.5, %v4376_v41  ;;  %v4382_v49 = vmul.f32 0.5, %v6202_v42  ;;  %v3774_v61 = vpop.f32.mrb[125].mxu0  ;;  %6225 = vtanh.f32 %v4179_v60  ;;  %v4180_v17 = vmul.f32 0.5, %v3769_v26 }
 0x996   : > { %v6206_v54 = vpop.eup %6205  ;;  %4601 = vst [vmem:[%s7552_s17 + $0x48] sm:$0xff] %v4489_v43  ;;  %v4490_v56 = vadd.f32 0.5, %v4378_v45  ;;  %v4384_v59 = vmul.f32 0.5, %v6204_v46  ;;  %v3887_v0 = vpop.f32.mrb[125].mxu1  ;;  %6227 = vtanh.f32 %v4181_v3  ;;  %v3773_v21 = vadd.f32 %v3772_v53, %v7505_v13 }
 0x997   : > { %v6208_v29 = vpop.eup %6207  ;;  %4600 = vst [vmem:[%s7552_s17 + $0x40] sm:$0xff] %v4488_v36  ;;  %v4494_v34 = vadd.f32 0.5, %v4382_v49  ;;  %v4383_v2 = vmul.f32 0.5, %v6206_v54  ;;  %v3776_v50 = vpop.f32.mrb[126].mxu0  ;;  %6229 = vtanh.f32 %v4180_v17  ;;  %v4182_v57 = vmul.f32 0.5, %v3882_v47 }
 0x998   : > { %v3889_v58 = vpop.f32.mrb[126].mxu1  ;;  %v6210_v37 = vpop.eup %6209  ;;  %4602 = vst [vmem:[%s7552_s17 + $0x50] sm:$0xff] %v4490_v56  ;;  %v4496_v5 = vadd.f32 0.5, %v4384_v59  ;;  %v4385_v9 = vmul.f32 0.5, %v6208_v29  ;;  %v3886_v25 = vadd.f32 %v3885_v19, %v7508_v48  ;;  %v4186_v31 = vmul.f32 0.5, %v3773_v21 }
 0x999   : > { %v3778_v44 = vpop.f32.mrb[127].mxu0  ;;  %v3891_v55 = vpop.f32.mrb[127].mxu1  ;;  %4606 = vst [vmem:[%s7552_s17 + $0x70] sm:$0xff] %v4494_v34  ;;  %v4495_v20 = vadd.f32 0.5, %v4383_v2  ;;  %v4389_v22 = vmul.f32 0.5, %v6210_v37  ;;  %v3775_v32 = vadd.f32 %v3774_v61, %v7511_v14  ;;  %6231 = vtanh.f32 %v4182_v57 }
 0x99a   : > { %v6212_v18 = vpop.eup %6211  ;;  %4608 = vst [vmem:[%s7552_s17 + $0x80] sm:$0xff] %v4496_v5  ;;  %v4497_v15 = vadd.f32 0.5, %v4385_v9  ;;  %v4188_v38 = vmul.f32 0.5, %v3886_v25  ;;  %6233 = vtanh.f32 %v4186_v31  ;;  %v3888_v36 = vadd.f32 %v3887_v0, %v7514_v52 }
 0x99b   : > { %v6214_v7 = vpop.eup %6213  ;;  %v4391_v12 = vmul.f32 0.5, %v6212_v18  ;;  %4607 = vst [vmem:[%s7552_s17 + $0x78] sm:$0xff] %v4495_v20  ;;  %v4501_v6 = vadd.f32 0.5, %v4389_v22  ;;  %v3782_v39 = vpop.f32.mrb[128].mxu0  ;;  %v4187_v42 = vmul.f32 0.5, %v3775_v32  ;;  %v3777_v53 = vadd.f32 %v3776_v50, %v7505_v13 }
 0x99c   : > { %v6216_v23 = vpop.eup %6215  ;;  %v4390_v24 = vmul.f32 0.5, %v6214_v7  ;;  %4609 = vst [vmem:[%s7552_s17 + $0x88] sm:$0xff] %v4497_v15  ;;  %v3895_v1 = vpop.f32.mrb[128].mxu1  ;;  %6235 = vtanh.f32 %v4188_v38  ;;  %v3890_v19 = vadd.f32 %v3889_v58, %v7508_v48  ;;  %v4189_v26 = vmul.f32 0.5, %v3888_v36 }
 0x99d   : > { %v6218_v27 = vpop.eup %6217  ;;  %v4503_v30 = vadd.f32 0.5, %v4391_v12  ;;  %v4392_v28 = vmul.f32 0.5, %v6216_v23  ;;  %4613 = vst [vmem:[%s7552_s17 + $0xa8] sm:$0xff] %v4501_v6  ;;  %v3784_v43 = vpop.f32.mrb[129].mxu0  ;;  %6237 = vtanh.f32 %v4187_v42  ;;  %v3779_v61 = vadd.f32 %v3778_v44, %v7511_v14 }
 0x99e   : > { %v6220_v33 = vpop.eup %6219  ;;  %v4502_v35 = vadd.f32 0.5, %v4390_v24  ;;  %v4396_v62 = vmul.f32 0.5, %v6218_v27  ;;  %v3897_v45 = vpop.f32.mrb[129].mxu1  ;;  %v3892_v0 = vadd.f32 %v3891_v55, %v7514_v52  ;;  %v4193_v2 = vmul.f32 0.5, %v3777_v53 }
 0x99f   : > { %v6222_v40 = vpop.eup %6221  ;;  %4615 = vst [vmem:[%s7552_s17 + $0xb8] sm:$0xff] %v4503_v30  ;;  %v4504_v41 = vadd.f32 0.5, %v4392_v28  ;;  %v4398_v8 = vmul.f32 0.5, %v6220_v33  ;;  %v3786_v49 = vpop.f32.mrb[130].mxu0  ;;  %v4195_v3 = vmul.f32 0.5, %v3890_v19  ;;  %v3783_v50 = vadd.f32 %v3782_v39, %v7505_v13 }
 0x9a0   : > { %4614 = vst [vmem:[%s7552_s17 + $0xb0] sm:$0xff] %v4502_v35  ;;  %v4508_v11 = vadd.f32 0.5, %v4396_v62  ;;  %v4397_v46 = vmul.f32 0.5, %v6222_v40  ;;  %v7579_v16 = vpop.f32.mrb[130].mxu1  ;;  %v7584_v54 = vpop.f32.mrb[131].mxu0  ;;  %6239 = vtanh.f32 %v4189_v26  ;;  %v4194_v5 = vmul.f32 0.5, %v3779_v61 }
 0x9a1   : > { %4616 = vst [vmem:[%s7552_s17 + $0xc0] sm:$0xff] %v4504_v41  ;;  %v4510_v51 = vadd.f32 0.5, %v4398_v8  ;;  %v7586_v56 = vpop.f32.mrb[131].mxu1  ;;  %v6224_v59 = vpop.eup %6223  ;;  %v4196_v9 = vmul.f32 0.5, %v3892_v0  ;;  %6241 = vtanh.f32 %v4193_v2  ;;  %v4200_v44 = vmul.f32 0.5, %v3783_v50 }
 0x9a2   : > { %4620 = vst [vmem:[%s7552_s17 + $0xe0] sm:$0xff] %v4508_v11  ;;  %v4509_v60 = vadd.f32 0.5, %v4397_v46  ;;  %v6226_v29 = vpop.eup %6225  ;;  %v4399_v34 = vmul.f32 0.5, %v6224_v59  ;;  %6243 = vtanh.f32 %v4195_v3  ;;  %v3896_v47 = vadd.f32 %v3895_v1, %v7508_v48 }
 0x9a3   : > { %4622 = vst [vmem:[%s7552_s17 + $0xf0] sm:$0xff] %v4510_v51  ;;  %v6228_v58 = vpop.eup %6227  ;;  %v4403_v37 = vmul.f32 0.5, %v6226_v29  ;;  %v3792_v7 = vpop.f32.mrb[132].mxu0  ;;  %6245 = vtanh.f32 %v4194_v5  ;;  %v3785_v21 = vadd.f32 %v3784_v43, %v7511_v14  ;;  %v3898_v23 = vadd.f32 %v3897_v45, %v7514_v52 }
 0x9a4   : > { %4621 = vst [vmem:[%s7552_s17 + $0xe8] sm:$0xff] %v4509_v60  ;;  %v6230_v17 = vpop.eup %6229  ;;  %v4511_v18 = vadd.f32 0.5, %v4399_v34  ;;  %v4405_v20 = vmul.f32 0.5, %v6228_v58  ;;  %v3905_v15 = vpop.f32.mrb[132].mxu1  ;;  %6247 = vtanh.f32 %v4196_v9  ;;  %v4202_v27 = vmul.f32 0.5, %v3896_v47 }
 0x9a5   : > { %v4515_v55 = vadd.f32 0.5, %v4403_v37  ;;  %v4404_v22 = vmul.f32 0.5, %v6230_v17  ;;  %v3794_v6 = vpop.f32.mrb[133].mxu0  ;;  %v3907_v24 = vpop.f32.mrb[133].mxu1  ;;  %v3787_v30 = vadd.f32 %v3786_v49, %v7505_v13  ;;  %6249 = vtanh.f32 %v4200_v44 }
 0x9a6   : > { %4623 = vst [vmem:[%s7552_s17 + $0xf8] sm:$0xff] %v4511_v18  ;;  %v4517_v12 = vadd.f32 0.5, %v4405_v20  ;;  %v6232_v57 = vpop.eup %6231  ;;  %v7600_v28 = vpop.f32.mrb[134].mxu0  ;;  %v4201_v35 = vmul.f32 0.5, %v3785_v21  ;;  %v4203_v62 = vmul.f32 0.5, %v3898_v23  ;;  %6251 = vtanh.f32 %v4202_v27 }
 0x9a7   : > { %4627 = vst [vmem:[%s7552_s17 + $0x118] sm:$0xff] %v4515_v55  ;;  %v4516_v25 = vadd.f32 0.5, %v4404_v22  ;;  %v7602_v31 = vpop.f32.mrb[134].mxu1  ;;  %v6234_v32 = vpop.eup %6233  ;;  %v4406_v33 = vmul.f32 0.5, %v6232_v57  ;;  %v4207_v41 = vmul.f32 0.5, %v3787_v30  ;;  %v3900_v8 = vadd.f32 %v7579_v16, %v7508_v48 }
 0x9a8   : > { %4629 = vst [vmem:[%s7552_s17 + $0x128] sm:$0xff] %v4517_v12  ;;  %v7605_v38 = vpop.f32.mrb[135].mxu0  ;;  %v7607_v39 = vpop.f32.mrb[135].mxu1  ;;  %v4410_v40 = vmul.f32 0.5, %v6234_v32  ;;  %6253 = vtanh.f32 %v4201_v35  ;;  %v3789_v11 = vadd.f32 %v7584_v54, %v7511_v14  ;;  %v3902_v16 = vadd.f32 %v7586_v56, %v7514_v52 }
 0x9a9   : > { %v6236_v1 = vpop.eup %6235  ;;  %4628 = vst [vmem:[%s7552_s17 + $0x120] sm:$0xff] %v4516_v25  ;;  %v4518_v43 = vadd.f32 0.5, %v4406_v33  ;;  %6255 = vtanh.f32 %v4203_v62  ;;  %v4209_v49 = vmul.f32 0.5, %v3900_v8  ;;  %v3793_v60 = vadd.f32 %v3792_v7, %v7505_v13 }
 0x9aa   : > { %v6238_v42 = vpop.eup %6237  ;;  %v4412_v45 = vmul.f32 0.5, %v6236_v1  ;;  %v4522_v46 = vadd.f32 0.5, %v4410_v40  ;;  %6257 = vtanh.f32 %v4207_v41  ;;  %v4208_v53 = vmul.f32 0.5, %v3789_v11 }
 0x9ab   : > { %v4411_v36 = vmul.f32 0.5, %v6238_v42  ;;  %4630 = vst [vmem:[%s7552_s17 + $0x130] sm:$0xff] %v4518_v43  ;;  %v6240_v19 = vpop.eup %6239  ;;  %6259 = vtanh.f32 %v4209_v49  ;;  %v3906_v54 = vadd.f32 %v3905_v15, %v7508_v48  ;;  %v7620_v26 = vpop.f32.mrb[136].mxu0  ;;  %v4210_v34 = vmul.f32 0.5, %v3902_v16 }
 0x9ac   : > { %v4524_v51 = vadd.f32 0.5, %v4412_v45  ;;  %4634 = vst [vmem:[%s7552_s17 + $0x150] sm:$0xff] %v4522_v46  ;;  %v7622_v61 = vpop.f32.mrb[136].mxu1  ;;  %v6242_v0 = vpop.eup %6241  ;;  %v4413_v29 = vmul.f32 0.5, %v6240_v19  ;;  %6261 = vtanh.f32 %v4208_v53  ;;  %v3795_v56 = vadd.f32 %v3794_v6, %v7511_v14 }
 0x9ad   : > { %v4523_v59 = vadd.f32 0.5, %v4411_v36  ;;  %v7626_v2 = vpop.f32.mrb[137].mxu0  ;;  %v7628_v3 = vpop.f32.mrb[137].mxu1  ;;  %v4417_v58 = vmul.f32 0.5, %v6242_v0  ;;  %v4214_v37 = vmul.f32 0.5, %v3793_v60  ;;  %v4216_v5 = vmul.f32 0.5, %v3906_v54 }
 0x9ae   : > { %4636 = vst [vmem:[%s7552_s17 + $0x160] sm:$0xff] %v4524_v51  ;;  %v6244_v50 = vpop.eup %6243  ;;  %v3908_v9 = vadd.f32 %v3907_v24, %v7514_v52  ;;  %v7632_v17 = vpop.f32.mrb[138].mxu0  ;;  %v4525_v44 = vadd.f32 0.5, %v4413_v29  ;;  %6263 = vtanh.f32 %v4210_v34  ;;  %v4215_v22 = vmul.f32 0.5, %v3795_v56 }
 0x9af   : > { %4635 = vst [vmem:[%s7552_s17 + $0x158] sm:$0xff] %v4523_v59  ;;  %v7634_v18 = vpop.f32.mrb[138].mxu1  ;;  %v6246_v20 = vpop.eup %6245  ;;  %v4419_v55 = vmul.f32 0.5, %v6244_v50  ;;  %v4529_v12 = vadd.f32 0.5, %v4417_v58  ;;  %6265 = vtanh.f32 %v4214_v37  ;;  %v3797_v25 = vadd.f32 %v7600_v28, %v7505_v13 }
 0x9b0   : > { %v7636_v47 = vpop.f32.mrb[139].mxu0  ;;  %v7638_v7 = vpop.f32.mrb[139].mxu1  ;;  %v4418_v21 = vmul.f32 0.5, %v6246_v20  ;;  %v4217_v23 = vmul.f32 0.5, %v3908_v9  ;;  %4637 = vst [vmem:[%s7552_s17 + $0x168] sm:$0xff] %v4525_v44  ;;  %6267 = vtanh.f32 %v4216_v5  ;;  %v3910_v33 = vadd.f32 %v7602_v31, %v7508_v48 }
 0x9b1   : > { %v6248_v15 = vpop.eup %6247  ;;  %v4531_v24 = vadd.f32 0.5, %v4419_v55  ;;  %4641 = vst [vmem:[%s7552_s17 + $0x188] sm:$0xff] %v4529_v12  ;;  %6269 = vtanh.f32 %v4215_v22  ;;  %v4221_v40 = vmul.f32 0.5, %v3797_v25  ;;  %v3799_v43 = vadd.f32 %v7605_v38, %v7511_v14 }
 0x9b2   : > { %v6250_v6 = vpop.eup %6249  ;;  %v4420_v57 = vmul.f32 0.5, %v6248_v15  ;;  %v4530_v30 = vadd.f32 0.5, %v4418_v21  ;;  %6271 = vtanh.f32 %v4217_v23  ;;  %v4223_v42 = vmul.f32 0.5, %v3910_v33 }
 0x9b3   : > { %v6252_v27 = vpop.eup %6251  ;;  %v4424_v32 = vmul.f32 0.5, %v6250_v6  ;;  %4643 = vst [vmem:[%s7552_s17 + $0x198] sm:$0xff] %v4531_v24  ;;  %v7650_v45 = vpop.f32.mrb[140].mxu0  ;;  %6273 = vtanh.f32 %v4221_v40  ;;  %v3912_v49 = vadd.f32 %v7607_v39, %v7514_v52  ;;  %v4222_v59 = vmul.f32 0.5, %v3799_v43 }
 0x9b4   : > { %v6254_v35 = vpop.eup %6253  ;;  %v4532_v62 = vadd.f32 0.5, %v4420_v57  ;;  %v4426_v1 = vmul.f32 0.5, %v6252_v27  ;;  %4642 = vst [vmem:[%s7552_s17 + $0x190] sm:$0xff] %v4530_v30  ;;  %v7652_v11 = vpop.f32.mrb[140].mxu1  ;;  %6275 = vtanh.f32 %v4223_v42  ;;  %v3803_v56 = vadd.f32 %v7620_v26, %v7505_v13 }
 0x9b5   : > { %v6256_v41 = vpop.eup %6255  ;;  %v4536_v8 = vadd.f32 0.5, %v4424_v32  ;;  %v4425_v28 = vmul.f32 0.5, %v6254_v35  ;;  %v7657_v51 = vpop.f32.mrb[141].mxu0  ;;  %v4224_v34 = vmul.f32 0.5, %v3912_v49  ;;  %6277 = vtanh.f32 %v4222_v59 }
 0x9b6   : > { %v6258_v31 = vpop.eup %6257  ;;  %4644 = vst [vmem:[%s7552_s17 + $0x1a0] sm:$0xff] %v4532_v62  ;;  %v4538_v46 = vadd.f32 0.5, %v4426_v1  ;;  %v4427_v36 = vmul.f32 0.5, %v6256_v41  ;;  %v7659_v53 = vpop.f32.mrb[141].mxu1  ;;  %v3916_v9 = vadd.f32 %v7622_v61, %v7508_v48  ;;  %v4228_v55 = vmul.f32 0.5, %v3803_v56 }
 0x9b7   : > { %v6260_v16 = vpop.eup %6259  ;;  %4648 = vst [vmem:[%s7552_s17 + $0x1c0] sm:$0xff] %v4536_v8  ;;  %v4537_v38 = vadd.f32 0.5, %v4425_v28  ;;  %v4431_v19 = vmul.f32 0.5, %v6258_v31  ;;  %v7662_v60 = vpop.f32.mrb[142].mxu0  ;;  %6279 = vtanh.f32 %v4224_v34  ;;  %v3805_v26 = vadd.f32 %v7626_v2, %v7511_v14 }
 0x9b8   : > { %v7664_v54 = vpop.f32.mrb[142].mxu1  ;;  %v6262_v0 = vpop.eup %6261  ;;  %4650 = vst [vmem:[%s7552_s17 + $0x1d0] sm:$0xff] %v4538_v46  ;;  %v4539_v29 = vadd.f32 0.5, %v4427_v36  ;;  %v4433_v39 = vmul.f32 0.5, %v6260_v16  ;;  %v4230_v21 = vmul.f32 0.5, %v3916_v9  ;;  %v3918_v23 = vadd.f32 %v7628_v3, %v7514_v52 }
 0x9b9   : > { %v7669_v50 = vpop.f32.mrb[143].mxu0  ;;  %v7671_v58 = vpop.f32.mrb[143].mxu1  ;;  %4649 = vst [vmem:[%s7552_s17 + $0x1c8] sm:$0xff] %v4537_v38  ;;  %v4543_v37 = vadd.f32 0.5, %v4431_v19  ;;  %v4432_v5 = vmul.f32 0.5, %v6262_v0  ;;  %6281 = vtanh.f32 %v4228_v55  ;;  %v4229_v24 = vmul.f32 0.5, %v3805_v26 }
 0x9ba   : > { %v6264_v20 = vpop.eup %6263  ;;  %4651 = vst [vmem:[%s7552_s17 + $0x1d8] sm:$0xff] %v4539_v29  ;;  %v4545_v44 = vadd.f32 0.5, %v4433_v39  ;;  %v3807_v57 = vadd.f32 %v7632_v17, %v7505_v13  ;;  %6283 = vtanh.f32 %v4230_v21  ;;  %v4231_v30 = vmul.f32 0.5, %v3918_v23 }
 0x9bb   : > { %v6266_v22 = vpop.eup %6265  ;;  %4655 = vst [vmem:[%s7552_s17 + $0x1f8] sm:$0xff] %v4543_v37  ;;  %v4544_v15 = vadd.f32 0.5, %v4432_v5  ;;  %v4434_v12 = vmul.f32 0.5, %v6264_v20  ;;  %v7686_v32 = vpop.f32.mrb[144].mxu0  ;;  %6285 = vtanh.f32 %v4229_v24  ;;  %v3920_v28 = vadd.f32 %v7634_v18, %v7508_v48 }
 0x9bc   : > { %v6268_v6 = vpop.eup %6267  ;;  %4657 = vst [vmem:[%s7552_s17 + $0x208] sm:$0xff] %v4545_v44  ;;  %v4438_v61 = vmul.f32 0.5, %v6266_v22  ;;  %v7688_v33 = vpop.f32.mrb[144].mxu1  ;;  %v4235_v1 = vmul.f32 0.5, %v3807_v57  ;;  %6287 = vtanh.f32 %v4231_v30  ;;  %v3809_v36 = vadd.f32 %v7636_v47, %v7511_v14 }
 0x9bd   : > { %v6270_v25 = vpop.eup %6269  ;;  %4656 = vst [vmem:[%s7552_s17 + $0x200] sm:$0xff] %v4544_v15  ;;  %v4546_v2 = vadd.f32 0.5, %v4434_v12  ;;  %v4440_v27 = vmul.f32 0.5, %v6268_v6  ;;  %v7690_v40 = vpop.f32.mrb[145].mxu0  ;;  %v3922_v49 = vadd.f32 %v7638_v7, %v7514_v52  ;;  %v4237_v0 = vmul.f32 0.5, %v3920_v28 }
 0x9be   : > { %v6272_v3 = vpop.eup %6271  ;;  %v4550_v35 = vadd.f32 0.5, %v4438_v61  ;;  %v4439_v62 = vmul.f32 0.5, %v6270_v25  ;;  %v7692_v17 = vpop.f32.mrb[145].mxu1  ;;  %6289 = vtanh.f32 %v4235_v1  ;;  %v3813_v29 = vadd.f32 %v7650_v45, %v7505_v13 }
 0x9bf   : > { %4658 = vst [vmem:[%s7552_s17 + $0x210] sm:$0xff] %v4546_v2  ;;  %v4552_v41 = vadd.f32 0.5, %v4440_v27  ;;  %v4441_v8 = vmul.f32 0.5, %v6272_v3  ;;  %v7697_v42 = vpop.f32.mrb[146].mxu0  ;;  %v7699_v43 = vpop.f32.mrb[146].mxu1  ;;  %v4236_v47 = vmul.f32 0.5, %v3809_v36  ;;  %v3926_v7 = vadd.f32 %v7652_v11, %v7508_v48 }
 0x9c0   : > { %v6274_v31 = vpop.eup %6273  ;;  %4662 = vst [vmem:[%s7552_s17 + $0x230] sm:$0xff] %v4550_v35  ;;  %v4551_v46 = vadd.f32 0.5, %v4439_v62  ;;  %v7706_v16 = vpop.f32.mrb[147].mxu0  ;;  %v4238_v34 = vmul.f32 0.5, %v3922_v49  ;;  %6291 = vtanh.f32 %v4237_v0  ;;  %v4242_v5 = vmul.f32 0.5, %v3813_v29 }
 0x9c1   : > { %v7708_v38 = vpop.f32.mrb[147].mxu1  ;;  %v6276_v18 = vpop.eup %6275  ;;  %4664 = vst [vmem:[%s7552_s17 + $0x240] sm:$0xff] %v4552_v41  ;;  %v4553_v19 = vadd.f32 0.5, %v4441_v8  ;;  %v4445_v59 = vmul.f32 0.5, %v6274_v31  ;;  %v3815_v9 = vadd.f32 %v7657_v51, %v7511_v14  ;;  %6293 = vtanh.f32 %v4236_v47 }
 0x9c2   : > { %4663 = vst [vmem:[%s7552_s17 + $0x238] sm:$0xff] %v4551_v46  ;;  %v4447_v39 = vmul.f32 0.5, %v6276_v18  ;;  %v6278_v56 = vpop.eup %6277  ;;  %v4244_v55 = vmul.f32 0.5, %v3926_v7  ;;  %6295 = vtanh.f32 %v4238_v34  ;;  %v3928_v11 = vadd.f32 %v7659_v53, %v7514_v52 }
 0x9c3   : > { %4665 = vst [vmem:[%s7552_s17 + $0x248] sm:$0xff] %v4553_v19  ;;  %v4557_v37 = vadd.f32 0.5, %v4445_v59  ;;  %v6280_v20 = vpop.eup %6279  ;;  %v4446_v45 = vmul.f32 0.5, %v6278_v56  ;;  %v4243_v22 = vmul.f32 0.5, %v3815_v9  ;;  %v7722_v15 = vpop.f32.mrb[148].mxu0  ;;  %6297 = vtanh.f32 %v4242_v5 }
 0x9c4   : > { %v4559_v44 = vadd.f32 0.5, %v4447_v39  ;;  %v4448_v26 = vmul.f32 0.5, %v6280_v20  ;;  %v7724_v12 = vpop.f32.mrb[148].mxu1  ;;  %v6282_v21 = vpop.eup %6281  ;;  %v3817_v23 = vadd.f32 %v7662_v60, %v7505_v13  ;;  %v3930_v6 = vadd.f32 %v7664_v54, %v7508_v48 }
 0x9c5   : > { %4669 = vst [vmem:[%s7552_s17 + $0x268] sm:$0xff] %v4557_v37  ;;  %v4558_v51 = vadd.f32 0.5, %v4446_v45  ;;  %v7731_v61 = vpop.f32.mrb[149].mxu0  ;;  %v7733_v24 = vpop.f32.mrb[149].mxu1  ;;  %v4452_v25 = vmul.f32 0.5, %v6282_v21  ;;  %6299 = vtanh.f32 %v4244_v55  ;;  %v4245_v2 = vmul.f32 0.5, %v3928_v11 }
 0x9c6   : > { %4671 = vst [vmem:[%s7552_s17 + $0x278] sm:$0xff] %v4559_v44  ;;  %v6284_v53 = vpop.eup %6283  ;;  %v4560_v57 = vadd.f32 0.5, %v4448_v26  ;;  %v7735_v27 = vpop.f32.mrb[150].mxu0  ;;  %6301 = vtanh.f32 %v4243_v22  ;;  %v4249_v48 = vmul.f32 0.5, %v3817_v23  ;;  %v4251_v60 = vmul.f32 0.5, %v3930_v6 }
 0x9c7   : > { %v7737_v30 = vpop.f32.mrb[150].mxu1  ;;  %v6286_v3 = vpop.eup %6285  ;;  %4670 = vst [vmem:[%s7552_s17 + $0x270] sm:$0xff] %v4558_v51  ;;  %v4454_v13 = vmul.f32 0.5, %v6284_v53  ;;  %v4564_v1 = vadd.f32 0.5, %v4452_v25  ;;  %6303 = vtanh.f32 %v4245_v2  ;;  %v3819_v8 = vadd.f32 %v7669_v50, %v7511_v14 }
 0x9c8   : > { %v7740_v54 = vpop.f32.mrb[151].mxu0  ;;  %v7742_v35 = vpop.f32.mrb[151].mxu1  ;;  %4672 = vst [vmem:[%s7552_s17 + $0x280] sm:$0xff] %v4560_v57  ;;  %v4453_v41 = vmul.f32 0.5, %v6286_v3  ;;  %6305 = vtanh.f32 %v4249_v48  ;;  %v3932_v36 = vadd.f32 %v7671_v58, %v7514_v52  ;;  %v3969_v14 = vadd.f32 %v7686_v32, %v7537_v63 }
 0x9c9   : > { %v6288_v62 = vpop.eup %6287  ;;  %v4566_v31 = vadd.f32 0.5, %v4454_v13  ;;  %4676 = vst [vmem:[%s7552_s17 + $0x2a0] sm:$0xff] %v4564_v1  ;;  %6307 = vtanh.f32 %v4251_v60  ;;  %v4250_v19 = vmul.f32 0.5, %v3819_v8  ;;  %v4090_v50 = vadd.f32 %v7688_v33, %v7540_v4 }
 0x9ca   : > { %v6290_v28 = vpop.eup %6289  ;;  %v4455_v46 = vmul.f32 0.5, %v6288_v62  ;;  %v4565_v49 = vadd.f32 0.5, %v4453_v41  ;;  %v4252_v0 = vmul.f32 0.5, %v3932_v36  ;;  %v3971_v52 = vadd.f32 %v7690_v40, %v7543_v10 }
 0x9cb   : > { %v4459_v18 = vmul.f32 0.5, %v6290_v28  ;;  %4678 = vst [vmem:[%s7552_s17 + $0x2b0] sm:$0xff] %v4566_v31  ;;  %v6292_v29 = vpop.eup %6291  ;;  %6309 = vtanh.f32 %v4250_v19  ;;  %v4082_v58 = vadd.f32 %v7692_v17, %v7540_v4  ;;  %v7760_v47 = vpop.f32.mrb[152].mxu0  ;;  %v4148_v33 = vmul.f32 0.5, %v3969_v14 }
 0x9cc   : > { %v4567_v59 = vadd.f32 0.5, %v4455_v46  ;;  %4677 = vst [vmem:[%s7552_s17 + $0x2a8] sm:$0xff] %v4565_v49  ;;  %v7762_v34 = vpop.f32.mrb[152].mxu1  ;;  %v6294_v7 = vpop.eup %6293  ;;  %v4461_v32 = vmul.f32 0.5, %v6292_v29  ;;  %6311 = vtanh.f32 %v4252_v0  ;;  %v4164_v56 = vmul.f32 0.5, %v4090_v50 }
 0x9cd   : > { %v4571_v39 = vadd.f32 0.5, %v4459_v18  ;;  %v7765_v37 = vpop.f32.mrb[153].mxu0  ;;  %v7767_v5 = vpop.f32.mrb[153].mxu1  ;;  %v4460_v40 = vmul.f32 0.5, %v6294_v7  ;;  %v4149_v20 = vmul.f32 0.5, %v3971_v52  ;;  %v4150_v44 = vmul.f32 0.5, %v4082_v58 }
 0x9ce   : > { %4679 = vst [vmem:[%s7552_s17 + $0x2b8] sm:$0xff] %v4567_v59  ;;  %v6296_v9 = vpop.eup %6295  ;;  %v3973_v17 = vadd.f32 %v7697_v42, %v7537_v63  ;;  %v7772_v45 = vpop.f32.mrb[154].mxu0  ;;  %v4573_v22 = vadd.f32 0.5, %v4461_v32  ;;  %6313 = vtanh.f32 %v4148_v33  ;;  %v4093_v21 = vadd.f32 %v7699_v43, %v7540_v4 }
 0x9cf   : > { %4683 = vst [vmem:[%s7552_s17 + $0x2d8] sm:$0xff] %v4571_v39  ;;  %v7774_v55 = vpop.f32.mrb[154].mxu1  ;;  %v6298_v26 = vpop.eup %6297  ;;  %v4462_v11 = vmul.f32 0.5, %v6296_v9  ;;  %v4572_v53 = vadd.f32 0.5, %v4460_v40  ;;  %6315 = vtanh.f32 %v4164_v56  ;;  %v3975_v62 = vadd.f32 %v7706_v16, %v7543_v10 }
 0x9d0   : > { %v7778_v51 = vpop.f32.mrb[155].mxu0  ;;  %v7780_v23 = vpop.f32.mrb[155].mxu1  ;;  %v4466_v42 = vmul.f32 0.5, %v6298_v26  ;;  %v4155_v57 = vmul.f32 0.5, %v3973_v17  ;;  %4685 = vst [vmem:[%s7552_s17 + $0x2e8] sm:$0xff] %v4573_v22  ;;  %6317 = vtanh.f32 %v4149_v20  ;;  %v4171_v13 = vmul.f32 0.5, %v4093_v21 }
 0x9d1   : > { %v6300_v6 = vpop.eup %6299  ;;  %v4574_v2 = vadd.f32 0.5, %v4462_v11  ;;  %4684 = vst [vmem:[%s7552_s17 + $0x2e0] sm:$0xff] %v4572_v53  ;;  %6319 = vtanh.f32 %v4150_v44  ;;  %v4085_v28 = vadd.f32 %v7708_v38, %v7540_v4  ;;  %v4156_v49 = vmul.f32 0.5, %v3975_v62 }
 0x9d2   : > { %v6302_v25 = vpop.eup %6301  ;;  %v4468_v3 = vmul.f32 0.5, %v6300_v6  ;;  %v4578_v43 = vadd.f32 0.5, %v4466_v42  ;;  %6321 = vtanh.f32 %v4155_v57  ;;  %v3979_v14 = vadd.f32 %v7722_v15, %v7537_v63 }
 0x9d3   : > { %v6304_v48 = vpop.eup %6303  ;;  %v4467_v60 = vmul.f32 0.5, %v6302_v25  ;;  %4686 = vst [vmem:[%s7552_s17 + $0x2f0] sm:$0xff] %v4574_v2  ;;  %6323 = vtanh.f32 %v4171_v13  ;;  %v7790_v18 = vpop.f32.mrb[156].mxu0  ;;  %v4157_v0 = vmul.f32 0.5, %v4085_v28  ;;  %v4106_v52 = vadd.f32 %v7724_v12, %v7540_v4 }
 0x9d4   : > { %v6306_v1 = vpop.eup %6305  ;;  %v4580_v41 = vadd.f32 0.5, %v4468_v3  ;;  %v4469_v8 = vmul.f32 0.5, %v6304_v48  ;;  %4690 = vst [vmem:[%s7552_s17 + $0x310] sm:$0xff] %v4578_v43  ;;  %v7792_v19 = vpop.f32.mrb[156].mxu1  ;;  %6325 = vtanh.f32 %v4156_v49  ;;  %v3981_v58 = vadd.f32 %v7731_v61, %v7543_v10 }
 0x9d5   : > { %v6308_v31 = vpop.eup %6307  ;;  %v4579_v46 = vadd.f32 0.5, %v4467_v60  ;;  %v4473_v36 = vmul.f32 0.5, %v6306_v1  ;;  %v7797_v38 = vpop.f32.mrb[157].mxu0  ;;  %6327 = vtanh.f32 %v4157_v0  ;;  %v4162_v9 = vmul.f32 0.5, %v3979_v14 }
 0x9d6   : > { %4692 = vst [vmem:[%s7552_s17 + $0x320] sm:$0xff] %v4580_v41  ;;  %v4581_v16 = vadd.f32 0.5, %v4469_v8  ;;  %v4475_v59 = vmul.f32 0.5, %v6308_v31  ;;  %v7799_v50 = vpop.f32.mrb[157].mxu1  ;;  %v6310_v29 = vpop.eup %6309  ;;  %v4192_v44 = vmul.f32 0.5, %v4106_v52  ;;  %v4163_v61 = vmul.f32 0.5, %v3981_v58 }
 0x9d7   : > { %4691 = vst [vmem:[%s7552_s17 + $0x318] sm:$0xff] %v4579_v46  ;;  %v4585_v39 = vadd.f32 0.5, %v4473_v36  ;;  %v7806_v7 = vpop.f32.mrb[158].mxu0  ;;  %v7808_v32 = vpop.f32.mrb[158].mxu1  ;;  %v4474_v56 = vmul.f32 0.5, %v6310_v29  ;;  %v4098_v17 = vadd.f32 %v7733_v24, %v7540_v4  ;;  %6329 = vtanh.f32 %v4162_v9 }
 0x9d8   : > { %v6312_v15 = vpop.eup %6311  ;;  %4693 = vst [vmem:[%s7552_s17 + $0x328] sm:$0xff] %v4581_v16  ;;  %v4587_v33 = vadd.f32 0.5, %v4475_v59  ;;  %v7811_v40 = vpop.f32.mrb[159].mxu0  ;;  %v3983_v11 = vadd.f32 %v7735_v27, %v7537_v63  ;;  %v4109_v21 = vadd.f32 %v7737_v30, %v7540_v4  ;;  %6331 = vtanh.f32 %v4192_v44 }
 0x9d9   : > { %v7813_v20 = vpop.f32.mrb[159].mxu1  ;;  %4697 = vst [vmem:[%s7552_s17 + $0x348] sm:$0xff] %v4585_v39  ;;  %v4476_v12 = vmul.f32 0.5, %v6312_v15  ;;  %v6314_v26 = vpop.eup %6313  ;;  %v4586_v22 = vadd.f32 0.5, %v4474_v56  ;;  %v4178_v57 = vmul.f32 0.5, %v4098_v17  ;;  %6333 = vtanh.f32 %v4163_v61 }
 0x9da   : > { %4699 = vst [vmem:[%s7552_s17 + $0x358] sm:$0xff] %v4587_v33  ;;  %v6316_v6 = vpop.eup %6315  ;;  %v4372_v42 = vmul.f32 0.5, %v6314_v26  ;;  %v4169_v24 = vmul.f32 0.5, %v3983_v11  ;;  %v4199_v3 = vmul.f32 0.5, %v4109_v21  ;;  %v3985_v27 = vadd.f32 %v7740_v54, %v7543_v10 }
 0x9db   : > { %v4588_v53 = vadd.f32 0.5, %v4476_v12  ;;  %v6318_v25 = vpop.eup %6317  ;;  %4698 = vst [vmem:[%s7552_s17 + $0x350] sm:$0xff] %v4586_v22  ;;  %v4388_v2 = vmul.f32 0.5, %v6316_v6  ;;  %6335 = vtanh.f32 %v4178_v57  ;;  %v7827_v30 = vpop.f32.mrb[160].mxu0  ;;  %v4101_v41 = vadd.f32 %v7742_v35, %v7540_v4 }
 0x9dc   : > { %v6320_v13 = vpop.eup %6319  ;;  %v4484_v48 = vadd.f32 0.5, %v4372_v42  ;;  %v4373_v43 = vmul.f32 0.5, %v6318_v25  ;;  %6337 = vtanh.f32 %v4169_v24  ;;  %v7831_v8 = vpop.f32.mrb[161].mxu0  ;;  %v4170_v36 = vmul.f32 0.5, %v3985_v27 }
 0x9dd   : > { %4700 = vst [vmem:[%s7552_s17 + $0x360] sm:$0xff] %v4588_v53  ;;  %v6322_v60 = vpop.eup %6321  ;;  %v4500_v62 = vadd.f32 0.5, %v4388_v2  ;;  %v4374_v1 = vmul.f32 0.5, %v6320_v13  ;;  %6339 = vtanh.f32 %v4199_v3  ;;  %v7834_v54 = vpop.f32.mrb[162].mxu0  ;;  %v4185_v59 = vmul.f32 0.5, %v4101_v41 }
 0x9de   : > { %v6324_v28 = vpop.eup %6323  ;;  %4596 = vst [vmem:[%s7552_s17 + $0x20] sm:$0xff] %v4484_v48  ;;  %v4485_v31 = vadd.f32 0.5, %v4373_v43  ;;  %v4379_v46 = vmul.f32 0.5, %v6322_v60  ;;  %v3989_v35 = vadd.f32 %v7760_v47, %v7537_v63  ;;  %v7839_v0 = vpop.f32.mrb[163].mxu0  ;;  %6341 = vtanh.f32 %v4170_v36 }
 0x9df   : > { %4612 = vst [vmem:[%s7552_s17 + $0xa0] sm:$0xff] %v4500_v62  ;;  %v4486_v49 = vadd.f32 0.5, %v4374_v1  ;;  %v4395_v16 = vmul.f32 0.5, %v6324_v28  ;;  %v6326_v14 = vpop.eup %6325  ;;  %v4122_v39 = vadd.f32 %v7762_v34, %v7540_v4  ;;  %v3991_v52 = vadd.f32 %v7765_v37, %v7543_v10 }
 0x9e0   : > { %4597 = vst [vmem:[%s7552_s17 + $0x28] sm:$0xff] %v4485_v31  ;;  %v4491_v29 = vadd.f32 0.5, %v4379_v46  ;;  %v6328_v58 = vpop.eup %6327  ;;  %v4380_v33 = vmul.f32 0.5, %v6326_v14  ;;  %6343 = vtanh.f32 %v4185_v59  ;;  %v4176_v56 = vmul.f32 0.5, %v3989_v35 }
 0x9e1   : > { %4598 = vst [vmem:[%s7552_s17 + $0x30] sm:$0xff] %v4486_v49  ;;  %v4507_v15 = vadd.f32 0.5, %v4395_v16  ;;  %v4381_v47 = vmul.f32 0.5, %v6328_v58  ;;  %v4220_v9 = vmul.f32 0.5, %v4122_v39  ;;  %v4177_v12 = vmul.f32 0.5, %v3991_v52  ;;  %v6330_v61 = vpop.eup %6329 }
 0x9e2   : > { %4603 = vst [vmem:[%s7552_s17 + $0x58] sm:$0xff] %v4491_v29  ;;  %v4114_v44 = vadd.f32 %v7767_v5, %v7540_v4  ;;  %v4492_v34 = vadd.f32 0.5, %v4380_v33  ;;  %6345 = vtanh.f32 %v4176_v56  ;;  %v3993_v37 = vadd.f32 %v7772_v45, %v7537_v63  ;;  %v6332_v26 = vpop.eup %6331 }
 0x9e3   : > { %4619 = vst [vmem:[%s7552_s17 + $0xd8] sm:$0xff] %v4507_v15  ;;  %v4125_v17 = vadd.f32 %v7774_v55, %v7540_v4  ;;  %v4493_v22 = vadd.f32 0.5, %v4381_v47  ;;  %v4386_v11 = vmul.f32 0.5, %v6330_v61  ;;  %6347 = vtanh.f32 %v4220_v9  ;;  %v7855_v6 = vpop.f32.mrb[164].mxu0  ;;  %v6334_v53 = vpop.eup %6333 }
 0x9e4   : > { %v4206_v21 = vmul.f32 0.5, %v4114_v44  ;;  %4604 = vst [vmem:[%s7552_s17 + $0x60] sm:$0xff] %v4492_v34  ;;  %v4416_v5 = vmul.f32 0.5, %v6332_v26  ;;  %6349 = vtanh.f32 %v4177_v12  ;;  %v4183_v42 = vmul.f32 0.5, %v3993_v37  ;;  %v7858_v25 = vpop.f32.mrb[165].mxu0 }
 0x9e5   : > { %v4227_v57 = vmul.f32 0.5, %v4125_v17  ;;  %v6336_v45 = vpop.eup %6335  ;;  %4605 = vst [vmem:[%s7552_s17 + $0x68] sm:$0xff] %v4493_v22  ;;  %v4498_v2 = vadd.f32 0.5, %v4386_v11  ;;  %v4387_v55 = vmul.f32 0.5, %v6334_v53  ;;  %v3995_v24 = vadd.f32 %v7778_v51, %v7543_v10  ;;  %v7863_v3 = vpop.f32.mrb[166].mxu0 }
 0x9e6   : > { %6351 = vtanh.f32 %v4206_v21  ;;  %v6338_v13 = vpop.eup %6337  ;;  %v4528_v48 = vadd.f32 0.5, %v4416_v5  ;;  %v4402_v43 = vmul.f32 0.5, %v6336_v45  ;;  %v4117_v27 = vadd.f32 %v7780_v23, %v7540_v4  ;;  %v7867_v60 = vpop.f32.mrb[167].mxu0 }
 0x9e7   : > { %6353 = vtanh.f32 %v4183_v42  ;;  %v6340_v62 = vpop.eup %6339  ;;  %4610 = vst [vmem:[%s7552_s17 + $0x90] sm:$0xff] %v4498_v2  ;;  %v4499_v1 = vadd.f32 0.5, %v4387_v55  ;;  %v4393_v41 = vmul.f32 0.5, %v6338_v13  ;;  %v4184_v28 = vmul.f32 0.5, %v3995_v24 }
 0x9e8   : > { %6355 = vtanh.f32 %v4227_v57  ;;  %4640 = vst [vmem:[%s7552_s17 + $0x180] sm:$0xff] %v4528_v48  ;;  %v4514_v51 = vadd.f32 0.5, %v4402_v43  ;;  %v4423_v31 = vmul.f32 0.5, %v6340_v62  ;;  %v4213_v46 = vmul.f32 0.5, %v4117_v27  ;;  %v6342_v49 = vpop.eup %6341 }
 0x9e9   : > { %v3999_v36 = vadd.f32 %v7790_v18, %v7537_v63  ;;  %4611 = vst [vmem:[%s7552_s17 + $0x98] sm:$0xff] %v4499_v1  ;;  %v4505_v23 = vadd.f32 0.5, %v4393_v41  ;;  %6357 = vtanh.f32 %v4184_v28  ;;  %v4138_v16 = vadd.f32 %v7792_v19, %v7540_v4 }
 0x9ea   : > { %v4001_v59 = vadd.f32 %v7797_v38, %v7543_v10  ;;  %v6344_v35 = vpop.eup %6343  ;;  %4626 = vst [vmem:[%s7552_s17 + $0x110] sm:$0xff] %v4514_v51  ;;  %v4535_v14 = vadd.f32 0.5, %v4423_v31  ;;  %v4394_v29 = vmul.f32 0.5, %v6342_v49  ;;  %6359 = vtanh.f32 %v4213_v46 }
 0x9eb   : > { %v4190_v39 = vmul.f32 0.5, %v3999_v36  ;;  %4617 = vst [vmem:[%s7552_s17 + $0xc8] sm:$0xff] %v4505_v23  ;;  %v4409_v52 = vmul.f32 0.5, %v6344_v35  ;;  %v4248_v18 = vmul.f32 0.5, %v4138_v16  ;;  %v4130_v15 = vadd.f32 %v7799_v50, %v7540_v4  ;;  %v7882_v33 = vpop.f32.mrb[168].mxu0 }
 0x9ec   : > { %v4191_v58 = vmul.f32 0.5, %v4001_v59  ;;  %v6346_v19 = vpop.eup %6345  ;;  %4647 = vst [vmem:[%s7552_s17 + $0x1b8] sm:$0xff] %v4535_v14  ;;  %v4506_v56 = vadd.f32 0.5, %v4394_v29  ;;  %v4003_v38 = vadd.f32 %v7806_v7, %v7537_v63  ;;  %v4141_v47 = vadd.f32 %v7808_v32, %v7540_v4  ;;  %v7889_v9 = vpop.f32.mrb[169].mxu0 }
 0x9ed   : > { %6361 = vtanh.f32 %v4190_v39  ;;  %v6348_v12 = vpop.eup %6347  ;;  %v4521_v44 = vadd.f32 0.5, %v4409_v52  ;;  %v4400_v61 = vmul.f32 0.5, %v6346_v19  ;;  %v4234_v50 = vmul.f32 0.5, %v4130_v15  ;;  %v7891_v34 = vpop.f32.mrb[170].mxu0 }
 0x9ee   : > { %6363 = vtanh.f32 %v4248_v18  ;;  %v6350_v37 = vpop.eup %6349  ;;  %4618 = vst [vmem:[%s7552_s17 + $0xd0] sm:$0xff] %v4506_v56  ;;  %v4444_v17 = vmul.f32 0.5, %v6348_v12  ;;  %v4197_v26 = vmul.f32 0.5, %v4003_v38  ;;  %v4255_v7 = vmul.f32 0.5, %v4141_v47  ;;  %v7894_v22 = vpop.f32.mrb[171].mxu0 }
 0x9ef   : > { %6365 = vtanh.f32 %v4191_v58  ;;  %4633 = vst [vmem:[%s7552_s17 + $0x148] sm:$0xff] %v4521_v44  ;;  %v4512_v11 = vadd.f32 0.5, %v4400_v61  ;;  %v4401_v21 = vmul.f32 0.5, %v6350_v37  ;;  %v4005_v53 = vadd.f32 %v7811_v40, %v7543_v10 }
 0x9f0   : > { %v6352_v32 = vpop.eup %6351  ;;  %6367 = vtanh.f32 %v4234_v50  ;;  %v4556_v42 = vadd.f32 0.5, %v4444_v17  ;;  %v4133_v45 = vadd.f32 %v7813_v20, %v7540_v4  ;;  %v4009_v40 = vadd.f32 %v7827_v30, %v7537_v63 }
 0x9f1   : > { %v6354_v5 = vpop.eup %6353  ;;  %v4430_v57 = vmul.f32 0.5, %v6352_v32  ;;  %6369 = vtanh.f32 %v4197_v26  ;;  %4624 = vst [vmem:[%s7552_s17 + $0x100] sm:$0xff] %v4512_v11  ;;  %v4513_v55 = vadd.f32 0.5, %v4401_v21  ;;  %v4198_v13 = vmul.f32 0.5, %v4005_v53 }
 0x9f2   : > { %v6356_v2 = vpop.eup %6355  ;;  %v4407_v24 = vmul.f32 0.5, %v6354_v5  ;;  %6371 = vtanh.f32 %v4255_v7  ;;  %4668 = vst [vmem:[%s7552_s17 + $0x260] sm:$0xff] %v4556_v42  ;;  %v4241_v27 = vmul.f32 0.5, %v4133_v45  ;;  %v4011_v4 = vadd.f32 %v7831_v8, %v7543_v10 }
 0x9f3   : > { %v4542_v48 = vadd.f32 0.5, %v4430_v57  ;;  %v4451_v43 = vmul.f32 0.5, %v6356_v2  ;;  %v6358_v62 = vpop.eup %6357  ;;  %4625 = vst [vmem:[%s7552_s17 + $0x108] sm:$0xff] %v4513_v55  ;;  %6373 = vtanh.f32 %v4198_v13  ;;  %v4013_v20 = vadd.f32 %v7834_v54, %v7537_v63  ;;  %v7910_v41 = vpop.f32.mrb[172].mxu0 }
 0x9f4   : > { %v4519_v1 = vadd.f32 0.5, %v4407_v24  ;;  %v6360_v28 = vpop.eup %6359  ;;  %v4408_v31 = vmul.f32 0.5, %v6358_v62  ;;  %6375 = vtanh.f32 %v4241_v27  ;;  %v4204_v46 = vmul.f32 0.5, %v4009_v40  ;;  %v7913_v30 = vpop.f32.mrb[173].mxu0 }
 0x9f5   : > { %4654 = vst [vmem:[%s7552_s17 + $0x1f0] sm:$0xff] %v4542_v48  ;;  %v4563_v51 = vadd.f32 0.5, %v4451_v43  ;;  %v4437_v36 = vmul.f32 0.5, %v6360_v28  ;;  %v4205_v49 = vmul.f32 0.5, %v4011_v4  ;;  %v4211_v23 = vmul.f32 0.5, %v4013_v20  ;;  %v7918_v54 = vpop.f32.mrb[174].mxu0 }
 0x9f6   : > { %4631 = vst [vmem:[%s7552_s17 + $0x138] sm:$0xff] %v4519_v1  ;;  %v4015_v8 = vadd.f32 %v7839_v0, %v7543_v10  ;;  %v4520_v59 = vadd.f32 0.5, %v4408_v31  ;;  %6377 = vtanh.f32 %v4204_v46  ;;  %v4019_v35 = vadd.f32 %v7855_v6, %v7537_v63  ;;  %v7925_v29 = vpop.f32.mrb[175].mxu0 }
 0x9f7   : > { %v6362_v16 = vpop.eup %6361  ;;  %4675 = vst [vmem:[%s7552_s17 + $0x298] sm:$0xff] %v4563_v51  ;;  %v4021_v14 = vadd.f32 %v7858_v25, %v7543_v10  ;;  %v4549_v52 = vadd.f32 0.5, %v4437_v36  ;;  %6379 = vtanh.f32 %v4205_v49  ;;  %v4023_v25 = vadd.f32 %v7863_v3, %v7537_v63 }
 0x9f8   : > { %v6364_v39 = vpop.eup %6363  ;;  %v4414_v18 = vmul.f32 0.5, %v6362_v16  ;;  %v4212_v0 = vmul.f32 0.5, %v4015_v8  ;;  %4632 = vst [vmem:[%s7552_s17 + $0x140] sm:$0xff] %v4520_v59  ;;  %6381 = vtanh.f32 %v4211_v23  ;;  %v4218_v19 = vmul.f32 0.5, %v4019_v35 }
 0x9f9   : > { %v6366_v58 = vpop.eup %6365  ;;  %v4472_v15 = vmul.f32 0.5, %v6364_v39  ;;  %v4219_v56 = vmul.f32 0.5, %v4021_v14  ;;  %4661 = vst [vmem:[%s7552_s17 + $0x228] sm:$0xff] %v4549_v52  ;;  %v4025_v50 = vadd.f32 %v7867_v60, %v7543_v10  ;;  %v4225_v7 = vmul.f32 0.5, %v4023_v25 }
 0x9fa   : > { %v6368_v38 = vpop.eup %6367  ;;  %v4526_v6 = vadd.f32 0.5, %v4414_v18  ;;  %v4415_v47 = vmul.f32 0.5, %v6366_v58  ;;  %6383 = vtanh.f32 %v4212_v0  ;;  %v4029_v21 = vadd.f32 %v7882_v33, %v7537_v63 }
 0x9fb   : > { %v6370_v12 = vpop.eup %6369  ;;  %v4584_v44 = vadd.f32 0.5, %v4472_v15  ;;  %v4458_v61 = vmul.f32 0.5, %v6368_v38  ;;  %6385 = vtanh.f32 %v4218_v19  ;;  %v4226_v3 = vmul.f32 0.5, %v4025_v50 }
 0x9fc   : > { %v6372_v37 = vpop.eup %6371  ;;  %4638 = vst [vmem:[%s7552_s17 + $0x170] sm:$0xff] %v4526_v6  ;;  %v4527_v17 = vadd.f32 0.5, %v4415_v47  ;;  %v4421_v26 = vmul.f32 0.5, %v6370_v12  ;;  %6387 = vtanh.f32 %v4219_v56  ;;  %v4031_v60 = vadd.f32 %v7889_v9, %v7543_v10 }
 0x9fd   : > { %4696 = vst [vmem:[%s7552_s17 + $0x340] sm:$0xff] %v4584_v44  ;;  %v4570_v32 = vadd.f32 0.5, %v4458_v61  ;;  %v4479_v11 = vmul.f32 0.5, %v6372_v37  ;;  %v6374_v53 = vpop.eup %6373  ;;  %6389 = vtanh.f32 %v4225_v7  ;;  %v4033_v42 = vadd.f32 %v7891_v34, %v7537_v63 }
 0x9fe   : > { %4639 = vst [vmem:[%s7552_s17 + $0x178] sm:$0xff] %v4527_v17  ;;  %v4533_v5 = vadd.f32 0.5, %v4421_v26  ;;  %v6376_v57 = vpop.eup %6375  ;;  %v4422_v2 = vmul.f32 0.5, %v6374_v53  ;;  %6391 = vtanh.f32 %v4226_v3  ;;  %v4232_v55 = vmul.f32 0.5, %v4029_v21 }
 0x9ff   : > { %4682 = vst [vmem:[%s7552_s17 + $0x2d0] sm:$0xff] %v4570_v32  ;;  %v4591_v45 = vadd.f32 0.5, %v4479_v11  ;;  %v4465_v24 = vmul.f32 0.5, %v6376_v57  ;;  %v4233_v33 = vmul.f32 0.5, %v4031_v60  ;;  %v4239_v13 = vmul.f32 0.5, %v4033_v42 }
 0xa00   : > { %4645 = vst [vmem:[%s7552_s17 + $0x1a8] sm:$0xff] %v4533_v5  ;;  %v4035_v48 = vadd.f32 %v7894_v22, %v7543_v10  ;;  %v6378_v43 = vpop.eup %6377  ;;  %v4534_v9 = vadd.f32 0.5, %v4422_v2  ;;  %6393 = vtanh.f32 %v4232_v55  ;;  %v4039_v34 = vadd.f32 %v7910_v41, %v7537_v63 }
 0xa01   : > { %4703 = vst [vmem:[%s7552_s17 + $0x378] sm:$0xff] %v4591_v45  ;;  %v4041_v27 = vadd.f32 %v7913_v30, %v7543_v10  ;;  %v6380_v40 = vpop.eup %6379  ;;  %v4577_v62 = vadd.f32 0.5, %v4465_v24  ;;  %v4428_v1 = vmul.f32 0.5, %v6378_v43  ;;  %6395 = vtanh.f32 %v4233_v33 }
 0xa02   : > { %v4240_v4 = vmul.f32 0.5, %v4035_v48  ;;  %v6382_v20 = vpop.eup %6381  ;;  %4646 = vst [vmem:[%s7552_s17 + $0x1b0] sm:$0xff] %v4534_v9  ;;  %v4429_v28 = vmul.f32 0.5, %v6380_v40  ;;  %6397 = vtanh.f32 %v4239_v13  ;;  %v4246_v22 = vmul.f32 0.5, %v4039_v34 }
 0xa03   : > { %v4247_v51 = vmul.f32 0.5, %v4041_v27  ;;  %4689 = vst [vmem:[%s7552_s17 + $0x308] sm:$0xff] %v4577_v62  ;;  %v4540_v46 = vadd.f32 0.5, %v4428_v1  ;;  %v4435_v41 = vmul.f32 0.5, %v6382_v20  ;;  %v4043_v30 = vadd.f32 %v7918_v54, %v7537_v63 }
 0xa04   : > { %v6384_v31 = vpop.eup %6383  ;;  %6399 = vtanh.f32 %v4240_v4  ;;  %v4541_v49 = vadd.f32 0.5, %v4429_v28  ;;  %v4045_v8 = vadd.f32 %v7925_v29, %v7543_v10 }
 0xa05   : > { %v6386_v36 = vpop.eup %6385  ;;  %v4436_v23 = vmul.f32 0.5, %v6384_v31  ;;  %6401 = vtanh.f32 %v4246_v22  ;;  %4652 = vst [vmem:[%s7552_s17 + $0x1e0] sm:$0xff] %v4540_v46  ;;  %v4547_v59 = vadd.f32 0.5, %v4435_v41  ;;  %v4253_v14 = vmul.f32 0.5, %v4043_v30 }
 0xa06   : > { %v6388_v16 = vpop.eup %6387  ;;  %v4442_v35 = vmul.f32 0.5, %v6386_v36  ;;  %6403 = vtanh.f32 %v4247_v51  ;;  %4653 = vst [vmem:[%s7552_s17 + $0x1e8] sm:$0xff] %v4541_v49  ;;  %v4254_v54 = vmul.f32 0.5, %v4045_v8 }
 0xa07   : > { %v4548_v39 = vadd.f32 0.5, %v4436_v23  ;;  %v4443_v63 = vmul.f32 0.5, %v6388_v16  ;;  %v6390_v52 = vpop.eup %6389  ;;  %4659 = vst [vmem:[%s7552_s17 + $0x218] sm:$0xff] %v4547_v59  ;;  %6405 = vtanh.f32 %v4253_v14 }
 0xa08   : > { %v4554_v18 = vadd.f32 0.5, %v4442_v35  ;;  %v6392_v0 = vpop.eup %6391  ;;  %v4449_v29 = vmul.f32 0.5, %v6390_v52  ;;  %6407 = vtanh.f32 %v4254_v54 }
 0xa09   : > { %4660 = vst [vmem:[%s7552_s17 + $0x220] sm:$0xff] %v4548_v39  ;;  %v4555_v10 = vadd.f32 0.5, %v4443_v63  ;;  %v4450_v58 = vmul.f32 0.5, %v6392_v0 }
 0xa0a   : > { %4666 = vst [vmem:[%s7552_s17 + $0x250] sm:$0xff] %v4554_v18  ;;  %v6394_v15 = vpop.eup %6393  ;;  %v4561_v19 = vadd.f32 0.5, %v4449_v29 }
 0xa0b   : > { %4667 = vst [vmem:[%s7552_s17 + $0x258] sm:$0xff] %v4555_v10  ;;  %v6396_v56 = vpop.eup %6395  ;;  %v4562_v38 = vadd.f32 0.5, %v4450_v58  ;;  %v4456_v6 = vmul.f32 0.5, %v6394_v15 }
 0xa0c   : > { %v6398_v47 = vpop.eup %6397  ;;  %4673 = vst [vmem:[%s7552_s17 + $0x288] sm:$0xff] %v4561_v19  ;;  %v4457_v25 = vmul.f32 0.5, %v6396_v56 }
 0xa0d   : > { %4674 = vst [vmem:[%s7552_s17 + $0x290] sm:$0xff] %v4562_v38  ;;  %v4568_v44 = vadd.f32 0.5, %v4456_v6  ;;  %v4463_v61 = vmul.f32 0.5, %v6398_v47 }
 0xa0e   : > { %v6400_v12 = vpop.eup %6399  ;;  %v4569_v37 = vadd.f32 0.5, %v4457_v25 }
 0xa0f   : > { %v6402_v50 = vpop.eup %6401  ;;  %v4464_v17 = vmul.f32 0.5, %v6400_v12  ;;  %4680 = vst [vmem:[%s7552_s17 + $0x2c0] sm:$0xff] %v4568_v44  ;;  %v4575_v7 = vadd.f32 0.5, %v4463_v61 }
 0xa10   : > { %v6404_v26 = vpop.eup %6403  ;;  %v4470_v32 = vmul.f32 0.5, %v6402_v50  ;;  %4681 = vst [vmem:[%s7552_s17 + $0x2c8] sm:$0xff] %v4569_v37 }
 0xa11   : > { %v4576_v11 = vadd.f32 0.5, %v4464_v17  ;;  %v4471_v3 = vmul.f32 0.5, %v6404_v26  ;;  %v6406_v21 = vpop.eup %6405  ;;  %4687 = vst [vmem:[%s7552_s17 + $0x2f8] sm:$0xff] %v4575_v7 }
 0xa12   : > { %v4582_v53 = vadd.f32 0.5, %v4470_v32  ;;  %v6408_v5 = vpop.eup %6407  ;;  %v4477_v42 = vmul.f32 0.5, %v6406_v21 }
 0xa13   : > { %4688 = vst [vmem:[%s7552_s17 + $0x300] sm:$0xff] %v4576_v11  ;;  %v4583_v60 = vadd.f32 0.5, %v4471_v3  ;;  %v4478_v57 = vmul.f32 0.5, %v6408_v5 }
 0xa14   : > { %4694 = vst [vmem:[%s7552_s17 + $0x330] sm:$0xff] %v4582_v53  ;;  %v4589_v45 = vadd.f32 0.5, %v4477_v42 }
 0xa15   : > { %4695 = vst [vmem:[%s7552_s17 + $0x338] sm:$0xff] %v4583_v60  ;;  %v4590_v2 = vadd.f32 0.5, %v4478_v57 }
 0xa16   : > { %4701 = vst [vmem:[%s7552_s17 + $0x368] sm:$0xff] %v4589_v45 }
 0xa17   : > { %4702 = vst [vmem:[%s7552_s17 + $0x370] sm:$0xff] %v4590_v2 }
 0xa18   : > { %6704 = shalt.err (!%p6701_p3)
}
 0xa19   : > { %s6705_s24 = scalar_lea.hbm %s7976_s2, 14336  ;;  %s6709_s17 = scalar_lea.hbm %s8107_s5, 28672 }
 0xa1a   : > { %p6706_p5 = scmp.ne.s32.totalorder %s7976_s2, %s6705_s24  ;;  %p6710_p4 = scmp.lt.u32.totalorder %s7976_s2, %s8107_s5 }
 0xa1b   : > { %p6711_p12 = scmp.lt.u32.totalorder %s6709_s17, %s6705_s24  ;;  %p6713_p13 = scmp.lt.u32.totalorder %s6705_s24, %s7976_s2 }
 0xa1c   : > { %p6707_p9 = pnand %p6706_p5, %p8108_p0 }
 0xa1d   : > { %p6712_p1 = por %p6711_p12, %p6710_p4 }
 0xa1e   : > { %p6708_p7 = pneg %p6707_p9 }
 0xa1f   : > { %p6714_p2 = por %p6713_p13, %p6712_p1 }
 0xa21   : > { %p6715_p8 = pnand %p6714_p2, %p6708_p7 }
 0xa23   : > { %6718 = shalt.err (!%p6715_p8)
}
 0xa24   : > { %s6795_s27 = smov 896   ;;  %s6796_s22 = smov 56  }
 0xa25   : > { %5807 = dma.vmem_to_hbm [thread:$0]  (%p8108_p0), %s7978_s18, 14336, %s7976_s2, %s4705_s11, %s6795_s27, %s6795_s27, %s6796_s22  }
 0xa26 PF: > { %s4734_s29 = sand.u32 1, %s6765_s0   ;;  %p8109_p6 = scmp.ne.s32.totalorder %s8083_s25, 0 }
 0xa27   : > { %p8110_p10 = scmp.ge.s32.totalorder %s6777_s21, 2  ;;  %s4735_s4 = scalar_lea.sflag [#allocation4], %s4734_s29 }
 0xa29   : > { %p5842_p11 = pnand %p8110_p10, %p8109_p6 }
 0xa2b   : > { %6760 = dma.done.wait (!%p5842_p11), %s4735_s4, 14336  }
 0xa2c   : > { %6762 = vsyncadd (!%p5842_p11), %s4735_s4, 4294952960  ;;  %p37_p3 = scmp.ge.s32.totalorder %s7154_s19, 4   ;;  %s8111_s0 = smov %s6769_s30 }
 0xa2d   : > { %s8112_s30 = smov %s6773_s20  ;;  %s8113_s20 = smov %s7166_s3 }
 0xa2e   : > { %s8114_s21 = smov %s7154_s19  ;;  %39 = sbr.rel (!%p37_p3) target bundleno = 27 (0x1b), region = 177 }
 0xa35   :  { %4740 = vsyncpa [#allocation3], 1 }
 0xa36   :  { %4742 = vsyncpa [#allocation3 + $0x1], 1 }
 0xa37   :  { %4743 = vsyncpa [#allocation6], 1 }
 0xa38   :  { %4744 = vsyncpa [#allocation9], 1 }
 0xa39   :  { %4745 = vsyncpa [#allocation12], 1 }
 0xa3a   :  { %4746 = vsyncpa [#allocation15], 1 }
 0xa3b   :  { %4747 = vsyncpa [#allocation18], 1 }
 0xa3c   :  { %4748 = vsyncpa [#allocation4], 1 }
 0xa3d   :  { %4750 = vsyncpa [#allocation4 + $0x1], 1 }

</bundles_post_ra>
